<compile_context>
chip_gen: v5e
topology: v5e:2x2
jax: 0.10.0
libtpu: 0.0.40
codegen_flags: <defaults>
</compile_context>

<pallas_src>
import jax
import jax.numpy as jnp
from jax.experimental import pallas as pl
from jax.experimental.pallas import tpu as pltpu

HIDDEN = 768            # config.hidden_size (the module hard-codes 768-d features)
NUM_CLASSES = 2
CLS_PAD = 128           # pad the class dim of W2/b2 to one full lane width (MXU)
DEFAULT_TILE_M = 512    # batch rows per grid step (fits v5e 16 MiB scoped VMEM)
VMEM_LIMIT_BYTES = 32 * 1024 * 1024


def _round_up(x, m):
    return (x + m - 1) // m * m


def _choose_tile_m(n):
    """Pick the batch tile: as large as possible (<= DEFAULT_TILE_M) while
    keeping >= 2 grid steps when the batch allows it (v7x megacore sharding)."""
    half = _round_up(max(pl.cdiv(n, 2), 1), 8)
    return max(8, min(DEFAULT_TILE_M, half))


def _head_kernel(x_ref, w1_ref, b1_ref, w2_ref, b2_ref, logits_ref):
    """Linear(2H->H) + tanh + Linear(H->2); stores only the 2 real logits."""
    # TODO(synk): dropout is identity at inference; training-mode dropout not modeled.
    x = x_ref[...].astype(jnp.bfloat16)                       # f32 tile -> bf16 in VMEM
    h = (jnp.dot(x, w1_ref[...], preferred_element_type=jnp.float32)
         + b1_ref[...])                                       # f32 (TM, H)
    h = jnp.tanh(h.astype(jnp.bfloat16))                      # bf16 tanh -> feeds MXU directly
    logits = (jnp.dot(h, w2_ref[...], preferred_element_type=jnp.float32)
              + b2_ref[...])                                  # f32 (TM, CLS_PAD)
    logits_ref[...] = logits[:, :NUM_CLASSES]                 # narrow (TM, 2) store


@jax.jit
def _run_head(x2h, w1, b1, w2p, b2p):
    n = x2h.shape[0]
    tile_m = _choose_tile_m(n)
    grid = (pl.cdiv(n, tile_m),)
    in_specs = [
        pl.BlockSpec((tile_m, 2 * HIDDEN), lambda i: (i, 0)),  # x tile (pipelined, f32)
        pl.BlockSpec((2 * HIDDEN, HIDDEN), lambda i: (0, 0)),  # w1 (resident bf16)
        pl.BlockSpec((1, HIDDEN),          lambda i: (0, 0)),  # b1 (resident f32)
        pl.BlockSpec((HIDDEN, CLS_PAD),    lambda i: (0, 0)),  # w2 padded (resident bf16)
        pl.BlockSpec((1, CLS_PAD),         lambda i: (0, 0)),  # b2 padded (resident f32)
    ]
    out_spec = pl.BlockSpec((tile_m, NUM_CLASSES), lambda i: (i, 0))
    return pl.pallas_call(
        _head_kernel,
        out_shape=jax.ShapeDtypeStruct((n, NUM_CLASSES), jnp.float32),
        grid=grid,
        in_specs=in_specs,
        out_specs=out_spec,
        compiler_params=pltpu.CompilerParams(
            dimension_semantics=("parallel",),
            vmem_limit_bytes=VMEM_LIMIT_BYTES),
    )(x2h, w1, b1, w2p, b2p)


def init_params(key, hidden=HIDDEN):
    """Deterministic synthetic weights for RobertaClassificationHead."""
    k1, k2, k3, k4 = jax.random.split(key, 4)
    # stored as (in_features, out_features)  (transposed vs. torch.nn.Linear)
    w1 = jax.random.normal(k1, (2 * hidden, hidden), jnp.float32) * 0.02
    b1 = jax.random.normal(k2, (1, hidden), jnp.float32) * 0.02
    w2 = jax.random.normal(k3, (hidden, NUM_CLASSES), jnp.float32) * 0.02
    b2 = jax.random.normal(k4, (1, NUM_CLASSES), jnp.float32) * 0.02
    return {"w1": w1, "b1": b1, "w2": w2, "b2": b2}


def prepare_head_params(params):
    """One-time lane padding + bf16 cast of the head weights (kernel layout)."""
    w2p = (jnp.zeros((HIDDEN, CLS_PAD), jnp.float32)
           .at[:, :NUM_CLASSES].set(params["w2"]))
    b2p = (jnp.zeros((1, CLS_PAD), jnp.float32)
           .at[:, :NUM_CLASSES].set(params["b2"]))
    return {
        "w1": params["w1"].astype(jnp.bfloat16),
        "b1": params["b1"].astype(jnp.float32),
        "w2p": w2p.astype(jnp.bfloat16),
        "b2p": b2p,                            # f32 (padded class lanes are 0, sliced away)
    }


def classification_head(features, prepared):
    """RobertaClassificationHead.forward (inference): (2N, H) -> logits (N, 2)."""
    h = features.shape[-1]
    x2h = features.reshape(-1, 2 * h).astype(jnp.float32)      # (N, 2H)
    return _run_head(x2h, prepared["w1"], prepared["b1"],
                     prepared["w2p"], prepared["b2p"])


def model_forward(features, prepared, labels=None):
    """Surrounding Model.forward semantics: softmax / CE on the (N, 2) logits."""
    logits = classification_head(features, prepared)
    prob = jax.nn.softmax(logits, axis=-1)                     # exact, tiny (N, 2)
    if labels is None:
        return prob
    logz = jax.nn.logsumexp(logits, axis=-1)
    nll = logz - jnp.take_along_axis(logits, labels[:, None], axis=-1)[:, 0]
    return jnp.mean(nll), prob


if __name__ == "__main__":
    key = jax.random.PRNGKey(0)
    kf, kp, kl, kf2 = jax.random.split(key, 4)

    params = init_params(kp)
    prepared = prepare_head_params(params)

    def reference_logits(features, bf16=True):
        x2h = features.reshape(-1, 2 * HIDDEN)
        if bf16:   # matches the kernel's bf16 matmul inputs / bf16 tanh, f32 accum
            xb = x2h.astype(jnp.bfloat16)
            h = (jnp.dot(xb, params["w1"].astype(jnp.bfloat16),
                         preferred_element_type=jnp.float32) + params["b1"])
            h = jnp.tanh(h.astype(jnp.bfloat16))
            return (jnp.dot(h, params["w2"].astype(jnp.bfloat16),
                            preferred_element_type=jnp.float32) + params["b2"])
        h = jnp.tanh(x2h @ params["w1"] + params["b1"])
        return h @ params["w2"] + params["b2"]

    # ---- small demo batch (exact-fit grid) ----
    num_pairs = 8                                   # N pairs -> 2*N feature rows
    features = jax.random.normal(kf, (2 * num_pairs, HIDDEN), jnp.float32)
    labels = jax.random.randint(kl, (num_pairs,), 0, NUM_CLASSES)

    logits = classification_head(features, prepared)
    loss, prob = model_forward(features, prepared, labels=labels)
    jax.block_until_ready((logits, loss, prob))

    assert logits.shape == (num_pairs, NUM_CLASSES)
    assert prob.shape == (num_pairs, NUM_CLASSES)
    assert bool(jnp.all(jnp.isfinite(logits))) and bool(jnp.isfinite(loss))
    assert jnp.allclose(jnp.sum(prob, axis=-1), 1.0, atol=1e-5)
    assert jnp.allclose(logits, reference_logits(features), atol=2e-2, rtol=2e-2)
    assert jnp.allclose(logits, reference_logits(features, bf16=False),
                        atol=5e-2, rtol=5e-2)

    # ---- ragged batch: exercises multi-step grid + partial last block ----
    num_pairs2 = 13
    features2 = jax.random.normal(kf2, (2 * num_pairs2, HIDDEN), jnp.float32)
    logits2 = classification_head(features2, prepared)
    jax.block_until_ready(logits2)
    assert logits2.shape == (num_pairs2, NUM_CLASSES)
    assert jnp.allclose(logits2, reference_logits(features2), atol=2e-2, rtol=2e-2)

    print("KERNEL_OK")
</pallas_src>

<mosaic_0001>
module attributes {stable_mosaic.version = 11 : i64} {
  func.func @_head_kernel(%arg0: i32, %arg1: memref<8x1536xf32, #tpu.memory_space<vmem>>, %arg2: memref<1536x768xbf16, #tpu.memory_space<vmem>>, %arg3: memref<1x768xf32, #tpu.memory_space<vmem>>, %arg4: memref<768x128xbf16, #tpu.memory_space<vmem>>, %arg5: memref<1x128xf32, #tpu.memory_space<vmem>>, %arg6: memref<8x2xf32, #tpu.memory_space<vmem>>) attributes {dimension_semantics = [#tpu.dimension_semantics<parallel>], iteration_bounds = array<i64: 1>, scalar_prefetch = 0 : i64, scratch_operands = 0 : i64, tpu.core_type = #tpu.core_type<tc>, window_params = [{transform_indices = @transform_0, window_bounds = array<i64: 8, 1536>}, {pipeline_mode = #tpu.pipeline_mode<synchronous>, transform_indices = @transform_1, window_bounds = array<i64: 1536, 768>}, {pipeline_mode = #tpu.pipeline_mode<synchronous>, transform_indices = @transform_2, window_bounds = array<i64: 1, 768>}, {pipeline_mode = #tpu.pipeline_mode<synchronous>, transform_indices = @transform_3, window_bounds = array<i64: 768, 128>}, {pipeline_mode = #tpu.pipeline_mode<synchronous>, transform_indices = @transform_4, window_bounds = array<i64: 1, 128>}, {transform_indices = @transform_5, window_bounds = array<i64: 8, 2>}]} {
    %c0 = arith.constant 0 : index
    %c0_0 = arith.constant 0 : index
    %0 = vector.load %arg1[%c0, %c0_0] : memref<8x1536xf32, #tpu.memory_space<vmem>>, vector<8x1536xf32>
    %1 = arith.truncf %0 : vector<8x1536xf32> to vector<8x1536xbf16>
    %c0_1 = arith.constant 0 : index
    %c0_2 = arith.constant 0 : index
    %2 = vector.load %arg2[%c0_1, %c0_2] : memref<1536x768xbf16, #tpu.memory_space<vmem>>, vector<1536x768xbf16>
    %cst = arith.constant dense<0.000000e+00> : vector<8x768xf32>
    %3 = tpu.matmul %1, %2, %cst {dimension_numbers = #tpu.dot_dimension_numbers<[1], [0], [0], [1], [0, 0, 1, 1], [], []>} : vector<8x1536xbf16>, vector<1536x768xbf16>, vector<8x768xf32> -> vector<8x768xf32>
    %c0_3 = arith.constant 0 : index
    %c0_4 = arith.constant 0 : index
    %4 = vector.load %arg3[%c0_3, %c0_4] : memref<1x768xf32, #tpu.memory_space<vmem>>, vector<1x768xf32>
    %5 = vector.broadcast %4 : vector<1x768xf32> to vector<8x768xf32>
    %6 = arith.addf %3, %5 : vector<8x768xf32>
    %7 = arith.truncf %6 : vector<8x768xf32> to vector<8x768xbf16>
    %8 = math.tanh %7 : vector<8x768xbf16>
    %c0_5 = arith.constant 0 : index
    %c0_6 = arith.constant 0 : index
    %9 = vector.load %arg4[%c0_5, %c0_6] : memref<768x128xbf16, #tpu.memory_space<vmem>>, vector<768x128xbf16>
    %cst_7 = arith.constant dense<0.000000e+00> : vector<8x128xf32>
    %10 = tpu.matmul %8, %9, %cst_7 {dimension_numbers = #tpu.dot_dimension_numbers<[1], [0], [0], [1], [0, 0, 1, 1], [], []>} : vector<8x768xbf16>, vector<768x128xbf16>, vector<8x128xf32> -> vector<8x128xf32>
    %c0_8 = arith.constant 0 : index
    %c0_9 = arith.constant 0 : index
    %11 = vector.load %arg5[%c0_8, %c0_9] : memref<1x128xf32, #tpu.memory_space<vmem>>, vector<1x128xf32>
    %12 = vector.broadcast %11 : vector<1x128xf32> to vector<8x128xf32>
    %13 = arith.addf %10, %12 : vector<8x128xf32>
    %14 = vector.extract_strided_slice %13 {offsets = [0, 0], sizes = [8, 2], strides = [1, 1]} : vector<8x128xf32> to vector<8x2xf32>
    %c0_10 = arith.constant 0 : index
    %c0_11 = arith.constant 0 : index
    %15 = vector.load %arg6[%c0_10, %c0_11] : memref<8x2xf32, #tpu.memory_space<vmem>>, vector<8x2xf32>
    tpu.vector_store %arg6[%c0_10, %c0_11], %14 {strides = array<i32>} : memref<8x2xf32, #tpu.memory_space<vmem>>, vector<8x2xf32>,
    return
  }
  func.func @transform_0(%arg0: i32) -> (i32, i32) {
    %c0_i32 = arith.constant 0 : i32
    %c0_i32_0 = arith.constant 0 : i32
    return %arg0, %c0_i32 : i32, i32
  }
  func.func @transform_1(%arg0: i32) -> (i32, i32) {
    %c0_i32 = arith.constant 0 : i32
    %c0_i32_0 = arith.constant 0 : i32
    %c0_i32_1 = arith.constant 0 : i32
    return %c0_i32, %c0_i32_0 : i32, i32
  }
  func.func @transform_2(%arg0: i32) -> (i32, i32) {
    %c0_i32 = arith.constant 0 : i32
    %c0_i32_0 = arith.constant 0 : i32
    %c0_i32_1 = arith.constant 0 : i32
    return %c0_i32, %c0_i32_0 : i32, i32
  }
  func.func @transform_3(%arg0: i32) -> (i32, i32) {
    %c0_i32 = arith.constant 0 : i32
    %c0_i32_0 = arith.constant 0 : i32
    %c0_i32_1 = arith.constant 0 : i32
    return %c0_i32, %c0_i32_0 : i32, i32
  }
  func.func @transform_4(%arg0: i32) -> (i32, i32) {
    %c0_i32 = arith.constant 0 : i32
    %c0_i32_0 = arith.constant 0 : i32
    %c0_i32_1 = arith.constant 0 : i32
    return %c0_i32, %c0_i32_0 : i32, i32
  }
  func.func @transform_5(%arg0: i32) -> (i32, i32) {
    %c0_i32 = arith.constant 0 : i32
    %c0_i32_0 = arith.constant 0 : i32
    return %arg0, %c0_i32 : i32, i32
  }
}

</mosaic_0001>

<bundles_post_ra>
// kernel: _run_head.1
= control target key start
LH: loop header
LB: loop body
LE: loop exit
PB: predicated region body
PF: predicated region fallthrough
CT: control target
= control target key end

     0   :  { %10 = vsyncpa [#allocation3], 0  ;;  %s8522_s0 = inlined_call_operand.hbm [shape: f32[8,1536], index: 0, kind: input, shape index: {}]   ;;  %s8523_s1 = inlined_call_operand.hbm [shape: bf16[1536,768], index: 1, kind: input, shape index: {}]   ;;  %s8524_s2 = inlined_call_operand.hbm [shape: f32[1,768], index: 2, kind: input, shape index: {}]   ;;  %s8525_s3 = inlined_call_operand.hbm [shape: bf16[768,128], index: 3, kind: input, shape index: {}]   ;;  %s8526_s4 = inlined_call_operand.hbm [shape: f32[1,128], index: 4, kind: input, shape index: {}]   ;;  %s8527_s5 = inlined_call_operand.vmem [shape: f32[8,2], index: 5, kind: output, shape index: {}]  }
   0x1   :  { %11 = vsyncpa [#allocation5], 0  ;;  %s28_s20 = sshll.u32 %s8523_s1, 4  ;;  %s29_s20 = int_to_ptr.hbm [resolvable:$true] %s28_s20 }
   0x2   :  { %12 = vsyncpa [#allocation8], 0  ;;  %s8291_s21 = smov [#allocation4]   ;;  %s52_s25 = sshll.u32 %s8525_s3, 4  ;;  %s53_s25 = int_to_ptr.hbm [resolvable:$true] %s52_s25 }
   0x3   :  { %s30_s22 = sshll.u32 %s8291_s21, 4  ;;  %s8292_s26 = smov 384   ;;  %s31_s22 = int_to_ptr.vmem [resolvable:$true] %s30_s22 }
   0x4   :  { %s8293_s27 = smov 24   ;;  %s8294_s28 = smov [#allocation7]  }
   0x5   :  { %36 = dma.hbm_to_vmem [thread:$0]  %s29_s20, 73728, %s31_s22, [#allocation5], %s8292_s26, %s8292_s26, %s8293_s27  }
   0x6   :  { %s54_s29 = sshll.u32 %s8294_s28, 4  ;;  %s8295_s30 = smov 64   ;;  %s55_s29 = int_to_ptr.vmem [resolvable:$true] %s54_s29 }
   0x7   :  { %s8296_s6 = smov 4   ;;  %s18_s8 = sshll.u32 %s8522_s0, 4  ;;  %s19_s8 = int_to_ptr.hbm [resolvable:$true] %s18_s8 }
   0x8   :  { %60 = dma.hbm_to_vmem [thread:$0]  %s53_s25, 6144, %s55_s29, [#allocation8], %s8295_s30, %s8295_s30, %s8296_s6  }
   0x9   :  { %s8297_s9 = smov [#allocation2]   ;;  %s42_s12 = sshll.u32 %s8524_s2, 4  ;;  %s43_s12 = int_to_ptr.hbm [resolvable:$true] %s42_s12 }
   0xa   :  { %s20_s10 = sshll.u32 %s8297_s9, 4  ;;  %s8298_s13 = smov [#allocation6]   ;;  %s21_s10 = int_to_ptr.vmem [resolvable:$true] %s20_s10 }
   0xb   :  { %23 = dma.hbm_to_vmem [thread:$0]  %s19_s8, 1536, %s21_s10, [#allocation3]  }
   0xc   :  { %s44_s14 = sshll.u32 %s8298_s13, 4  ;;  %s66_s17 = sshll.u32 %s8526_s4, 4  ;;  %s45_s14 = int_to_ptr.vmem [resolvable:$true] %s44_s14  ;;  %s67_s17 = int_to_ptr.hbm [resolvable:$true] %s66_s17 }
   0xd   :  { %47 = dma.hbm_to_vmem [thread:$0]  %s43_s12, 96, %s45_s14, [#allocation5]  }
   0xe   :  { %s8299_s0 = smov [#allocation9]  }
   0xf   :  { %s68_s18 = sshll.u32 %s8299_s0, 4  ;;  %s69_s18 = int_to_ptr.vmem [resolvable:$true] %s68_s18 }
  0x10   :  { %71 = dma.hbm_to_vmem [thread:$0]  %s67_s17, 16, %s69_s18, [#allocation8]  }
  0x11   :  { %8285 = dma.done.wait [#allocation3], 1536  }
  0x12   :  { %8286 = vsyncadd [#allocation3], 4294965760 }
  0x13   :  { %8287 = dma.done.wait [#allocation5], 73824  }
  0x14   :  { %8288 = vsyncadd [#allocation5], 4294893472 }
  0x15   :  { %8289 = dma.done.wait [#allocation8], 6160  }
  0x16   :  { %8290 = vsyncadd [#allocation8], 4294961136  ;;  %v5191_v0 = vld [vmem:[#allocation4 + $0x150] sm:$0xf]  ;;  %v7562_v1 = vld [vmem:[#allocation4 + $0x164] sm:$0xf0] }
  0x17   :  { %v5383_v2 = vld [vmem:[#allocation4 + $0x2d0] sm:$0xf]  ;;  %v5192_v3 = vor.u32 %v7562_v1, %v5191_v0  ;;  %v7610_v4 = vld [vmem:[#allocation4 + $0x2e4] sm:$0xf0]  ;;  %v5167_v11 = vld [vmem:[#allocation4 + $0x120] sm:$0xf] }
  0x18   :  { %v5575_v5 = vld [vmem:[#allocation4 + $0x450] sm:$0xf]  ;;  %v7658_v6 = vld [vmem:[#allocation4 + $0x464] sm:$0xf0]  ;;  %v5384_v7 = vor.u32 %v7610_v4, %v5383_v2  ;;  %v7556_v13 = vld [vmem:[#allocation4 + $0x134] sm:$0xf0] }
  0x19   :  { %v5576_v8 = vor.u32 %v7658_v6, %v5575_v5  ;;  %v5767_v9 = vld [vmem:[#allocation4 + $0x5d0] sm:$0xf]  ;;  %v7706_v10 = vld [vmem:[#allocation4 + $0x5e4] sm:$0xf0]  ;;  %3586 = vmatpush.bf16.msra.mxu0 %v5192_v3  ;;  %v5359_v14 = vld [vmem:[#allocation4 + $0x2a0] sm:$0xf]  ;;  %v5168_v16 = vor.u32 %v7556_v13, %v5167_v11 }
  0x1a   :  { %v5768_v12 = vor.u32 %v7706_v10, %v5767_v9  ;;  %v7604_v15 = vld [vmem:[#allocation4 + $0x2b4] sm:$0xf0]  ;;  %3599 = vmatpush.bf16.msra.mxu1 %v5384_v7  ;;  %v5551_v18 = vld [vmem:[#allocation4 + $0x420] sm:$0xf]  ;;  %v5143_v23 = vld [vmem:[#allocation4 + $0xf0] sm:$0xf] }
  0x1b   :  { %3612 = vmatpush.bf16.msra.mxu2 %v5576_v8  ;;  %v5360_v17 = vor.u32 %v7604_v15, %v5359_v14  ;;  %v7652_v19 = vld [vmem:[#allocation4 + $0x434] sm:$0xf0]  ;;  %v5743_v20 = vld [vmem:[#allocation4 + $0x5a0] sm:$0xf]  ;;  %v7550_v24 = vld [vmem:[#allocation4 + $0x104] sm:$0xf0] }
  0x1c   :  { %3625 = vmatpush.bf16.msra.mxu3 %v5768_v12  ;;  %v5552_v21 = vor.u32 %v7652_v19, %v5551_v18  ;;  %v7700_v22 = vld [vmem:[#allocation4 + $0x5b4] sm:$0xf0]  ;;  %v5335_v26 = vld [vmem:[#allocation4 + $0x270] sm:$0xf]  ;;  %v7598_v27 = vld [vmem:[#allocation4 + $0x284] sm:$0xf0]  ;;  %v5144_v29 = vor.u32 %v7550_v24, %v5143_v23 }
  0x1d   :  { %v5744_v25 = vor.u32 %v7700_v22, %v5743_v20  ;;  %v5527_v28 = vld [vmem:[#allocation4 + $0x3f0] sm:$0xf]  ;;  %3587 = vmatpush.bf16.msra.mxu0 %v5168_v16  ;;  %v7646_v30 = vld [vmem:[#allocation4 + $0x404] sm:$0xf0]  ;;  %v5336_v33 = vor.u32 %v7598_v27, %v5335_v26  ;;  %v5119_v35 = vld [vmem:[#allocation4 + $0xc0] sm:$0xf] }
  0x1e   :  { %v5719_v31 = vld [vmem:[#allocation4 + $0x570] sm:$0xf]  ;;  %v7694_v32 = vld [vmem:[#allocation4 + $0x584] sm:$0xf0]  ;;  %3600 = vmatpush.bf16.msra.mxu1 %v5360_v17  ;;  %v5528_v34 = vor.u32 %v7646_v30, %v5527_v28  ;;  %v7544_v36 = vld [vmem:[#allocation4 + $0xd4] sm:$0xf0] }
  0x1f   :  { %3613 = vmatpush.bf16.msra.mxu2 %v5552_v21  ;;  %v5311_v37 = vld [vmem:[#allocation4 + $0x240] sm:$0xf]  ;;  %v5720_v38 = vor.u32 %v7694_v32, %v5719_v31  ;;  %v7592_v39 = vld [vmem:[#allocation4 + $0x254] sm:$0xf0]  ;;  %v5120_v44 = vor.u32 %v7544_v36, %v5119_v35  ;;  %v5095_v47 = vld [vmem:[#allocation4 + $0x90] sm:$0xf] }
  0x20   :  { %3626 = vmatpush.bf16.msra.mxu3 %v5744_v25  ;;  %v5503_v40 = vld [vmem:[#allocation4 + $0x3c0] sm:$0xf]  ;;  %v7640_v41 = vld [vmem:[#allocation4 + $0x3d4] sm:$0xf0]  ;;  %v5312_v45 = vor.u32 %v7592_v39, %v5311_v37  ;;  %v7538_v48 = vld [vmem:[#allocation4 + $0xa4] sm:$0xf0] }
  0x21   :  { %v5695_v42 = vld [vmem:[#allocation4 + $0x540] sm:$0xf]  ;;  %v7688_v43 = vld [vmem:[#allocation4 + $0x554] sm:$0xf0]  ;;  %3588 = vmatpush.bf16.msra.mxu0 %v5144_v29  ;;  %v5504_v46 = vor.u32 %v7640_v41, %v5503_v40  ;;  %v5287_v49 = vld [vmem:[#allocation4 + $0x210] sm:$0xf]  ;;  %v5096_v56 = vor.u32 %v7538_v48, %v5095_v47 }
  0x22   :  { %3601 = vmatpush.bf16.msra.mxu1 %v5336_v33  ;;  %v5696_v50 = vor.u32 %v7688_v43, %v5695_v42  ;;  %v7586_v51 = vld [vmem:[#allocation4 + $0x224] sm:$0xf0]  ;;  %v5479_v52 = vld [vmem:[#allocation4 + $0x390] sm:$0xf]  ;;  %v5071_v59 = vld [vmem:[#allocation4 + $0x60] sm:$0xf] }
  0x23   :  { %3614 = vmatpush.bf16.msra.mxu2 %v5528_v34  ;;  %v7634_v53 = vld [vmem:[#allocation4 + $0x3a4] sm:$0xf0]  ;;  %v5671_v54 = vld [vmem:[#allocation4 + $0x510] sm:$0xf]  ;;  %v5288_v57 = vor.u32 %v7586_v51, %v5287_v49  ;;  %v7532_v60 = vld [vmem:[#allocation4 + $0x74] sm:$0xf0] }
  0x24   :  { %3627 = vmatpush.bf16.msra.mxu3 %v5720_v38  ;;  %v7682_v55 = vld [vmem:[#allocation4 + $0x524] sm:$0xf0]  ;;  %v5480_v58 = vor.u32 %v7634_v53, %v5479_v52  ;;  %v5263_v61 = vld [vmem:[#allocation4 + $0x1e0] sm:$0xf]  ;;  %v7580_v63 = vld [vmem:[#allocation4 + $0x1f4] sm:$0xf0]  ;;  %v5072_v4 = vor.u32 %v7532_v60, %v5071_v59 }
  0x25   :  { %3589 = vmatpush.bf16.msra.mxu0 %v5120_v44  ;;  %v5672_v62 = vor.u32 %v7682_v55, %v5671_v54  ;;  %v5455_v0 = vld [vmem:[#allocation4 + $0x360] sm:$0xf]  ;;  %v7628_v1 = vld [vmem:[#allocation4 + $0x374] sm:$0xf0]  ;;  %v5264_v5 = vor.u32 %v7580_v63, %v5263_v61  ;;  %v5047_v7 = vld [vmem:[#allocation4 + $0x30] sm:$0xf] }
  0x26   :  { %3602 = vmatpush.bf16.msra.mxu1 %v5312_v45  ;;  %v5647_v2 = vld [vmem:[#allocation4 + $0x4e0] sm:$0xf]  ;;  %v7676_v3 = vld [vmem:[#allocation4 + $0x4f4] sm:$0xf0]  ;;  %v5456_v6 = vor.u32 %v7628_v1, %v5455_v0  ;;  %v7526_v8 = vld [vmem:[#allocation4 + $0x44] sm:$0xf0] }
  0x27   :  { %3615 = vmatpush.bf16.msra.mxu2 %v5504_v46  ;;  %v5239_v9 = vld [vmem:[#allocation4 + $0x1b0] sm:$0xf]  ;;  %v5648_v10 = vor.u32 %v7676_v3, %v5647_v2  ;;  %v7574_v11 = vld [vmem:[#allocation4 + $0x1c4] sm:$0xf0]  ;;  %v5048_v16 = vor.u32 %v7526_v8, %v5047_v7  ;;  %v5023_v17 = vld [vmem:[#allocation4] sm:$0xf] }
  0x28   :  { %3628 = vmatpush.bf16.msra.mxu3 %v5696_v50  ;;  %v5431_v12 = vld [vmem:[#allocation4 + $0x330] sm:$0xf]  ;;  %v7622_v13 = vld [vmem:[#allocation4 + $0x344] sm:$0xf0]  ;;  %v7520_v18 = vld [vmem:[#allocation4 + $0x14] sm:$0xf0]  ;;  %v5240_v19 = vor.u32 %v7574_v11, %v5239_v9 }
  0x29   :  { %3590 = vmatpush.bf16.msra.mxu0 %v5096_v56  ;;  %v5623_v14 = vld [vmem:[#allocation4 + $0x4b0] sm:$0xf]  ;;  %v7670_v15 = vld [vmem:[#allocation4 + $0x4c4] sm:$0xf0]  ;;  %v5432_v20 = vor.u32 %v7622_v13, %v5431_v12  ;;  %v5215_v21 = vld [vmem:[#allocation4 + $0x180] sm:$0xf]  ;;  %v5024_v31 = vor.u32 %v7520_v18, %v5023_v17 }
  0x2a   :  { %3603 = vmatpush.bf16.msra.mxu1 %v5288_v57  ;;  %v7568_v22 = vld [vmem:[#allocation4 + $0x194] sm:$0xf0]  ;;  %v5407_v23 = vld [vmem:[#allocation4 + $0x300] sm:$0xf]  ;;  %v5624_v24 = vor.u32 %v7670_v15, %v5623_v14  ;;  %v5959_v28 = vld [vmem:[#allocation4 + $0x750] sm:$0xf] }
  0x2b   :  { %3616 = vmatpush.bf16.msra.mxu2 %v5480_v58  ;;  %v7616_v25 = vld [vmem:[#allocation4 + $0x314] sm:$0xf0]  ;;  %v5599_v26 = vld [vmem:[#allocation4 + $0x480] sm:$0xf]  ;;  %v7754_v29 = vld [vmem:[#allocation4 + $0x764] sm:$0xf0]  ;;  %v5216_v35 = vor.u32 %v7568_v22, %v5215_v21 }
  0x2c   :  { %3629 = vmatpush.bf16.msra.mxu3 %v5672_v62  ;;  %v7664_v27 = vld [vmem:[#allocation4 + $0x494] sm:$0xf0]  ;;  %v6151_v30 = vld [vmem:[#allocation4 + $0x8d0] sm:$0xf]  ;;  %v7802_v32 = vld [vmem:[#allocation4 + $0x8e4] sm:$0xf0]  ;;  %v5408_v36 = vor.u32 %v7616_v25, %v5407_v23  ;;  %v5960_v40 = vor.u32 %v7754_v29, %v5959_v28 }
  0x2d   :  { %3591 = vmatpush.bf16.msra.mxu0 %v5072_v4  ;;  %v6343_v33 = vld [vmem:[#allocation4 + $0xa50] sm:$0xf]  ;;  %v7850_v34 = vld [vmem:[#allocation4 + $0xa64] sm:$0xf0]  ;;  %v5600_v39 = vor.u32 %v7664_v27, %v5599_v26  ;;  %v6152_v41 = vor.u32 %v7802_v32, %v6151_v30  ;;  %v5935_v43 = vld [vmem:[#allocation4 + $0x720] sm:$0xf] }
  0x2e   :  { %3604 = vmatpush.bf16.msra.mxu1 %v5264_v5  ;;  %v6535_v37 = vld [vmem:[#allocation4 + $0xbd0] sm:$0xf]  ;;  %v7898_v38 = vld [vmem:[#allocation4 + $0xbe4] sm:$0xf0]  ;;  %v6344_v42 = vor.u32 %v7850_v34, %v6343_v33  ;;  %v7748_v44 = vld [vmem:[#allocation4 + $0x734] sm:$0xf0] }
  0x2f   :  { %3617 = vmatpush.bf16.msra.mxu2 %v5456_v6  ;;  %v6127_v45 = vld [vmem:[#allocation4 + $0x8a0] sm:$0xf]  ;;  %v6536_v46 = vor.u32 %v7898_v38, %v6535_v37  ;;  %v7796_v47 = vld [vmem:[#allocation4 + $0x8b4] sm:$0xf0]  ;;  %v5936_v52 = vor.u32 %v7748_v44, %v5935_v43  ;;  %v5911_v53 = vld [vmem:[#allocation4 + $0x6f0] sm:$0xf] }
  0x30   :  { %3630 = vmatpush.bf16.msra.mxu3 %v5648_v10  ;;  %v6319_v48 = vld [vmem:[#allocation4 + $0xa20] sm:$0xf]  ;;  %v7844_v49 = vld [vmem:[#allocation4 + $0xa34] sm:$0xf0]  ;;  %v6128_v54 = vor.u32 %v7796_v47, %v6127_v45  ;;  %v7742_v56 = vld [vmem:[#allocation4 + $0x704] sm:$0xf0] }
  0x31   :  { %3592 = vmatpush.bf16.msra.mxu0 %v5048_v16  ;;  %v6511_v50 = vld [vmem:[#allocation4 + $0xba0] sm:$0xf]  ;;  %v7892_v51 = vld [vmem:[#allocation4 + $0xbb4] sm:$0xf0]  ;;  %v6320_v55 = vor.u32 %v7844_v49, %v6319_v48  ;;  %v6103_v57 = vld [vmem:[#allocation4 + $0x870] sm:$0xf]  ;;  %v5912_v0 = vor.u32 %v7742_v56, %v5911_v53 }
  0x32   :  { %3605 = vmatpush.bf16.msra.mxu1 %v5240_v19  ;;  %v7790_v58 = vld [vmem:[#allocation4 + $0x884] sm:$0xf0]  ;;  %v6512_v59 = vor.u32 %v7892_v51, %v6511_v50  ;;  %v6295_v60 = vld [vmem:[#allocation4 + $0x9f0] sm:$0xf]  ;;  %v5887_v2 = vld [vmem:[#allocation4 + $0x6c0] sm:$0xf] }
  0x33   :  { %3618 = vmatpush.bf16.msra.mxu2 %v5432_v20  ;;  %v7838_v61 = vld [vmem:[#allocation4 + $0xa04] sm:$0xf0]  ;;  %v6487_v62 = vld [vmem:[#allocation4 + $0xb70] sm:$0xf]  ;;  %v6104_v1 = vor.u32 %v7790_v58, %v6103_v57  ;;  %v92_v4 = vld [vmem:[#allocation2] sm:$0xff]  ;;  %vm5012_vm0 = vcmask 15360  }
  0x34   :  { %3631 = vmatpush.bf16.msra.mxu3 %v5624_v24  ;;  %v7886_v63 = vld [vmem:[#allocation4 + $0xb84] sm:$0xf0]  ;;  %v94_v3 = vld [vmem:[#allocation2 + $0x10] sm:$0xff]  ;;  %v6296_v5 = vor.u32 %v7838_v61, %v6295_v60  ;;  %v7736_v6 = vld [vmem:[#allocation4 + $0x6d4] sm:$0xf0]  ;;  %v8347_v9 = vpack.c.bf16 %v92_v4, %v92_v4 }
  0x35   :  { %3593 = vmatpush.bf16.msra.mxu0 %v5024_v31  ;;  %v6079_v7 = vld [vmem:[#allocation4 + $0x840] sm:$0xf]  ;;  %v8345_v8 = vpack.c.bf16 %v94_v3, %v94_v3  ;;  %v95_v10 = vld [vmem:[#allocation2 + $0x18] sm:$0xff]  ;;  %v6488_v11 = vor.u32 %v7886_v63, %v6487_v62  ;;  %v5888_v18 = vor.u32 %v7736_v6, %v5887_v2  ;;  %v93_v19 = vld [vmem:[#allocation2 + $0x8] sm:$0xff] }
  0x36   :  { %3606 = vmatpush.bf16.msra.mxu1 %v5216_v35  ;;  %v7784_v12 = vld [vmem:[#allocation4 + $0x854] sm:$0xf0]  ;;  %v6271_v13 = vld [vmem:[#allocation4 + $0x9c0] sm:$0xf]  ;;  %v8349_v15 = vpack.c.bf16 %v95_v10, %v95_v10  ;;  %v5863_v22 = vld [vmem:[#allocation4 + $0x690] sm:$0xf]  ;;  %v8354_v25 = vpack.c.bf16 %v93_v19, %v93_v19 }
  0x37   :  { %3619 = vmatpush.bf16.msra.mxu2 %v5408_v36  ;;  %v7832_v14 = vld [vmem:[#allocation4 + $0x9d4] sm:$0xf0]  ;;  %v6463_v16 = vld [vmem:[#allocation4 + $0xb40] sm:$0xf]  ;;  %v6080_v20 = vor.u32 %v7784_v12, %v6079_v7  ;;  %v7730_v23 = vld [vmem:[#allocation4 + $0x6a4] sm:$0xf0] }
  0x38   :  { %3632 = vmatpush.bf16.msra.mxu3 %v5600_v39  ;;  %v7880_v17 = vld [vmem:[#allocation4 + $0xb54] sm:$0xf0]  ;;  %3594 = vmatmul.bf16.vlgmr.msra.gmra.mxu0 %v8347_v9  ;;  %v6272_v21 = vor.u32 %v7832_v14, %v6271_v13  ;;  %v6055_v24 = vld [vmem:[#allocation4 + $0x810] sm:$0xf]  ;;  %v7778_v27 = vld [vmem:[#allocation4 + $0x824] sm:$0xf0]  ;;  %v5864_v32 = vor.u32 %v7730_v23, %v5863_v22 }
  0x39   :  { %3638 = vmatpush.bf16.msrb.mxu0 %v5960_v40  ;;  %v6464_v26 = vor.u32 %v7880_v17, %v6463_v16  ;;  %v6247_v28 = vld [vmem:[#allocation4 + $0x990] sm:$0xf]  ;;  %v7826_v29 = vld [vmem:[#allocation4 + $0x9a4] sm:$0xf0]  ;;  %3607 = vmatmul.bf16.vlgmr.msra.gmra.mxu1 %v8354_v25  ;;  %v6056_v33 = vor.u32 %v7778_v27, %v6055_v24  ;;  %v5839_v35 = vld [vmem:[#allocation4 + $0x660] sm:$0xf] }
  0x3a   :  { %3651 = vmatpush.bf16.msrb.mxu1 %v6152_v41  ;;  %3620 = vmatmul.bf16.vlgmr.msra.gmra.mxu2 %v8345_v8  ;;  %v6439_v30 = vld [vmem:[#allocation4 + $0xb10] sm:$0xf]  ;;  %v7874_v31 = vld [vmem:[#allocation4 + $0xb24] sm:$0xf0]  ;;  %v6248_v34 = vor.u32 %v7826_v29, %v6247_v28  ;;  %v7724_v36 = vld [vmem:[#allocation4 + $0x674] sm:$0xf0] }
  0x3b   :  { %3664 = vmatpush.bf16.msrb.mxu2 %v6344_v42  ;;  %3633 = vmatmul.bf16.vlgmr.msra.gmra.mxu3 %v8349_v15  ;;  %v6031_v37 = vld [vmem:[#allocation4 + $0x7e0] sm:$0xf]  ;;  %v6440_v38 = vor.u32 %v7874_v31, %v6439_v30  ;;  %v7772_v39 = vld [vmem:[#allocation4 + $0x7f4] sm:$0xf0]  ;;  %v5840_v44 = vor.u32 %v7724_v36, %v5839_v35  ;;  %v5815_v47 = vld [vmem:[#allocation4 + $0x630] sm:$0xf] }
  0x3c   :  { %3677 = vmatpush.bf16.msrb.mxu3 %v6536_v46  ;;  %v6223_v40 = vld [vmem:[#allocation4 + $0x960] sm:$0xf]  ;;  %v7820_v41 = vld [vmem:[#allocation4 + $0x974] sm:$0xf0]  ;;  %v6032_v45 = vor.u32 %v7772_v39, %v6031_v37  ;;  %v7718_v48 = vld [vmem:[#allocation4 + $0x644] sm:$0xf0] }
  0x3d   :  { %3639 = vmatpush.bf16.msrb.mxu0 %v5936_v52  ;;  %v6415_v42 = vld [vmem:[#allocation4 + $0xae0] sm:$0xf]  ;;  %v7868_v43 = vld [vmem:[#allocation4 + $0xaf4] sm:$0xf0]  ;;  %v6224_v46 = vor.u32 %v7820_v41, %v6223_v40  ;;  %v6007_v49 = vld [vmem:[#allocation4 + $0x7b0] sm:$0xf]  ;;  %v5816_v56 = vor.u32 %v7718_v48, %v5815_v47 }
  0x3e   :  { %3652 = vmatpush.bf16.msrb.mxu1 %v6128_v54  ;;  %v6416_v50 = vor.u32 %v7868_v43, %v6415_v42  ;;  %v7766_v51 = vld [vmem:[#allocation4 + $0x7c4] sm:$0xf0]  ;;  %v6199_v52 = vld [vmem:[#allocation4 + $0x930] sm:$0xf]  ;;  %v5791_v57 = vld [vmem:[#allocation4 + $0x600] sm:$0xf] }
  0x3f   :  { %3665 = vmatpush.bf16.msrb.mxu2 %v6320_v55  ;;  %v7814_v53 = vld [vmem:[#allocation4 + $0x944] sm:$0xf0]  ;;  %v6391_v54 = vld [vmem:[#allocation4 + $0xab0] sm:$0xf]  ;;  %v7712_v58 = vld [vmem:[#allocation4 + $0x614] sm:$0xf0] }
  0x40   :  { %3678 = vmatpush.bf16.msrb.mxu3 %v6512_v59  ;;  %v7862_v55 = vld [vmem:[#allocation4 + $0xac4] sm:$0xf0]  ;;  %v6008_v59 = vor.u32 %v7766_v51, %v6007_v49  ;;  %v6200_v60 = vor.u32 %v7814_v53, %v6199_v52  ;;  %v5983_v61 = vld [vmem:[#allocation4 + $0x780] sm:$0xf]  ;;  %v7760_v62 = vld [vmem:[#allocation4 + $0x794] sm:$0xf0]  ;;  %v5792_v7 = vor.u32 %v7712_v58, %v5791_v57 }
  0x41   :  { %3640 = vmatpush.bf16.msrb.mxu0 %v5912_v0  ;;  %v6175_v63 = vld [vmem:[#allocation4 + $0x900] sm:$0xf]  ;;  %v6392_v0 = vor.u32 %v7862_v55, %v6391_v54  ;;  %v7856_v3 = vld [vmem:[#allocation4 + $0xa94] sm:$0xf0]  ;;  %v6727_v4 = vld [vmem:[#allocation4 + $0xd50] sm:$0xf]  ;;  %v5984_v13 = vor.u32 %v7760_v62, %v5983_v61 }
  0x42   :  { %3653 = vmatpush.bf16.msrb.mxu1 %v6104_v1  ;;  %v7808_v1 = vld [vmem:[#allocation4 + $0x914] sm:$0xf0]  ;;  %v6367_v2 = vld [vmem:[#allocation4 + $0xa80] sm:$0xf]  ;;  %v6919_v6 = vld [vmem:[#allocation4 + $0xed0] sm:$0xf] }
  0x43   :  { %3666 = vmatpush.bf16.msrb.mxu2 %v6296_v5  ;;  %v7946_v5 = vld [vmem:[#allocation4 + $0xd64] sm:$0xf0]  ;;  %v6176_v14 = vor.u32 %v7808_v1, %v6175_v63  ;;  %v7303_v16 = vld [vmem:[#allocation4 + $0x11d0] sm:$0xf]  ;;  %v6368_v19 = vor.u32 %v7856_v3, %v6367_v2  ;;  %v96_v22 = vld [vmem:[#allocation2 + $0x20] sm:$0xff] }
  0x44   :  { %3679 = vmatpush.bf16.msrb.mxu3 %v6488_v11  ;;  %v7994_v10 = vld [vmem:[#allocation4 + $0xee4] sm:$0xf0]  ;;  %v7111_v11 = vld [vmem:[#allocation4 + $0x1050] sm:$0xf]  ;;  %v99_v23 = vld [vmem:[#allocation2 + $0x38] sm:$0xff]  ;;  %v8359_v37 = vpack.c.bf16 %v96_v22, %v96_v22 }
  0x45   :  { %3641 = vmatpush.bf16.msrb.mxu0 %v5888_v18  ;;  %v8042_v12 = vld [vmem:[#allocation4 + $0x1064] sm:$0xf0]  ;;  %v98_v18 = vld [vmem:[#allocation2 + $0x30] sm:$0xff]  ;;  %v6920_v24 = vor.u32 %v7994_v10, %v6919_v6  ;;  %v7940_v27 = vld [vmem:[#allocation4 + $0xd34] sm:$0xf0] }
  0x46   :  { %3654 = vmatpush.bf16.msrb.mxu1 %v6080_v20  ;;  %v8090_v17 = vld [vmem:[#allocation4 + $0x11e4] sm:$0xf0]  ;;  %v6728_v20 = vor.u32 %v7946_v5, %v6727_v4  ;;  %v6895_v28 = vld [vmem:[#allocation4 + $0xea0] sm:$0xf]  ;;  %v7988_v31 = vld [vmem:[#allocation4 + $0xeb4] sm:$0xf0] }
  0x47   :  { %3667 = vmatpush.bf16.msrb.mxu2 %v6272_v21  ;;  %v6703_v21 = vld [vmem:[#allocation4 + $0xd20] sm:$0xf]  ;;  %v97_v29 = vld [vmem:[#allocation2 + $0x28] sm:$0xff]  ;;  %v7304_v30 = vor.u32 %v8090_v17, %v7303_v16  ;;  %v8084_v36 = vld [vmem:[#allocation4 + $0x11b4] sm:$0xf0]  ;;  %v6896_v41 = vor.u32 %v7988_v31, %v6895_v28 }
  0x48   :  { %3680 = vmatpush.bf16.msrb.mxu3 %v6464_v26  ;;  %v7112_v26 = vor.u32 %v8042_v12, %v7111_v11  ;;  %v7279_v35 = vld [vmem:[#allocation4 + $0x11a0] sm:$0xf]  ;;  %v6704_v39 = vor.u32 %v7940_v27, %v6703_v21  ;;  %v8363_v40 = vpack.c.bf16 %v97_v29, %v97_v29  ;;  %v6679_v43 = vld [vmem:[#allocation4 + $0xcf0] sm:$0xf]  ;;  %v7982_v47 = vld [vmem:[#allocation4 + $0xe84] sm:$0xf0] }
  0x49   :  { %3642 = vmatpush.bf16.msrb.mxu0 %v5864_v32  ;;  %v7087_v32 = vld [vmem:[#allocation4 + $0x1020] sm:$0xf]  ;;  %v7063_v48 = vld [vmem:[#allocation4 + $0xff0] sm:$0xf]  ;;  %v8030_v49 = vld [vmem:[#allocation4 + $0x1004] sm:$0xf0] }
  0x4a   :  { %3655 = vmatpush.bf16.msrb.mxu1 %v6056_v33  ;;  %v8036_v33 = vld [vmem:[#allocation4 + $0x1034] sm:$0xf0]  ;;  %v8078_v51 = vld [vmem:[#allocation4 + $0x1184] sm:$0xf0]  ;;  %v7064_v54 = vor.u32 %v8030_v49, %v7063_v48  ;;  %v6655_v55 = vld [vmem:[#allocation4 + $0xcc0] sm:$0xf] }
  0x4b   :  { %3668 = vmatpush.bf16.msrb.mxu2 %v6248_v34  ;;  %v8357_v34 = vpack.c.bf16 %v98_v18, %v98_v18  ;;  %v7088_v42 = vor.u32 %v8036_v33, %v7087_v32  ;;  %v6847_v57 = vld [vmem:[#allocation4 + $0xe40] sm:$0xf]  ;;  %v8024_v61 = vld [vmem:[#allocation4 + $0xfd4] sm:$0xf0]  ;;  %v6631_v3 = vld [vmem:[#allocation4 + $0xc90] sm:$0xf] }
  0x4c   :  { %3681 = vmatpush.bf16.msrb.mxu3 %v6440_v38  ;;  %v8361_v38 = vpack.c.bf16 %v99_v23, %v99_v23  ;;  %v7231_v62 = vld [vmem:[#allocation4 + $0x1140] sm:$0xf]  ;;  %v8072_v63 = vld [vmem:[#allocation4 + $0x1154] sm:$0xf0]  ;;  %v7922_v4 = vld [vmem:[#allocation4 + $0xca4] sm:$0xf0] }
  0x4d   :  { %3643 = vmatpush.bf16.msrb.mxu0 %v5840_v44  ;;  %v7934_v44 = vld [vmem:[#allocation4 + $0xd04] sm:$0xf0]  ;;  %v6823_v5 = vld [vmem:[#allocation4 + $0xe10] sm:$0xf]  ;;  %v7232_v6 = vor.u32 %v8072_v63, %v7231_v62  ;;  %v6607_v18 = vld [vmem:[#allocation4 + $0xc60] sm:$0xf] }
  0x4e   :  { %3656 = vmatpush.bf16.msrb.mxu1 %v6032_v45  ;;  %v6871_v45 = vld [vmem:[#allocation4 + $0xe70] sm:$0xf]  ;;  %v6680_v52 = vor.u32 %v7934_v44, %v6679_v43  ;;  %v8018_v11 = vld [vmem:[#allocation4 + $0xfa4] sm:$0xf0]  ;;  %v7964_v22 = vld [vmem:[#allocation4 + $0xdf4] sm:$0xf0] }
  0x4f   :  { %3669 = vmatpush.bf16.msrb.mxu2 %v6224_v46  ;;  %v7280_v46 = vor.u32 %v8084_v36, %v7279_v35  ;;  %v6872_v53 = vor.u32 %v7982_v47, %v6871_v45  ;;  %v7015_v10 = vld [vmem:[#allocation4 + $0xf90] sm:$0xf]  ;;  %v6991_v23 = vld [vmem:[#allocation4 + $0xf60] sm:$0xf]  ;;  %v8060_v27 = vld [vmem:[#allocation4 + $0x10f4] sm:$0xf0] }
  0x50   :  { %3682 = vmatpush.bf16.msrb.mxu3 %v6416_v50  ;;  %v7255_v50 = vld [vmem:[#allocation4 + $0x1170] sm:$0xf]  ;;  %v7016_v17 = vor.u32 %v8018_v11, %v7015_v10  ;;  %v7910_v32 = vld [vmem:[#allocation4 + $0xc44] sm:$0xf0]  ;;  %v6559_v45 = vld [vmem:[#allocation4 + $0xc00] sm:$0xf] }
  0x51   :  { %3644 = vmatpush.bf16.msrb.mxu0 %v5816_v56  ;;  %v7928_v56 = vld [vmem:[#allocation4 + $0xcd4] sm:$0xf0]  ;;  %v7256_v58 = vor.u32 %v8078_v51, %v7255_v50  ;;  %v7207_v12 = vld [vmem:[#allocation4 + $0x1110] sm:$0xf]  ;;  %v7958_v36 = vld [vmem:[#allocation4 + $0xdc4] sm:$0xf0] }
  0x52   :  { %3657 = vmatpush.bf16.msrb.mxu1 %v6008_v59  ;;  %v7976_v59 = vld [vmem:[#allocation4 + $0xe54] sm:$0xf0]  ;;  %v6583_v31 = vld [vmem:[#allocation4 + $0xc30] sm:$0xf]  ;;  %v8054_v43 = vld [vmem:[#allocation4 + $0x10c4] sm:$0xf0] }
  0x53   :  { %3670 = vmatpush.bf16.msrb.mxu2 %v6200_v60  ;;  %v7039_v60 = vld [vmem:[#allocation4 + $0xfc0] sm:$0xf]  ;;  %v6848_v1 = vor.u32 %v7976_v59, %v6847_v57  ;;  %v6775_v33 = vld [vmem:[#allocation4 + $0xdb0] sm:$0xf]  ;;  %v6584_v44 = vor.u32 %v7910_v32, %v6583_v31  ;;  %v7952_v50 = vld [vmem:[#allocation4 + $0xd94] sm:$0xf0] }
  0x54   :  { %3683 = vmatpush.bf16.msrb.mxu3 %v6392_v0  ;;  %v6656_v0 = vor.u32 %v7928_v56, %v6655_v55  ;;  %v7040_v2 = vor.u32 %v8024_v61, %v7039_v60  ;;  %v6751_v47 = vld [vmem:[#allocation4 + $0xd80] sm:$0xf]  ;;  %v6776_v48 = vor.u32 %v7958_v36, %v6775_v33  ;;  %v8048_v55 = vld [vmem:[#allocation4 + $0x1094] sm:$0xf0]  ;;  %v7559_v56 = vld [vmem:[#allocation4 + $0x154] sm:$0xf] }
  0x55   :  { %3645 = vmatpush.bf16.msrb.mxu0 %v5792_v7  ;;  %v7970_v7 = vld [vmem:[#allocation4 + $0xe24] sm:$0xf0]  ;;  %v6943_v51 = vld [vmem:[#allocation4 + $0xf00] sm:$0xf]  ;;  %v5193_v57 = vld [vmem:[#allocation4 + $0x168] sm:$0xf0]  ;;  %v6752_v63 = vor.u32 %v7952_v50, %v6751_v47 }
  0x56   :  { %3658 = vmatpush.bf16.msrb.mxu1 %v5984_v13  ;;  %v8066_v13 = vld [vmem:[#allocation4 + $0x1124] sm:$0xf0]  ;;  %v6824_v16 = vor.u32 %v7970_v7, %v6823_v5  ;;  %v5385_v60 = vld [vmem:[#allocation4 + $0x2e8] sm:$0xf0]  ;;  %v7655_v61 = vld [vmem:[#allocation4 + $0x454] sm:$0xf]  ;;  %v5196_v5 = vor.u32 %v7559_v56, %v5193_v57 }
  0x57   :  { %3671 = vmatpush.bf16.msrb.mxu2 %v6176_v14  ;;  %v6632_v14 = vor.u32 %v7922_v4, %v6631_v3  ;;  %v7208_v21 = vor.u32 %v8066_v13, %v7207_v12  ;;  %v5577_v62 = vld [vmem:[#allocation4 + $0x468] sm:$0xf0]  ;;  %v100_v3 = vld [vmem:[#allocation2 + $0x40] sm:$0xff]  ;;  %v103_v10 = vld [vmem:[#allocation2 + $0x58] sm:$0xff] }
  0x58   :  { %3684 = vmatpush.bf16.msrb.mxu3 %v6368_v19  ;;  %3646 = vmatmul.bf16.vlgmr.msrb.gmra.mxu0 %v8359_v37  ;;  %v7916_v19 = vld [vmem:[#allocation4 + $0xc74] sm:$0xf0]  ;;  %v101_v7 = vld [vmem:[#allocation2 + $0x48] sm:$0xff]  ;;  %v5580_v12 = vor.u32 %v7655_v61, %v5577_v62  ;;  %v7553_v13 = vld [vmem:[#allocation4 + $0x124] sm:$0xf] }
  0x59   :  { %3690 = vmatpush.bf16.msra.mxu0 %v6728_v20  ;;  %3659 = vmatmul.bf16.vlgmr.msrb.gmra.mxu1 %v8363_v40  ;;  %v6799_v20 = vld [vmem:[#allocation4 + $0xde0] sm:$0xf]  ;;  %v6608_v28 = vor.u32 %v7916_v19, %v6607_v18  ;;  %v8369_v18 = vpack.c.bf16 %v100_v3, %v100_v3  ;;  %v5361_v19 = vld [vmem:[#allocation4 + $0x2b8] sm:$0xf0]  ;;  %v7547_v31 = vld [vmem:[#allocation4 + $0xf4] sm:$0xf] }
  0x5a   :  { %3703 = vmatpush.bf16.msra.mxu1 %v6920_v24  ;;  %3672 = vmatmul.bf16.vlgmr.msrb.gmra.mxu2 %v8357_v34  ;;  %v8012_v24 = vld [vmem:[#allocation4 + $0xf74] sm:$0xf0]  ;;  %v6800_v29 = vor.u32 %v7964_v22, %v6799_v20  ;;  %v7649_v20 = vld [vmem:[#allocation4 + $0x424] sm:$0xf]  ;;  %v5145_v32 = vld [vmem:[#allocation4 + $0x108] sm:$0xf0] }
  0x5b   :  { %3716 = vmatpush.bf16.msra.mxu2 %v7112_v26  ;;  %3685 = vmatmul.bf16.vlgmr.msrb.gmra.mxu3 %v8361_v38  ;;  %v7183_v26 = vld [vmem:[#allocation4 + $0x10e0] sm:$0xf]  ;;  %v7595_v33 = vld [vmem:[#allocation4 + $0x274] sm:$0xf]  ;;  %v5337_v36 = vld [vmem:[#allocation4 + $0x288] sm:$0xf0] }
  0x5c   :  { %3729 = vmatpush.bf16.msra.mxu3 %v7304_v30  ;;  %v6992_v30 = vor.u32 %v8012_v24, %v6991_v23  ;;  %v7184_v35 = vor.u32 %v8060_v27, %v7183_v26  ;;  %v8373_v23 = vpack.c.bf16 %v101_v7, %v101_v7  ;;  %v7697_v24 = vld [vmem:[#allocation4 + $0x5a4] sm:$0xf]  ;;  %v5745_v26 = vld [vmem:[#allocation4 + $0x5b8] sm:$0xf0]  ;;  %v8375_v27 = vpack.c.bf16 %v103_v10, %v103_v10  ;;  %v7583_v61 = vld [vmem:[#allocation4 + $0x214] sm:$0xf] }
  0x5d   :  { %3691 = vmatpush.bf16.msra.mxu0 %v6704_v39  ;;  %v6967_v39 = vld [vmem:[#allocation4 + $0xf30] sm:$0xf]  ;;  %v7541_v47 = vld [vmem:[#allocation4 + $0xc4] sm:$0xf]  ;;  %v5673_v3 = vld [vmem:[#allocation4 + $0x528] sm:$0xf0] }
  0x5e   :  { %3704 = vmatpush.bf16.msra.mxu1 %v6896_v41  ;;  %v8006_v41 = vld [vmem:[#allocation4 + $0xf44] sm:$0xf0]  ;;  %v7529_v7 = vld [vmem:[#allocation4 + $0x64] sm:$0xf]  ;;  %v5073_v10 = vld [vmem:[#allocation4 + $0x78] sm:$0xf0] }
  0x5f   :  { %3717 = vmatpush.bf16.msra.mxu2 %v7088_v42  ;;  %v7159_v42 = vld [vmem:[#allocation4 + $0x10b0] sm:$0xf]  ;;  %v6968_v49 = vor.u32 %v8006_v41, %v6967_v39  ;;  %v7643_v39 = vld [vmem:[#allocation4 + $0x3f4] sm:$0xf]  ;;  %v5529_v41 = vld [vmem:[#allocation4 + $0x408] sm:$0xf0] }
  0x60   :  { %3730 = vmatpush.bf16.msra.mxu3 %v7280_v46  ;;  %v7904_v46 = vld [vmem:[#allocation4 + $0xc14] sm:$0xf0] }
  0x61   :  { %3692 = vmatpush.bf16.msra.mxu0 %v6680_v52  ;;  %v8000_v52 = vld [vmem:[#allocation4 + $0xf14] sm:$0xf0]  ;;  %v6560_v59 = vor.u32 %v7904_v46, %v6559_v45  ;;  %v5340_v45 = vor.u32 %v7595_v33, %v5337_v36  ;;  %v5532_v46 = vor.u32 %v7643_v39, %v5529_v41  ;;  %v5433_v33 = vld [vmem:[#allocation4 + $0x348] sm:$0xf0]  ;;  %v7517_v41 = vld [vmem:[#allocation4 + $0x4] sm:$0xf] }
  0x62   :  { %3705 = vmatpush.bf16.msra.mxu1 %v6872_v53  ;;  %v7160_v53 = vor.u32 %v8054_v43, %v7159_v42  ;;  %v7691_v42 = vld [vmem:[#allocation4 + $0x574] sm:$0xf]  ;;  %v5721_v43 = vld [vmem:[#allocation4 + $0x588] sm:$0xf0] }
  0x63   :  { %3718 = vmatpush.bf16.msra.mxu2 %v7064_v54  ;;  %v7135_v54 = vld [vmem:[#allocation4 + $0x1080] sm:$0xf]  ;;  %v5724_v50 = vor.u32 %v7691_v42, %v5721_v43  ;;  %v5625_v36 = vld [vmem:[#allocation4 + $0x4c8] sm:$0xf0]  ;;  %v5025_v42 = vld [vmem:[#allocation4 + $0x18] sm:$0xf0] }
  0x64   :  { %3731 = vmatpush.bf16.msra.mxu3 %v7256_v58  ;;  %v7607_v58 = vld [vmem:[#allocation4 + $0x2d4] sm:$0xf]  ;;  %v7136_v4 = vor.u32 %v8048_v55, %v7135_v54  ;;  %v7685_v54 = vld [vmem:[#allocation4 + $0x544] sm:$0xf]  ;;  %v5697_v55 = vld [vmem:[#allocation4 + $0x558] sm:$0xf0] }
  0x65   :  { %3693 = vmatpush.bf16.msra.mxu0 %v6656_v0  ;;  %v6944_v0 = vor.u32 %v8000_v52, %v6943_v51  ;;  %v5388_v11 = vor.u32 %v7607_v58, %v5385_v60  ;;  %v5313_v51 = vld [vmem:[#allocation4 + $0x258] sm:$0xf0]  ;;  %v7637_v52 = vld [vmem:[#allocation4 + $0x3c4] sm:$0xf]  ;;  %v5097_v60 = vld [vmem:[#allocation4 + $0xa8] sm:$0xf0]  ;;  %v5700_v62 = vor.u32 %v7685_v54, %v5697_v55  ;;  %v5028_v55 = vor.u32 %v7517_v41, %v5025_v42 }
  0x66   :  { %3706 = vmatpush.bf16.msra.mxu1 %v6848_v1  ;;  %v7703_v1 = vld [vmem:[#allocation4 + $0x5d4] sm:$0xf]  ;;  %v7781_v41 = vld [vmem:[#allocation4 + $0x844] sm:$0xf] }
  0x67   :  { %3719 = vmatpush.bf16.msra.mxu2 %v7040_v2  ;;  %v5769_v2 = vld [vmem:[#allocation4 + $0x5e8] sm:$0xf0]  ;;  %v7799_v54 = vld [vmem:[#allocation4 + $0x8d4] sm:$0xf] }
  0x68   :  { %3732 = vmatpush.bf16.msra.mxu3 %v7232_v6  ;;  %v102_v6 = vld [vmem:[#allocation2 + $0x50] sm:$0xff] }
  0x69   :  { %3694 = vmatpush.bf16.msra.mxu0 %v6632_v14  ;;  %v5169_v14 = vld [vmem:[#allocation4 + $0x138] sm:$0xf0]  ;;  %v8371_v22 = vpack.c.bf16 %v102_v6, %v102_v6 }
  0x6a   :  { %3707 = vmatpush.bf16.msra.mxu1 %v6824_v16  ;;  %v7601_v16 = vld [vmem:[#allocation4 + $0x2a4] sm:$0xf] }
  0x6b   :  { %3720 = vmatpush.bf16.msra.mxu2 %v7016_v17  ;;  %v5772_v17 = vor.u32 %v7703_v1, %v5769_v2  ;;  %v5481_v1 = vld [vmem:[#allocation4 + $0x3a8] sm:$0xf0]  ;;  %v7679_v2 = vld [vmem:[#allocation4 + $0x514] sm:$0xf] }
  0x6c   :  { %3733 = vmatpush.bf16.msra.mxu3 %v7208_v21  ;;  %v5553_v21 = vld [vmem:[#allocation4 + $0x438] sm:$0xf0] }
  0x6d   :  { %3695 = vmatpush.bf16.msra.mxu0 %v6608_v28  ;;  %v5172_v28 = vor.u32 %v7553_v13, %v5169_v14  ;;  %v5265_v13 = vld [vmem:[#allocation4 + $0x1f8] sm:$0xf0]  ;;  %v7625_v14 = vld [vmem:[#allocation4 + $0x364] sm:$0xf] }
  0x6e   :  { %3708 = vmatpush.bf16.msra.mxu1 %v6800_v29  ;;  %v5364_v29 = vor.u32 %v7601_v16, %v5361_v19  ;;  %v5457_v16 = vld [vmem:[#allocation4 + $0x378] sm:$0xf0] }
  0x6f   :  { %3721 = vmatpush.bf16.msra.mxu2 %v6992_v30  ;;  %v5556_v30 = vor.u32 %v7649_v20, %v5553_v21  ;;  %v5649_v19 = vld [vmem:[#allocation4 + $0x4f8] sm:$0xf0]  ;;  %v5076_v20 = vor.u32 %v7529_v7, %v5073_v10  ;;  %v7841_v10 = vld [vmem:[#allocation4 + $0xa24] sm:$0xf] }
  0x70   :  { %3734 = vmatpush.bf16.msra.mxu3 %v7184_v35  ;;  %v5748_v35 = vor.u32 %v7697_v24, %v5745_v26  ;;  %v5460_v24 = vor.u32 %v7625_v14, %v5457_v16  ;;  %v7523_v26 = vld [vmem:[#allocation4 + $0x34] sm:$0xf]  ;;  %v6129_v7 = vld [vmem:[#allocation4 + $0x8b8] sm:$0xf0] }
  0x71   :  { %3696 = vmatpush.bf16.msra.mxu0 %v6584_v44  ;;  %v5148_v44 = vor.u32 %v7547_v31, %v5145_v32  ;;  %v5241_v31 = vld [vmem:[#allocation4 + $0x1c8] sm:$0xf0]  ;;  %v7619_v32 = vld [vmem:[#allocation4 + $0x334] sm:$0xf] }
  0x72   :  { %3709 = vmatpush.bf16.msra.mxu1 %v6776_v48  ;;  %v5121_v48 = vld [vmem:[#allocation4 + $0xd8] sm:$0xf0] }
  0x73   :  { %3722 = vmatpush.bf16.msra.mxu2 %v6968_v49  ;;  %v7589_v49 = vld [vmem:[#allocation4 + $0x244] sm:$0xf]  ;;  %v5124_v56 = vor.u32 %v7541_v47, %v5121_v48 }
  0x74   :  { %3735 = vmatpush.bf16.msra.mxu3 %v7160_v53  ;;  %v5505_v53 = vld [vmem:[#allocation4 + $0x3d8] sm:$0xf0]  ;;  %v5316_v57 = vor.u32 %v7589_v49, %v5313_v51  ;;  %v7613_v47 = vld [vmem:[#allocation4 + $0x304] sm:$0xf] }
  0x75   :  { %3697 = vmatpush.bf16.msra.mxu0 %v6560_v59  ;;  %v5508_v58 = vor.u32 %v7637_v52, %v5505_v53  ;;  %v7535_v59 = vld [vmem:[#allocation4 + $0x94] sm:$0xf]  ;;  %v5409_v49 = vld [vmem:[#allocation4 + $0x318] sm:$0xf0]  ;;  %v5961_v53 = vld [vmem:[#allocation4 + $0x768] sm:$0xf0] }
  0x76   :  { %3710 = vmatpush.bf16.msra.mxu1 %v6752_v63  ;;  %v5289_v63 = vld [vmem:[#allocation4 + $0x228] sm:$0xf0]  ;;  %v5601_v51 = vld [vmem:[#allocation4 + $0x498] sm:$0xf0]  ;;  %v7751_v52 = vld [vmem:[#allocation4 + $0x754] sm:$0xf] }
  0x77   :  { %3723 = vmatpush.bf16.msra.mxu2 %v6944_v0  ;;  %v7631_v0 = vld [vmem:[#allocation4 + $0x394] sm:$0xf] }
  0x78   :  { %3736 = vmatpush.bf16.msra.mxu3 %v7136_v4  ;;  %3698 = vmatmul.bf16.vlgmr.msra.gmra.mxu0 %v8369_v18  ;;  %v5100_v4 = vor.u32 %v7535_v59, %v5097_v60  ;;  %v5484_v6 = vor.u32 %v7631_v0, %v5481_v1  ;;  %v5412_v60 = vor.u32 %v7613_v47, %v5409_v49  ;;  %v6465_v47 = vld [vmem:[#allocation4 + $0xb58] sm:$0xf0] }
  0x79   :  { %3742 = vmatpush.bf16.msrb.mxu0 %v5196_v5  ;;  %3711 = vmatmul.bf16.vlgmr.msra.gmra.mxu1 %v8373_v23  ;;  %v5292_v5 = vor.u32 %v7583_v61, %v5289_v63  ;;  %v7895_v61 = vld [vmem:[#allocation4 + $0xbd4] sm:$0xf]  ;;  %v5964_v0 = vor.u32 %v7751_v52, %v5961_v53  ;;  %v5865_v52 = vld [vmem:[#allocation4 + $0x6a8] sm:$0xf0] }
  0x7a   :  { %3755 = vmatpush.bf16.msrb.mxu1 %v5388_v11  ;;  %3724 = vmatmul.bf16.vlgmr.msra.gmra.mxu2 %v8371_v22  ;;  %v7577_v11 = vld [vmem:[#allocation4 + $0x1e4] sm:$0xf]  ;;  %v7775_v53 = vld [vmem:[#allocation4 + $0x814] sm:$0xf] }
  0x7b   :  { %3768 = vmatpush.bf16.msrb.mxu2 %v5580_v12  ;;  %3737 = vmatmul.bf16.vlgmr.msra.gmra.mxu3 %v8375_v27  ;;  %v5676_v12 = vor.u32 %v7679_v2, %v5673_v3  ;;  %v5268_v21 = vor.u32 %v7577_v11, %v5265_v13  ;;  %v7745_v3 = vld [vmem:[#allocation4 + $0x724] sm:$0xf]  ;;  %v6321_v11 = vld [vmem:[#allocation4 + $0xa38] sm:$0xf0] }
  0x7c   :  { %3781 = vmatpush.bf16.msrb.mxu3 %v5772_v17  ;;  %v7673_v17 = vld [vmem:[#allocation4 + $0x4e4] sm:$0xf]  ;;  %v6513_v13 = vld [vmem:[#allocation4 + $0xbb8] sm:$0xf0] }
  0x7d   :  { %3743 = vmatpush.bf16.msrb.mxu0 %v5172_v28  ;;  %v5049_v28 = vld [vmem:[#allocation4 + $0x48] sm:$0xf0] }
  0x7e   :  { %3756 = vmatpush.bf16.msrb.mxu1 %v5364_v29  ;;  %v7571_v29 = vld [vmem:[#allocation4 + $0x1b4] sm:$0xf]  ;;  %v5052_v39 = vor.u32 %v7523_v26, %v5049_v28  ;;  %v6105_v26 = vld [vmem:[#allocation4 + $0x888] sm:$0xf0] }
  0x7f   :  { %3769 = vmatpush.bf16.msrb.mxu2 %v5556_v30  ;;  %v5652_v30 = vor.u32 %v7673_v17, %v5649_v19  ;;  %v5244_v43 = vor.u32 %v7571_v29, %v5241_v31  ;;  %v6324_v17 = vor.u32 %v7841_v10, %v6321_v11  ;;  %v7739_v19 = vld [vmem:[#allocation4 + $0x6f4] sm:$0xf]  ;;  %v6297_v29 = vld [vmem:[#allocation4 + $0xa08] sm:$0xf0] }
  0x80   :  { %3782 = vmatpush.bf16.msrb.mxu3 %v5748_v35  ;;  %v7667_v35 = vld [vmem:[#allocation4 + $0x4b4] sm:$0xf]  ;;  %v6489_v31 = vld [vmem:[#allocation4 + $0xb88] sm:$0xf0] }
  0x81   :  { %3744 = vmatpush.bf16.msrb.mxu0 %v5148_v44  ;;  %v5436_v44 = vor.u32 %v7619_v32, %v5433_v33  ;;  %v5628_v48 = vor.u32 %v7667_v35, %v5625_v36  ;;  %v7835_v28 = vld [vmem:[#allocation4 + $0x9f4] sm:$0xf]  ;;  %v7733_v36 = vld [vmem:[#allocation4 + $0x6c4] sm:$0xf] }
  0x82   :  { %3757 = vmatpush.bf16.msrb.mxu1 %v5340_v45  ;;  %v7565_v45 = vld [vmem:[#allocation4 + $0x184] sm:$0xf]  ;;  %v6300_v35 = vor.u32 %v7835_v28, %v6297_v29 }
  0x83   :  { %3770 = vmatpush.bf16.msrb.mxu2 %v5532_v46  ;;  %v5217_v46 = vld [vmem:[#allocation4 + $0x198] sm:$0xf0]  ;;  %v7709_v29 = vld [vmem:[#allocation4 + $0x604] sm:$0xf] }
  0x84   :  { %3783 = vmatpush.bf16.msrb.mxu3 %v5724_v50  ;;  %v7661_v50 = vld [vmem:[#allocation4 + $0x484] sm:$0xf]  ;;  %v5220_v59 = vor.u32 %v7565_v45, %v5217_v46  ;;  %v6273_v45 = vld [vmem:[#allocation4 + $0x9d8] sm:$0xf0] }
  0x85   :  { %3745 = vmatpush.bf16.msrb.mxu0 %v5124_v56  ;;  %v6153_v56 = vld [vmem:[#allocation4 + $0x8e8] sm:$0xf0]  ;;  %v5604_v63 = vor.u32 %v7661_v50, %v5601_v51  ;;  %v7877_v46 = vld [vmem:[#allocation4 + $0xb44] sm:$0xf]  ;;  %v7727_v51 = vld [vmem:[#allocation4 + $0x694] sm:$0xf] }
  0x86   :  { %3758 = vmatpush.bf16.msrb.mxu1 %v5316_v57  ;;  %v7847_v57 = vld [vmem:[#allocation4 + $0xa54] sm:$0xf]  ;;  %v6156_v1 = vor.u32 %v7799_v54, %v6153_v56  ;;  %v6468_v54 = vor.u32 %v7877_v46, %v6465_v47 }
  0x87   :  { %3771 = vmatpush.bf16.msrb.mxu2 %v5508_v58  ;;  %v6345_v58 = vld [vmem:[#allocation4 + $0xa68] sm:$0xf0]  ;;  %v7823_v56 = vld [vmem:[#allocation4 + $0x994] sm:$0xf] }
  0x88   :  { %3784 = vmatpush.bf16.msrb.mxu3 %v5700_v62  ;;  %v6537_v62 = vld [vmem:[#allocation4 + $0xbe8] sm:$0xf0]  ;;  %v6348_v2 = vor.u32 %v7847_v57, %v6345_v58  ;;  %v7871_v58 = vld [vmem:[#allocation4 + $0xb14] sm:$0xf] }
  0x89   :  { %3746 = vmatpush.bf16.msrb.mxu0 %v5100_v4  ;;  %v5937_v4 = vld [vmem:[#allocation4 + $0x738] sm:$0xf0]  ;;  %v6249_v57 = vld [vmem:[#allocation4 + $0x9a8] sm:$0xf0]  ;;  %v7991_v46 = vld [vmem:[#allocation4 + $0xed4] sm:$0xf] }
  0x8a   :  { %3759 = vmatpush.bf16.msrb.mxu1 %v5292_v5  ;;  %v7793_v5 = vld [vmem:[#allocation4 + $0x8a4] sm:$0xf]  ;;  %v5940_v14 = vor.u32 %v7745_v3, %v5937_v4  ;;  %v6033_v3 = vld [vmem:[#allocation4 + $0x7f8] sm:$0xf0] }
  0x8b   :  { %3772 = vmatpush.bf16.msrb.mxu2 %v5484_v6  ;;  %v6540_v6 = vor.u32 %v7895_v61, %v6537_v62  ;;  %v6132_v16 = vor.u32 %v7793_v5, %v6129_v7  ;;  %v6252_v62 = vor.u32 %v7823_v56, %v6249_v57  ;;  %v7817_v4 = vld [vmem:[#allocation4 + $0x964] sm:$0xf]  ;;  %v6225_v5 = vld [vmem:[#allocation4 + $0x978] sm:$0xf0] }
  0x8c   :  { %3785 = vmatpush.bf16.msrb.mxu3 %v5676_v12  ;;  %v7889_v12 = vld [vmem:[#allocation4 + $0xba4] sm:$0xf]  ;;  %v6417_v7 = vld [vmem:[#allocation4 + $0xaf8] sm:$0xf0] }
  0x8d   :  { %3747 = vmatpush.bf16.msrb.mxu0 %v5076_v20  ;;  %v5913_v20 = vld [vmem:[#allocation4 + $0x708] sm:$0xf0] }
  0x8e   :  { %3760 = vmatpush.bf16.msrb.mxu1 %v5268_v21  ;;  %v7787_v21 = vld [vmem:[#allocation4 + $0x874] sm:$0xf]  ;;  %v5916_v32 = vor.u32 %v7739_v19, %v5913_v20  ;;  %v6009_v19 = vld [vmem:[#allocation4 + $0x7c8] sm:$0xf0] }
  0x8f   :  { %3773 = vmatpush.bf16.msrb.mxu2 %v5460_v24  ;;  %v6516_v24 = vor.u32 %v7889_v12, %v6513_v13  ;;  %v6108_v33 = vor.u32 %v7787_v21, %v6105_v26  ;;  %v6228_v12 = vor.u32 %v7817_v4, %v6225_v5  ;;  %v7715_v13 = vld [vmem:[#allocation4 + $0x634] sm:$0xf]  ;;  %v6201_v21 = vld [vmem:[#allocation4 + $0x948] sm:$0xf0] }
  0x90   :  { %3786 = vmatpush.bf16.msrb.mxu3 %v5652_v30  ;;  %v7883_v30 = vld [vmem:[#allocation4 + $0xb74] sm:$0xf]  ;;  %v6393_v26 = vld [vmem:[#allocation4 + $0xac8] sm:$0xf0] }
  0x91   :  { %3748 = vmatpush.bf16.msrb.mxu0 %v5052_v39  ;;  %v5889_v39 = vld [vmem:[#allocation4 + $0x6d8] sm:$0xf0]  ;;  %v6492_v42 = vor.u32 %v7883_v30, %v6489_v31  ;;  %v7811_v20 = vld [vmem:[#allocation4 + $0x934] sm:$0xf] }
  0x92   :  { %3761 = vmatpush.bf16.msrb.mxu1 %v5244_v43  ;;  %v6081_v43 = vld [vmem:[#allocation4 + $0x858] sm:$0xf0] }
  0x93   :  { %3774 = vmatpush.bf16.msrb.mxu2 %v5436_v44  ;;  %v7829_v44 = vld [vmem:[#allocation4 + $0x9c4] sm:$0xf]  ;;  %v6084_v49 = vor.u32 %v7781_v41, %v6081_v43  ;;  %v5793_v30 = vld [vmem:[#allocation4 + $0x618] sm:$0xf0] }
  0x94   :  { %3787 = vmatpush.bf16.msrb.mxu3 %v5628_v48  ;;  %v5892_v48 = vor.u32 %v7733_v36, %v5889_v39  ;;  %v6276_v50 = vor.u32 %v7829_v44, %v6273_v45  ;;  %v7805_v36 = vld [vmem:[#allocation4 + $0x904] sm:$0xf]  ;;  %v6177_v41 = vld [vmem:[#allocation4 + $0x918] sm:$0xf0]  ;;  %v7943_v44 = vld [vmem:[#allocation4 + $0xd54] sm:$0xf]  ;;  %v5796_v47 = vor.u32 %v7709_v29, %v5793_v30 }
  0x95   :  { %3749 = vmatpush.bf16.msrb.mxu0 %v5028_v55  ;;  %v6057_v55 = vld [vmem:[#allocation4 + $0x828] sm:$0xf0]  ;;  %v6369_v43 = vld [vmem:[#allocation4 + $0xa98] sm:$0xf0]  ;;  %v7973_v29 = vld [vmem:[#allocation4 + $0xe44] sm:$0xf] }
  0x96   :  { %3762 = vmatpush.bf16.msrb.mxu1 %v5220_v59  ;;  %v6441_v59 = vld [vmem:[#allocation4 + $0xb28] sm:$0xf0]  ;;  %v6060_v61 = vor.u32 %v7775_v53, %v6057_v55  ;;  %v8087_v53 = vld [vmem:[#allocation4 + $0x11d4] sm:$0xf]  ;;  %v6849_v30 = vld [vmem:[#allocation4 + $0xe58] sm:$0xf0] }
  0x97   :  { %3775 = vmatpush.bf16.msrb.mxu2 %v5412_v60  ;;  %v5868_v60 = vor.u32 %v7727_v51, %v5865_v52  ;;  %v6729_v45 = vld [vmem:[#allocation4 + $0xd68] sm:$0xf0]  ;;  %v6180_v52 = vor.u32 %v7805_v36, %v6177_v41  ;;  %v8069_v36 = vld [vmem:[#allocation4 + $0x1144] sm:$0xf] }
  0x98   :  { %3788 = vmatpush.bf16.msrb.mxu3 %v5604_v63  ;;  %3750 = vmatmul.bf16.vlgmr.msrb.gmra.mxu0 %v8347_v9  ;;  %v7721_v63 = vld [vmem:[#allocation4 + $0x664] sm:$0xf]  ;;  %v6732_v56 = vor.u32 %v7943_v44, %v6729_v45  ;;  %v6633_v45 = vld [vmem:[#allocation4 + $0xca8] sm:$0xf0] }
  0x99   :  { %3794 = vmatpush.bf16.msra.mxu0 %v5964_v0  ;;  %3763 = vmatmul.bf16.vlgmr.msrb.gmra.mxu1 %v8354_v25  ;;  %v5841_v0 = vld [vmem:[#allocation4 + $0x678] sm:$0xf0] }
  0x9a   :  { %3807 = vmatpush.bf16.msra.mxu1 %v6156_v1  ;;  %3776 = vmatmul.bf16.vlgmr.msrb.gmra.mxu2 %v8345_v8  ;;  %v7769_v1 = vld [vmem:[#allocation4 + $0x7e4] sm:$0xf]  ;;  %v5844_v10 = vor.u32 %v7721_v63, %v5841_v0  ;;  %v6897_v63 = vld [vmem:[#allocation4 + $0xeb8] sm:$0xf0] }
  0x9b   :  { %3820 = vmatpush.bf16.msra.mxu2 %v6348_v2  ;;  %3789 = vmatmul.bf16.vlgmr.msrb.gmra.mxu3 %v8349_v15  ;;  %v6444_v2 = vor.u32 %v7871_v58, %v6441_v59  ;;  %v6036_v11 = vor.u32 %v7769_v1, %v6033_v3  ;;  %v7937_v59 = vld [vmem:[#allocation4 + $0xd24] sm:$0xf]  ;;  %v7089_v1 = vld [vmem:[#allocation4 + $0x1038] sm:$0xf0] }
  0x9c   :  { %3833 = vmatpush.bf16.msra.mxu3 %v6540_v6  ;;  %v7865_v6 = vld [vmem:[#allocation4 + $0xae4] sm:$0xf]  ;;  %v7281_v3 = vld [vmem:[#allocation4 + $0x11b8] sm:$0xf0] }
  0x9d   :  { %3795 = vmatpush.bf16.msra.mxu0 %v5940_v14  ;;  %v5817_v14 = vld [vmem:[#allocation4 + $0x648] sm:$0xf0]  ;;  %v8033_v0 = vld [vmem:[#allocation4 + $0x1024] sm:$0xf] }
  0x9e   :  { %3808 = vmatpush.bf16.msra.mxu1 %v6132_v16  ;;  %v7763_v16 = vld [vmem:[#allocation4 + $0x7b4] sm:$0xf]  ;;  %v5820_v28 = vor.u32 %v7715_v13, %v5817_v14  ;;  %v6873_v13 = vld [vmem:[#allocation4 + $0xe88] sm:$0xf0] }
  0x9f   :  { %3821 = vmatpush.bf16.msra.mxu2 %v6324_v17  ;;  %v6420_v17 = vor.u32 %v7865_v6, %v6417_v7  ;;  %v6012_v31 = vor.u32 %v7763_v16, %v6009_v19  ;;  %v7092_v6 = vor.u32 %v8033_v0, %v7089_v1  ;;  %v7931_v7 = vld [vmem:[#allocation4 + $0xcf4] sm:$0xf]  ;;  %v7065_v16 = vld [vmem:[#allocation4 + $0x1008] sm:$0xf0]  ;;  %v8009_v0 = vld [vmem:[#allocation4 + $0xf64] sm:$0xf] }
  0xa0   :  { %3834 = vmatpush.bf16.msra.mxu3 %v6516_v24  ;;  %v7859_v24 = vld [vmem:[#allocation4 + $0xab4] sm:$0xf]  ;;  %v7257_v19 = vld [vmem:[#allocation4 + $0x1188] sm:$0xf0]  ;;  %v6993_v1 = vld [vmem:[#allocation4 + $0xf78] sm:$0xf0] }
  0xa1   :  { %3796 = vmatpush.bf16.msra.mxu0 %v5916_v32  ;;  %v6204_v32 = vor.u32 %v7811_v20, %v6201_v21  ;;  %v6396_v39 = vor.u32 %v7859_v24, %v6393_v26  ;;  %v8027_v14 = vld [vmem:[#allocation4 + $0xff4] sm:$0xf]  ;;  %v7925_v21 = vld [vmem:[#allocation4 + $0xcc4] sm:$0xf] }
  0xa2   :  { %3809 = vmatpush.bf16.msra.mxu1 %v6108_v33  ;;  %v7757_v33 = vld [vmem:[#allocation4 + $0x784] sm:$0xf]  ;;  %v7068_v26 = vor.u32 %v8027_v14, %v7065_v16  ;;  %v6777_v16 = vld [vmem:[#allocation4 + $0xdc8] sm:$0xf0] }
  0xa3   :  { %3822 = vmatpush.bf16.msra.mxu2 %v6300_v35  ;;  %v5985_v35 = vld [vmem:[#allocation4 + $0x798] sm:$0xf0] }
  0xa4   :  { %3835 = vmatpush.bf16.msra.mxu3 %v6492_v42  ;;  %v7853_v42 = vld [vmem:[#allocation4 + $0xa84] sm:$0xf]  ;;  %v5988_v51 = vor.u32 %v7757_v33, %v5985_v35  ;;  %v7041_v33 = vld [vmem:[#allocation4 + $0xfd8] sm:$0xf0] }
  0xa5   :  { %3797 = vmatpush.bf16.msra.mxu0 %v5892_v48  ;;  %v6921_v48 = vld [vmem:[#allocation4 + $0xee8] sm:$0xf0]  ;;  %v6372_v55 = vor.u32 %v7853_v42, %v6369_v43  ;;  %v8389_v35 = vld [vmem:[#allocation6] sm:$0x3f]  ;;  %v7919_v42 = vld [vmem:[#allocation4 + $0xc94] sm:$0xf]  ;;  %v6852_v43 = vor.u32 %v7973_v29, %v6849_v30 }
  0xa6   :  { %3810 = vmatpush.bf16.msra.mxu1 %v6084_v49  ;;  %v8039_v49 = vld [vmem:[#allocation4 + $0x1054] sm:$0xf]  ;;  %v6924_v57 = vor.u32 %v7991_v46, %v6921_v48  ;;  %v7901_v30 = vld [vmem:[#allocation4 + $0xc04] sm:$0xf] }
  0xa7   :  { %3823 = vmatpush.bf16.msra.mxu2 %v6276_v50  ;;  %v7113_v50 = vld [vmem:[#allocation4 + $0x1068] sm:$0xf0]  ;;  %v7967_v46 = vld [vmem:[#allocation4 + $0xe14] sm:$0xf] }
  0xa8   :  { %3836 = vmatpush.bf16.msra.mxu3 %v6468_v54  ;;  %v7305_v54 = vld [vmem:[#allocation4 + $0x11e8] sm:$0xf0]  ;;  %v7116_v58 = vor.u32 %v8039_v49, %v7113_v50  ;;  %v8015_v50 = vld [vmem:[#allocation4 + $0xf94] sm:$0xf] }
  0xa9   :  { %3798 = vmatpush.bf16.msra.mxu0 %v5868_v60  ;;  %v6705_v60 = vld [vmem:[#allocation4 + $0xd38] sm:$0xf0]  ;;  %v6825_v49 = vld [vmem:[#allocation4 + $0xe28] sm:$0xf0] }
  0xaa   :  { %3811 = vmatpush.bf16.msra.mxu1 %v6060_v61  ;;  %v7985_v61 = vld [vmem:[#allocation4 + $0xea4] sm:$0xf]  ;;  %v6708_v4 = vor.u32 %v7937_v59, %v6705_v60  ;;  %v6609_v59 = vld [vmem:[#allocation4 + $0xc78] sm:$0xf0] }
  0xab   :  { %3824 = vmatpush.bf16.msra.mxu2 %v6252_v62  ;;  %v7308_v62 = vor.u32 %v8087_v53, %v7305_v54  ;;  %v6900_v5 = vor.u32 %v7985_v61, %v6897_v63  ;;  %v7209_v53 = vld [vmem:[#allocation4 + $0x1128] sm:$0xf0]  ;;  %v6636_v54 = vor.u32 %v7919_v42, %v6633_v45  ;;  %v7961_v60 = vld [vmem:[#allocation4 + $0xde4] sm:$0xf]  ;;  %v6801_v63 = vld [vmem:[#allocation4 + $0xdf8] sm:$0xf0] }
  0xac   :  { %3837 = vmatpush.bf16.msra.mxu3 %v6444_v2  ;;  %v8081_v2 = vld [vmem:[#allocation4 + $0x11a4] sm:$0xf]  ;;  %v6945_v45 = vld [vmem:[#allocation4 + $0xf18] sm:$0xf0] }
  0xad   :  { %3799 = vmatpush.bf16.msra.mxu0 %v5844_v10  ;;  %v6681_v10 = vld [vmem:[#allocation4 + $0xd08] sm:$0xf0]  ;;  %v7997_v42 = vld [vmem:[#allocation4 + $0xf04] sm:$0xf] }
  0xae   :  { %3812 = vmatpush.bf16.msra.mxu1 %v6036_v11  ;;  %v7979_v11 = vld [vmem:[#allocation4 + $0xe74] sm:$0xf]  ;;  %v6684_v20 = vor.u32 %v7931_v7, %v6681_v10  ;;  %v6996_v7 = vor.u32 %v8009_v0, %v6993_v1  ;;  %v5175_v1 = vld [vmem:[#allocation4 + $0x128] sm:$0xf] }
  0xaf   :  { %3825 = vmatpush.bf16.msra.mxu2 %v6228_v12  ;;  %v7284_v12 = vor.u32 %v8081_v2, %v7281_v3  ;;  %v6876_v24 = vor.u32 %v7979_v11, %v6873_v13  ;;  %v8057_v2 = vld [vmem:[#allocation4 + $0x10e4] sm:$0xf]  ;;  %v7185_v3 = vld [vmem:[#allocation4 + $0x10f8] sm:$0xf0]  ;;  %v7907_v10 = vld [vmem:[#allocation4 + $0xc34] sm:$0xf] }
  0xb0   :  { %3838 = vmatpush.bf16.msra.mxu3 %v6420_v17  ;;  %v8075_v17 = vld [vmem:[#allocation4 + $0x1174] sm:$0xf]  ;;  %v6585_v11 = vld [vmem:[#allocation4 + $0xc48] sm:$0xf0]  ;;  %v7188_v14 = vor.u32 %v8057_v2, %v7185_v3  ;;  %v7557_v2 = vld [vmem:[#allocation4 + $0x13c] sm:$0xf0] }
  0xb1   :  { %3800 = vmatpush.bf16.msra.mxu0 %v5820_v28  ;;  %v6657_v28 = vld [vmem:[#allocation4 + $0xcd8] sm:$0xf0]  ;;  %v6588_v29 = vor.u32 %v7907_v10, %v6585_v11  ;;  %v5367_v3 = vld [vmem:[#allocation4 + $0x2a8] sm:$0xf]  ;;  %v7653_v10 = vld [vmem:[#allocation4 + $0x43c] sm:$0xf0] }
  0xb2   :  { %3813 = vmatpush.bf16.msra.mxu1 %v6012_v31  ;;  %v7260_v31 = vor.u32 %v8075_v17, %v7257_v19  ;;  %v6660_v41 = vor.u32 %v7925_v21, %v6657_v28  ;;  %v8003_v17 = vld [vmem:[#allocation4 + $0xf34] sm:$0xf]  ;;  %v6969_v19 = vld [vmem:[#allocation4 + $0xf48] sm:$0xf0]  ;;  %v5751_v11 = vld [vmem:[#allocation4 + $0x5a8] sm:$0xf] }
  0xb3   :  { %3826 = vmatpush.bf16.msra.mxu2 %v6204_v32  ;;  %v8021_v32 = vld [vmem:[#allocation4 + $0xfc4] sm:$0xf]  ;;  %v8051_v21 = vld [vmem:[#allocation4 + $0x10b4] sm:$0xf] }
  0xb4   :  { %3839 = vmatpush.bf16.msra.mxu3 %v6396_v39  ;;  %v7233_v39 = vld [vmem:[#allocation4 + $0x1158] sm:$0xf0]  ;;  %v7044_v44 = vor.u32 %v8021_v32, %v7041_v33 }
  0xb5   :  { %3801 = vmatpush.bf16.msra.mxu0 %v5796_v47  ;;  %v694_v47 = vperm.slane %v8389_v35, 0  ;;  %v7236_v48 = vor.u32 %v8069_v36, %v7233_v39  ;;  %v6972_v36 = vor.u32 %v8003_v17, %v6969_v19  ;;  %v7949_v39 = vld [vmem:[#allocation4 + $0xd84] sm:$0xf]  ;;  %v5151_v17 = vld [vmem:[#allocation4 + $0xf8] sm:$0xf] }
  0xb6   :  { %3814 = vmatpush.bf16.msra.mxu1 %v5988_v51  ;;  %v7017_v51 = vld [vmem:[#allocation4 + $0xfa8] sm:$0xf0]  ;;  %v7551_v19 = vld [vmem:[#allocation4 + $0x10c] sm:$0xf0] }
  0xb7   :  { %3827 = vmatpush.bf16.msra.mxu2 %v6180_v52  ;;  %v8063_v52 = vld [vmem:[#allocation4 + $0x1114] sm:$0xf] }
  0xb8   :  { %3840 = vmatpush.bf16.msra.mxu3 %v6372_v55  ;;  %3802 = vmatmul.bf16.vlgmr.msra.gmra.mxu0 %v8359_v37  ;;  %v3595_v55 = vpop.f32.mrf.mxu0 }
  0xb9   :  { %3846 = vmatpush.bf16.msrb.mxu0 %v6732_v56  ;;  %3815 = vmatmul.bf16.vlgmr.msra.gmra.mxu1 %v8363_v40  ;;  %v6828_v56 = vor.u32 %v7967_v46, %v6825_v49  ;;  %v3596_v61 = vadd.f32 %v3595_v55, %v694_v47  ;;  %v8045_v46 = vld [vmem:[#allocation4 + $0x1084] sm:$0xf]  ;;  %v7137_v47 = vld [vmem:[#allocation4 + $0x1098] sm:$0xf0]  ;;  %v7563_v49 = vld [vmem:[#allocation4 + $0x16c] sm:$0xf0] }
  0xba   :  { %3859 = vmatpush.bf16.msrb.mxu1 %v6924_v57  ;;  %3828 = vmatmul.bf16.vlgmr.msra.gmra.mxu2 %v8357_v34  ;;  %v7020_v57 = vor.u32 %v8015_v50, %v7017_v51  ;;  %v5391_v50 = vld [vmem:[#allocation4 + $0x2d8] sm:$0xf] }
  0xbb   :  { %3872 = vmatpush.bf16.msrb.mxu2 %v7116_v58  ;;  %3841 = vmatmul.bf16.vlgmr.msra.gmra.mxu3 %v8361_v38  ;;  %v7913_v58 = vld [vmem:[#allocation4 + $0xc64] sm:$0xf] }
  0xbc   :  { %3885 = vmatpush.bf16.msrb.mxu3 %v7308_v62  ;;  %v7212_v62 = vor.u32 %v8063_v52, %v7209_v53  ;;  %v7611_v52 = vld [vmem:[#allocation4 + $0x2ec] sm:$0xf0]  ;;  %v5583_v53 = vld [vmem:[#allocation4 + $0x458] sm:$0xf] }
  0xbd   :  { %3847 = vmatpush.bf16.msrb.mxu0 %v6708_v4  ;;  %v6612_v4 = vor.u32 %v7913_v58, %v6609_v59  ;;  %v5775_v58 = vld [vmem:[#allocation4 + $0x5d8] sm:$0xf]  ;;  %v7707_v59 = vld [vmem:[#allocation4 + $0x5ec] sm:$0xf0] }
  0xbe   :  { %3860 = vmatpush.bf16.msrb.mxu1 %v6900_v5  ;;  %v3608_v5 = vpop.f32.mrf.mxu1  ;;  %v3634_v28 = vpop.f32.mrf.mxu3 }
  0xbf   :  { %3873 = vmatpush.bf16.msrb.mxu2 %v7092_v6  ;;  %v6804_v6 = vor.u32 %v7961_v60, %v6801_v63  ;;  %v3609_v13 = vadd.f32 %v3608_v5, %v3596_v61  ;;  %v7140_v60 = vor.u32 %v8045_v46, %v7137_v47  ;;  %v5392_v63 = vor.u32 %v7611_v52, %v5391_v50  ;;  %v7641_v46 = vld [vmem:[#allocation4 + $0x3dc] sm:$0xf0]  ;;  %v5703_v47 = vld [vmem:[#allocation4 + $0x548] sm:$0xf] }
  0xc0   :  { %3886 = vmatpush.bf16.msrb.mxu3 %v7284_v12  ;;  %v7955_v12 = vld [vmem:[#allocation4 + $0xdb4] sm:$0xf]  ;;  %v3597_v32 = vpop.f32.mrf.mxu0  ;;  %v5776_v5 = vor.u32 %v7707_v59, %v5775_v58  ;;  %v7587_v59 = vld [vmem:[#allocation4 + $0x22c] sm:$0xf0] }
  0xc1   :  { %3848 = vmatpush.bf16.msrb.mxu0 %v6684_v20  ;;  %v3621_v20 = vpop.f32.mrf.mxu2  ;;  %v6780_v33 = vor.u32 %v7955_v12, %v6777_v16  ;;  %v7701_v12 = vld [vmem:[#allocation4 + $0x5bc] sm:$0xf0] }
  0xc2   :  { %3861 = vmatpush.bf16.msrb.mxu1 %v6876_v24  ;;  %v7161_v24 = vld [vmem:[#allocation4 + $0x10c8] sm:$0xf0] }
  0xc3   :  { %3874 = vmatpush.bf16.msrb.mxu2 %v7068_v26  ;;  %v3622_v26 = vadd.f32 %v3621_v20, %v3609_v13  ;;  %v5176_v13 = vor.u32 %v7557_v2, %v5175_v1  ;;  %v5343_v20 = vld [vmem:[#allocation4 + $0x278] sm:$0xf] }
  0xc4   :  { %3887 = vmatpush.bf16.msrb.mxu3 %v7260_v31  ;;  %v6561_v31 = vld [vmem:[#allocation4 + $0xc18] sm:$0xf0] }
  0xc5   :  { %3849 = vmatpush.bf16.msrb.mxu0 %v6660_v41  ;;  %v6753_v41 = vld [vmem:[#allocation4 + $0xd98] sm:$0xf0]  ;;  %v6564_v51 = vor.u32 %v7901_v30, %v6561_v31  ;;  %v7695_v30 = vld [vmem:[#allocation4 + $0x58c] sm:$0xf0]  ;;  %v5152_v31 = vor.u32 %v7551_v19, %v5151_v17  ;;  %v7677_v17 = vld [vmem:[#allocation4 + $0x4fc] sm:$0xf0] }
  0xc6   :  { %3862 = vmatpush.bf16.msrb.mxu1 %v6852_v43  ;;  %v8392_v43 = vadd.f32 %v3634_v28, %v3622_v26  ;;  %v3610_v55 = vpop.f32.mrf.mxu1  ;;  %v5535_v26 = vld [vmem:[#allocation4 + $0x3f8] sm:$0xf]  ;;  %v7647_v28 = vld [vmem:[#allocation4 + $0x40c] sm:$0xf0] }
  0xc7   :  { %3875 = vmatpush.bf16.msrb.mxu2 %v7044_v44  ;;  %v7164_v44 = vor.u32 %v8051_v21, %v7161_v24  ;;  %v5752_v21 = vor.u32 %v7701_v12, %v5751_v11  ;;  %v7599_v24 = vld [vmem:[#allocation4 + $0x28c] sm:$0xf0]  ;;  %v5295_v55 = vld [vmem:[#allocation4 + $0x218] sm:$0xf]  ;;  %v5463_v11 = vld [vmem:[#allocation4 + $0x368] sm:$0xf] }
  0xc8   :  { %3888 = vmatpush.bf16.msrb.mxu3 %v7236_v48  ;;  %v5199_v48 = vld [vmem:[#allocation4 + $0x158] sm:$0xf]  ;;  %v5344_v32 = vor.u32 %v7599_v24, %v5343_v20  ;;  %v5296_v2 = vor.u32 %v7587_v59, %v5295_v55  ;;  %v7629_v12 = vld [vmem:[#allocation4 + $0x37c] sm:$0xf0]  ;;  %v5607_v55 = vld [vmem:[#allocation4 + $0x488] sm:$0xf] }
  0xc9   :  { %3850 = vmatpush.bf16.msrb.mxu0 %v6636_v54  ;;  %v7659_v54 = vld [vmem:[#allocation4 + $0x46c] sm:$0xf0]  ;;  %v5200_v61 = vor.u32 %v7563_v49, %v5199_v48  ;;  %v7689_v48 = vld [vmem:[#allocation4 + $0x55c] sm:$0xf0] }
  0xca   :  { %3863 = vmatpush.bf16.msrb.mxu1 %v6828_v56  ;;  %v6756_v56 = vor.u32 %v7949_v39, %v6753_v41  ;;  %v5584_v0 = vor.u32 %v7659_v54, %v5583_v53  ;;  %v7545_v39 = vld [vmem:[#allocation4 + $0xdc] sm:$0xf0]  ;;  %v5319_v41 = vld [vmem:[#allocation4 + $0x248] sm:$0xf]  ;;  %v5103_v53 = vld [vmem:[#allocation4 + $0x98] sm:$0xf]  ;;  %v5704_v58 = vor.u32 %v7689_v48, %v5703_v47 }
  0xcb   :  { %3876 = vmatpush.bf16.msrb.mxu2 %v7020_v57  ;;  %v6948_v57 = vor.u32 %v7997_v42, %v6945_v45  ;;  %v5511_v45 = vld [vmem:[#allocation4 + $0x3c8] sm:$0xf]  ;;  %v7539_v54 = vld [vmem:[#allocation4 + $0xac] sm:$0xf0] }
  0xcc   :  { %3889 = vmatpush.bf16.msrb.mxu3 %v7212_v62  ;;  %v3623_v62 = vpop.f32.mrf.mxu2  ;;  %v5512_v52 = vor.u32 %v7641_v46, %v5511_v45  ;;  %v5104_v1 = vor.u32 %v7539_v54, %v5103_v53  ;;  %v5031_v45 = vld [vmem:[#allocation4 + $0x8] sm:$0xf]  ;;  %v7521_v46 = vld [vmem:[#allocation4 + $0x1c] sm:$0xf0]  ;;  %v7755_v59 = vld [vmem:[#allocation4 + $0x76c] sm:$0xf0] }
  0xcd   :  { %3851 = vmatpush.bf16.msrb.mxu0 %v6612_v4  ;;  %v3636_v4 = vpop.f32.mrf.mxu3  ;;  %v5679_v62 = vld [vmem:[#allocation4 + $0x518] sm:$0xf]  ;;  %v7617_v54 = vld [vmem:[#allocation4 + $0x31c] sm:$0xf0] }
  0xce   :  { %3864 = vmatpush.bf16.msrb.mxu1 %v6804_v6  ;;  %v7605_v6 = vld [vmem:[#allocation4 + $0x2bc] sm:$0xf0]  ;;  %v5079_v4 = vld [vmem:[#allocation4 + $0x68] sm:$0xf] }
  0xcf   :  { %3877 = vmatpush.bf16.msrb.mxu2 %v6996_v7  ;;  %v5559_v7 = vld [vmem:[#allocation4 + $0x428] sm:$0xf] }
  0xd0   :  { %3890 = vmatpush.bf16.msrb.mxu3 %v7188_v14  ;;  %v5368_v14 = vor.u32 %v7605_v6, %v5367_v3  ;;  %v5560_v16 = vor.u32 %v7653_v10, %v5559_v7  ;;  %v5271_v6 = vld [vmem:[#allocation4 + $0x1e8] sm:$0xf]  ;;  %v7581_v10 = vld [vmem:[#allocation4 + $0x1fc] sm:$0xf0] }
  0xd1   :  { %3852 = vmatpush.bf16.msrb.mxu0 %v6588_v29  ;;  %v5727_v29 = vld [vmem:[#allocation4 + $0x578] sm:$0xf]  ;;  %v5272_v24 = vor.u32 %v7581_v10, %v5271_v6  ;;  %v5943_v10 = vld [vmem:[#allocation4 + $0x728] sm:$0xf] }
  0xd2   :  { %3865 = vmatpush.bf16.msrb.mxu1 %v6780_v33  ;;  %v5536_v33 = vor.u32 %v7647_v28, %v5535_v26  ;;  %v5728_v42 = vor.u32 %v7695_v30, %v5727_v29  ;;  %v5464_v26 = vor.u32 %v7629_v12, %v5463_v11  ;;  %v5055_v28 = vld [vmem:[#allocation4 + $0x38] sm:$0xf]  ;;  %v7527_v29 = vld [vmem:[#allocation4 + $0x4c] sm:$0xf0]  ;;  %v7749_v11 = vld [vmem:[#allocation4 + $0x73c] sm:$0xf0] }
  0xd3   :  { %3878 = vmatpush.bf16.msrb.mxu2 %v6972_v36  ;;  %v5127_v36 = vld [vmem:[#allocation4 + $0xc8] sm:$0xf]  ;;  %v5247_v30 = vld [vmem:[#allocation4 + $0x1b8] sm:$0xf] }
  0xd4   :  { %3891 = vmatpush.bf16.msrb.mxu3 %v7164_v44  ;;  %v7593_v44 = vld [vmem:[#allocation4 + $0x25c] sm:$0xf0]  ;;  %v5128_v49 = vor.u32 %v7545_v39, %v5127_v36  ;;  %v5439_v36 = vld [vmem:[#allocation4 + $0x338] sm:$0xf]  ;;  %v7623_v39 = vld [vmem:[#allocation4 + $0x34c] sm:$0xf0] }
  0xd5   :  { %3853 = vmatpush.bf16.msrb.mxu0 %v6564_v51  ;;  %v3647_v50 = vpop.f32.mrf.mxu0  ;;  %v5320_v51 = vor.u32 %v7593_v44, %v5319_v41  ;;  %v5631_v41 = vld [vmem:[#allocation4 + $0x4b8] sm:$0xf]  ;;  %v5056_v44 = vor.u32 %v7527_v29, %v5055_v28  ;;  %v5440_v48 = vor.u32 %v7623_v39, %v5439_v36  ;;  %v6135_v12 = vld [vmem:[#allocation4 + $0x8a8] sm:$0xf]  ;;  %v7839_v39 = vld [vmem:[#allocation4 + $0xa0c] sm:$0xf0] }
  0xd6   :  { %3866 = vmatpush.bf16.msrb.mxu1 %v6756_v56  ;;  %v3648_v56 = vadd.f32 %v3647_v50, %v8392_v43  ;;  %v7569_v50 = vld [vmem:[#allocation4 + $0x19c] sm:$0xf0]  ;;  %v5919_v29 = vld [vmem:[#allocation4 + $0x6f8] sm:$0xf] }
  0xd7   :  { %3879 = vmatpush.bf16.msrb.mxu2 %v6948_v57  ;;  %v3660_v57 = vpop.f32.mrf.mxu1  ;;  %v6303_v36 = vld [vmem:[#allocation4 + $0x9f8] sm:$0xf] }
  0xd8   :  { %3892 = vmatpush.bf16.msrb.mxu3 %v7140_v60  ;;  %3854 = vmatmul.bf16.vlgmr.msrb.gmra.mxu0 %v8369_v18  ;;  %v5487_v60 = vld [vmem:[#allocation4 + $0x398] sm:$0xf] }
  0xd9   :  { %3898 = vmatpush.bf16.msra.mxu0 %v5200_v61  ;;  %3867 = vmatmul.bf16.vlgmr.msrb.gmra.mxu1 %v8373_v23  ;;  %v7635_v61 = vld [vmem:[#allocation4 + $0x3ac] sm:$0xf0] }
  0xda   :  { %3911 = vmatpush.bf16.msra.mxu1 %v5392_v63  ;;  %3880 = vmatmul.bf16.vlgmr.msrb.gmra.mxu2 %v8371_v22  ;;  %v7683_v63 = vld [vmem:[#allocation4 + $0x52c] sm:$0xf0]  ;;  %v5488_v3 = vor.u32 %v7635_v61, %v5487_v60  ;;  %v6159_v60 = vld [vmem:[#allocation4 + $0x8d8] sm:$0xf]  ;;  %v5032_v61 = vor.u32 %v7521_v46, %v5031_v45  ;;  %v6304_v46 = vor.u32 %v7839_v39, %v6303_v36 }
  0xdb   :  { %3924 = vmatpush.bf16.msra.mxu2 %v5584_v0  ;;  %3893 = vmatmul.bf16.vlgmr.msrb.gmra.mxu3 %v8375_v27  ;;  %v3661_v0 = vadd.f32 %v3660_v57, %v3648_v56  ;;  %v5680_v43 = vor.u32 %v7683_v63, %v5679_v62  ;;  %v7665_v56 = vld [vmem:[#allocation4 + $0x49c] sm:$0xf0]  ;;  %v7803_v62 = vld [vmem:[#allocation4 + $0x8ec] sm:$0xf0]  ;;  %v6351_v63 = vld [vmem:[#allocation4 + $0xa58] sm:$0xf] }
  0xdc   :  { %3937 = vmatpush.bf16.msra.mxu3 %v5776_v5  ;;  %v7533_v5 = vld [vmem:[#allocation4 + $0x7c] sm:$0xf0] }
  0xdd   :  { %3899 = vmatpush.bf16.msra.mxu0 %v5176_v13  ;;  %v3673_v7 = vpop.f32.mrf.mxu2  ;;  %v5080_v19 = vor.u32 %v7533_v5, %v5079_v4  ;;  %v7899_v4 = vld [vmem:[#allocation4 + $0xbec] sm:$0xf0]  ;;  %v5608_v5 = vor.u32 %v7665_v56, %v5607_v55  ;;  %v6471_v55 = vld [vmem:[#allocation4 + $0xb48] sm:$0xf]  ;;  %v7881_v56 = vld [vmem:[#allocation4 + $0xb5c] sm:$0xf0] }
  0xde   :  { %3912 = vmatpush.bf16.msra.mxu1 %v5368_v14  ;;  %v3674_v13 = vadd.f32 %v3673_v7, %v3661_v0  ;;  %v3686_v14 = vpop.f32.mrf.mxu3  ;;  %v7851_v0 = vld [vmem:[#allocation4 + $0xa6c] sm:$0xf0]  ;;  %v6160_v7 = vor.u32 %v7803_v62, %v6159_v60  ;;  %v5871_v62 = vld [vmem:[#allocation4 + $0x698] sm:$0xf] }
  0xdf   :  { %3925 = vmatpush.bf16.msra.mxu2 %v5560_v16  ;;  %v5655_v16 = vld [vmem:[#allocation4 + $0x4e8] sm:$0xf] }
  0xe0   :  { %3938 = vmatpush.bf16.msra.mxu3 %v5752_v21  ;;  %v8399_v20 = vadd.f32 %v3686_v14, %v3674_v13  ;;  %v3649_v21 = vpop.f32.mrf.mxu0  ;;  %v7797_v14 = vld [vmem:[#allocation4 + $0x8bc] sm:$0xf0] }
  0xe1   :  { %3900 = vmatpush.bf16.msra.mxu0 %v5152_v31  ;;  %v3662_v31 = vpop.f32.mrf.mxu1  ;;  %v7893_v21 = vld [vmem:[#allocation4 + $0xbbc] sm:$0xf0] }
  0xe2   :  { %3913 = vmatpush.bf16.msra.mxu1 %v5344_v32  ;;  %v5656_v32 = vor.u32 %v7677_v17, %v5655_v16  ;;  %v6327_v16 = vld [vmem:[#allocation4 + $0xa28] sm:$0xf]  ;;  %v7845_v17 = vld [vmem:[#allocation4 + $0xa3c] sm:$0xf0]  ;;  %v6111_v31 = vld [vmem:[#allocation4 + $0x878] sm:$0xf] }
  0xe3   :  { %3926 = vmatpush.bf16.msra.mxu2 %v5536_v33  ;;  %v7575_v33 = vld [vmem:[#allocation4 + $0x1cc] sm:$0xf0]  ;;  %v6328_v28 = vor.u32 %v7845_v17, %v6327_v16  ;;  %v7773_v17 = vld [vmem:[#allocation4 + $0x7fc] sm:$0xf0] }
  0xe4   :  { %3939 = vmatpush.bf16.msra.mxu3 %v5728_v42  ;;  %v7671_v42 = vld [vmem:[#allocation4 + $0x4cc] sm:$0xf0]  ;;  %v5248_v47 = vor.u32 %v7575_v33, %v5247_v30 }
  0xe5   :  { %3901 = vmatpush.bf16.msra.mxu0 %v5128_v49  ;;  %v5223_v49 = vld [vmem:[#allocation4 + $0x188] sm:$0xf]  ;;  %v5632_v53 = vor.u32 %v7671_v42, %v5631_v41  ;;  %v7743_v30 = vld [vmem:[#allocation4 + $0x70c] sm:$0xf0]  ;;  %v6495_v41 = vld [vmem:[#allocation4 + $0xb78] sm:$0xf] }
  0xe6   :  { %3914 = vmatpush.bf16.msra.mxu1 %v5320_v51  ;;  %v5415_v51 = vld [vmem:[#allocation4 + $0x308] sm:$0xf]  ;;  %v3688_v57 = vpop.f32.mrf.mxu3  ;;  %v7791_v33 = vld [vmem:[#allocation4 + $0x88c] sm:$0xf0] }
  0xe7   :  { %3927 = vmatpush.bf16.msra.mxu2 %v5512_v52  ;;  %v3675_v52 = vpop.f32.mrf.mxu2  ;;  %v7887_v42 = vld [vmem:[#allocation4 + $0xb8c] sm:$0xf0]  ;;  %v6112_v45 = vor.u32 %v7791_v33, %v6111_v31 }
  0xe8   :  { %3940 = vmatpush.bf16.msra.mxu3 %v5704_v58  ;;  %v5967_v58 = vld [vmem:[#allocation4 + $0x758] sm:$0xf]  ;;  %v6279_v52 = vld [vmem:[#allocation4 + $0x9c8] sm:$0xf] }
  0xe9   :  { %3902 = vmatpush.bf16.msra.mxu0 %v5104_v1  ;;  %v5224_v1 = vor.u32 %v7569_v50, %v5223_v49  ;;  %v5968_v6 = vor.u32 %v7755_v59, %v5967_v58  ;;  %v6087_v49 = vld [vmem:[#allocation4 + $0x848] sm:$0xf]  ;;  %v6496_v50 = vor.u32 %v7887_v42, %v6495_v41  ;;  %v5823_v41 = vld [vmem:[#allocation4 + $0x638] sm:$0xf]  ;;  %v7719_v42 = vld [vmem:[#allocation4 + $0x64c] sm:$0xf0] }
  0xea   :  { %3915 = vmatpush.bf16.msra.mxu1 %v5296_v2  ;;  %v5416_v2 = vor.u32 %v7617_v54, %v5415_v51  ;;  %v7785_v51 = vld [vmem:[#allocation4 + $0x85c] sm:$0xf0] }
  0xeb   :  { %3928 = vmatpush.bf16.msra.mxu2 %v5488_v3  ;;  %v6543_v3 = vld [vmem:[#allocation4 + $0xbd8] sm:$0xf]  ;;  %v6088_v60 = vor.u32 %v7785_v51, %v6087_v49  ;;  %v5824_v51 = vor.u32 %v7719_v42, %v5823_v41  ;;  %v7935_v42 = vld [vmem:[#allocation4 + $0xd0c] sm:$0xf0] }
  0xec   :  { %3941 = vmatpush.bf16.msra.mxu3 %v5680_v43  ;;  %v6352_v43 = vor.u32 %v7851_v0, %v6351_v63  ;;  %v6544_v13 = vor.u32 %v7899_v4, %v6543_v3  ;;  %v7731_v63 = vld [vmem:[#allocation4 + $0x6ac] sm:$0xf0]  ;;  %v6063_v0 = vld [vmem:[#allocation4 + $0x818] sm:$0xf] }
  0xed   :  { %3903 = vmatpush.bf16.msra.mxu0 %v5080_v19  ;;  %v6519_v19 = vld [vmem:[#allocation4 + $0xba8] sm:$0xf]  ;;  %v7779_v3 = vld [vmem:[#allocation4 + $0x82c] sm:$0xf0]  ;;  %v6255_v4 = vld [vmem:[#allocation4 + $0x998] sm:$0xf] }
  0xee   :  { %3916 = vmatpush.bf16.msra.mxu1 %v5272_v24  ;;  %v5944_v24 = vor.u32 %v7749_v11, %v5943_v10  ;;  %v5847_v11 = vld [vmem:[#allocation4 + $0x668] sm:$0xf]  ;;  %v6399_v49 = vld [vmem:[#allocation4 + $0xab8] sm:$0xf] }
  0xef   :  { %3929 = vmatpush.bf16.msra.mxu2 %v5464_v26  ;;  %v6136_v26 = vor.u32 %v7797_v14, %v6135_v12  ;;  %v7725_v12 = vld [vmem:[#allocation4 + $0x67c] sm:$0xf0]  ;;  %v6687_v41 = vld [vmem:[#allocation4 + $0xcf8] sm:$0xf] }
  0xf0   :  { %3942 = vmatpush.bf16.msra.mxu3 %v5656_v32  ;;  %v6520_v32 = vor.u32 %v7893_v21, %v6519_v19  ;;  %v6231_v19 = vld [vmem:[#allocation4 + $0x968] sm:$0xf]  ;;  %v7821_v21 = vld [vmem:[#allocation4 + $0x97c] sm:$0xf0]  ;;  %v5848_v31 = vor.u32 %v7725_v12, %v5847_v11  ;;  %v8091_v11 = vld [vmem:[#allocation4 + $0x11ec] sm:$0xf0] }
  0xf1   :  { %3904 = vmatpush.bf16.msra.mxu0 %v5056_v44  ;;  %v5920_v44 = vor.u32 %v7743_v30, %v5919_v29  ;;  %v7869_v29 = vld [vmem:[#allocation4 + $0xafc] sm:$0xf0]  ;;  %v6232_v39 = vor.u32 %v7821_v21, %v6231_v19  ;;  %v6903_v21 = vld [vmem:[#allocation4 + $0xea8] sm:$0xf] }
  0xf2   :  { %3917 = vmatpush.bf16.msra.mxu1 %v5248_v47  ;;  %v5895_v47 = vld [vmem:[#allocation4 + $0x6c8] sm:$0xf]  ;;  %v7941_v19 = vld [vmem:[#allocation4 + $0xd3c] sm:$0xf0] }
  0xf3   :  { %3930 = vmatpush.bf16.msra.mxu2 %v5440_v48  ;;  %v7737_v48 = vld [vmem:[#allocation4 + $0x6dc] sm:$0xf0] }
  0xf4   :  { %3943 = vmatpush.bf16.msra.mxu3 %v5632_v53  ;;  %v7833_v53 = vld [vmem:[#allocation4 + $0x9dc] sm:$0xf0]  ;;  %v5896_v58 = vor.u32 %v7737_v48, %v5895_v47  ;;  %v6207_v47 = vld [vmem:[#allocation4 + $0x938] sm:$0xf]  ;;  %v7815_v48 = vld [vmem:[#allocation4 + $0x94c] sm:$0xf0] }
  0xf5   :  { %3905 = vmatpush.bf16.msra.mxu0 %v5032_v61  ;;  %v3699_v54 = vpop.f32.mrf.mxu0  ;;  %v6280_v61 = vor.u32 %v7833_v53, %v6279_v52  ;;  %v5799_v52 = vld [vmem:[#allocation4 + $0x608] sm:$0xf]  ;;  %v7713_v53 = vld [vmem:[#allocation4 + $0x61c] sm:$0xf0] }
  0xf6   :  { %3918 = vmatpush.bf16.msra.mxu1 %v5224_v1  ;;  %v3700_v57 = vadd.f32 %v3699_v54, %v8399_v20  ;;  %v3712_v59 = vpop.f32.mrf.mxu1  ;;  %v6472_v1 = vor.u32 %v7881_v56, %v6471_v55  ;;  %v6064_v20 = vor.u32 %v7779_v3, %v6063_v0  ;;  %v6208_v55 = vor.u32 %v7815_v48, %v6207_v47  ;;  %v5991_v56 = vld [vmem:[#allocation4 + $0x788] sm:$0xf]  ;;  %v6735_v0 = vld [vmem:[#allocation4 + $0xd58] sm:$0xf]  ;;  %v8031_v48 = vld [vmem:[#allocation4 + $0x100c] sm:$0xf0] }
  0xf7   :  { %3931 = vmatpush.bf16.msra.mxu2 %v5416_v2  ;;  %v7071_v47 = vld [vmem:[#allocation4 + $0xff8] sm:$0xf] }
  0xf8   :  { %3944 = vmatpush.bf16.msra.mxu3 %v5608_v5  ;;  %3906 = vmatmul.bf16.vlgmr.msra.gmra.mxu0 %v8347_v9  ;;  %v3713_v2 = vadd.f32 %v3712_v59, %v3700_v57  ;;  %v7827_v5 = vld [vmem:[#allocation4 + $0x9ac] sm:$0xf0]  ;;  %v7761_v57 = vld [vmem:[#allocation4 + $0x79c] sm:$0xf0] }
  0xf9   :  { %3950 = vmatpush.bf16.msrb.mxu0 %v5968_v6  ;;  %3919 = vmatmul.bf16.vlgmr.msra.gmra.mxu1 %v8354_v25  ;;  %v6447_v6 = vld [vmem:[#allocation4 + $0xb18] sm:$0xf]  ;;  %v6256_v10 = vor.u32 %v7827_v5, %v6255_v4  ;;  %v5800_v4 = vor.u32 %v7713_v53, %v5799_v52  ;;  %v7995_v5 = vld [vmem:[#allocation4 + $0xeec] sm:$0xf0]  ;;  %v6663_v52 = vld [vmem:[#allocation4 + $0xcc8] sm:$0xf] }
  0xfa   :  { %3963 = vmatpush.bf16.msrb.mxu1 %v6160_v7  ;;  %3932 = vmatmul.bf16.vlgmr.msra.gmra.mxu2 %v8345_v8  ;;  %v7875_v7 = vld [vmem:[#allocation4 + $0xb2c] sm:$0xf0] }
  0xfb   :  { %3976 = vmatpush.bf16.msrb.mxu2 %v6352_v43  ;;  %3945 = vmatmul.bf16.vlgmr.msra.gmra.mxu3 %v8349_v15  ;;  %v5872_v43 = vor.u32 %v7731_v63, %v5871_v62  ;;  %v6448_v14 = vor.u32 %v7875_v7, %v6447_v6  ;;  %v7857_v62 = vld [vmem:[#allocation4 + $0xa9c] sm:$0xf0]  ;;  %v7119_v6 = vld [vmem:[#allocation4 + $0x1058] sm:$0xf]  ;;  %v8043_v7 = vld [vmem:[#allocation4 + $0x106c] sm:$0xf0] }
  0xfc   :  { %3989 = vmatpush.bf16.msrb.mxu3 %v6544_v13  ;;  %v6039_v13 = vld [vmem:[#allocation4 + $0x7e8] sm:$0xf] }
  0xfd   :  { %3951 = vmatpush.bf16.msrb.mxu0 %v5944_v24  ;;  %v3725_v16 = vpop.f32.mrf.mxu2  ;;  %v3701_v30 = vpop.f32.mrf.mxu0  ;;  %v6040_v36 = vor.u32 %v7773_v17, %v6039_v13  ;;  %v6711_v17 = vld [vmem:[#allocation4 + $0xd28] sm:$0xf] }
  0xfe   :  { %3964 = vmatpush.bf16.msrb.mxu1 %v6136_v26  ;;  %v3726_v24 = vadd.f32 %v3725_v16, %v3713_v2  ;;  %v3738_v26 = vpop.f32.mrf.mxu3  ;;  %v6927_v2 = vld [vmem:[#allocation4 + $0xed8] sm:$0xf]  ;;  %v7120_v16 = vor.u32 %v8043_v7, %v7119_v6  ;;  %v7287_v30 = vld [vmem:[#allocation4 + $0x11a8] sm:$0xf] }
  0xff   :  { %3977 = vmatpush.bf16.msrb.mxu2 %v6328_v28  ;;  %v6423_v28 = vld [vmem:[#allocation4 + $0xae8] sm:$0xf]  ;;  %v6831_v6 = vld [vmem:[#allocation4 + $0xe18] sm:$0xf] }
 0x100   :  { %3990 = vmatpush.bf16.msrb.mxu3 %v6520_v32  ;;  %v3714_v32 = vpop.f32.mrf.mxu1  ;;  %v8406_v33 = vadd.f32 %v3738_v26, %v3726_v24  ;;  %v7989_v26 = vld [vmem:[#allocation4 + $0xebc] sm:$0xf0] }
 0x101   :  { %3952 = vmatpush.bf16.msrb.mxu0 %v5920_v44  ;;  %v6015_v44 = vld [vmem:[#allocation4 + $0x7b8] sm:$0xf]  ;;  %v6712_v32 = vor.u32 %v7941_v19, %v6711_v17 }
 0x102   :  { %3965 = vmatpush.bf16.msrb.mxu1 %v6112_v45  ;;  %v6424_v45 = vor.u32 %v7869_v29, %v6423_v28  ;;  %v7095_v28 = vld [vmem:[#allocation4 + $0x1028] sm:$0xf]  ;;  %v8037_v29 = vld [vmem:[#allocation4 + $0x103c] sm:$0xf0] }
 0x103   :  { %3978 = vmatpush.bf16.msrb.mxu2 %v6304_v46  ;;  %v7767_v46 = vld [vmem:[#allocation4 + $0x7cc] sm:$0xf0] }
 0x104   :  { %3991 = vmatpush.bf16.msrb.mxu3 %v6496_v50  ;;  %v7863_v50 = vld [vmem:[#allocation4 + $0xacc] sm:$0xf0]  ;;  %v6016_v54 = vor.u32 %v7767_v46, %v6015_v44  ;;  %v6879_v44 = vld [vmem:[#allocation4 + $0xe78] sm:$0xf] }
 0x105   :  { %3953 = vmatpush.bf16.msrb.mxu0 %v5896_v58  ;;  %v6183_v58 = vld [vmem:[#allocation4 + $0x908] sm:$0xf]  ;;  %v6400_v59 = vor.u32 %v7863_v50, %v6399_v49  ;;  %v3727_v63 = vpop.f32.mrf.mxu2  ;;  %v7983_v46 = vld [vmem:[#allocation4 + $0xe8c] sm:$0xf0]  ;;  %v7263_v49 = vld [vmem:[#allocation4 + $0x1178] sm:$0xf] }
 0x106   :  { %3966 = vmatpush.bf16.msrb.mxu1 %v6088_v60  ;;  %v7809_v60 = vld [vmem:[#allocation4 + $0x91c] sm:$0xf0]  ;;  %v3740_v3 = vpop.f32.mrf.mxu3  ;;  %v8079_v50 = vld [vmem:[#allocation4 + $0x118c] sm:$0xf0]  ;;  %v6880_v53 = vor.u32 %v7983_v46, %v6879_v44 }
 0x107   :  { %3979 = vmatpush.bf16.msrb.mxu2 %v6280_v61  ;;  %v6375_v61 = vld [vmem:[#allocation4 + $0xa88] sm:$0xf]  ;;  %v8073_v63 = vld [vmem:[#allocation4 + $0x115c] sm:$0xf0] }
 0x108   :  { %3992 = vmatpush.bf16.msrb.mxu3 %v6472_v1  ;;  %v7947_v1 = vld [vmem:[#allocation4 + $0xd6c] sm:$0xf0]  ;;  %v6376_v12 = vor.u32 %v7857_v62, %v6375_v61  ;;  %v8025_v61 = vld [vmem:[#allocation4 + $0xfdc] sm:$0xf0]  ;;  %v7239_v62 = vld [vmem:[#allocation4 + $0x1148] sm:$0xf] }
 0x109   :  { %3954 = vmatpush.bf16.msrb.mxu0 %v5872_v43  ;;  %v5992_v43 = vor.u32 %v7761_v57, %v5991_v56  ;;  %v6736_v13 = vor.u32 %v7947_v1, %v6735_v0  ;;  %v6855_v56 = vld [vmem:[#allocation4 + $0xe48] sm:$0xf]  ;;  %v695_v57 = vperm.slane %v8389_v35, 1  ;;  %v7240_v35 = vor.u32 %v8073_v63, %v7239_v62 }
 0x10a   :  { %3967 = vmatpush.bf16.msrb.mxu1 %v6064_v20  ;;  %v6184_v20 = vor.u32 %v7809_v60, %v6183_v58  ;;  %v7264_v58 = vor.u32 %v8079_v50, %v7263_v49  ;;  %v7047_v60 = vld [vmem:[#allocation4 + $0xfc8] sm:$0xf]  ;;  %v6591_v49 = vld [vmem:[#allocation4 + $0xc38] sm:$0xf]  ;;  %v7911_v50 = vld [vmem:[#allocation4 + $0xc4c] sm:$0xf0] }
 0x10b   :  { %3980 = vmatpush.bf16.msrb.mxu2 %v6256_v10  ;;  %v7311_v10 = vld [vmem:[#allocation4 + $0x11d8] sm:$0xf]  ;;  %v7048_v3 = vor.u32 %v8025_v61, %v7047_v60  ;;  %v6567_v60 = vld [vmem:[#allocation4 + $0xc08] sm:$0xf]  ;;  %v7905_v61 = vld [vmem:[#allocation4 + $0xc1c] sm:$0xf0] }
 0x10c   :  { %3993 = vmatpush.bf16.msrb.mxu3 %v6448_v14  ;;  %v6928_v14 = vor.u32 %v7995_v5, %v6927_v2  ;;  %v7312_v24 = vor.u32 %v8091_v11, %v7311_v10  ;;  %v7923_v5 = vld [vmem:[#allocation4 + $0xcac] sm:$0xf0]  ;;  %v7023_v10 = vld [vmem:[#allocation4 + $0xf98] sm:$0xf] }
 0x10d   :  { %3955 = vmatpush.bf16.msrb.mxu0 %v5848_v31  ;;  %v8085_v31 = vld [vmem:[#allocation4 + $0x11bc] sm:$0xf0]  ;;  %v8019_v11 = vld [vmem:[#allocation4 + $0xfac] sm:$0xf0] }
 0x10e   :  { %3968 = vmatpush.bf16.msrb.mxu1 %v6040_v36  ;;  %v6904_v36 = vor.u32 %v7989_v26, %v6903_v21  ;;  %v7024_v19 = vor.u32 %v8019_v11, %v7023_v10  ;;  %v6615_v21 = vld [vmem:[#allocation4 + $0xc68] sm:$0xf]  ;;  %v7608_v10 = vld [vmem:[#allocation4 + $0x2dc] sm:$0xf]  ;;  %v6568_v11 = vor.u32 %v7905_v61, %v6567_v60 }
 0x10f   :  { %3981 = vmatpush.bf16.msrb.mxu2 %v6232_v39  ;;  %v7096_v39 = vor.u32 %v8037_v29, %v7095_v28  ;;  %v6807_v26 = vld [vmem:[#allocation4 + $0xde8] sm:$0xf] }
 0x110   :  { %3994 = vmatpush.bf16.msrb.mxu3 %v6424_v45  ;;  %v7288_v45 = vor.u32 %v8085_v31, %v7287_v30  ;;  %v7965_v30 = vld [vmem:[#allocation4 + $0xdfc] sm:$0xf0]  ;;  %v6999_v31 = vld [vmem:[#allocation4 + $0xf68] sm:$0xf] }
 0x111   :  { %3956 = vmatpush.bf16.msrb.mxu0 %v5824_v51  ;;  %v6688_v51 = vor.u32 %v7935_v42, %v6687_v41  ;;  %v7191_v41 = vld [vmem:[#allocation4 + $0x10e8] sm:$0xf]  ;;  %v8061_v42 = vld [vmem:[#allocation4 + $0x10fc] sm:$0xf0] }
 0x112   :  { %3969 = vmatpush.bf16.msrb.mxu1 %v6016_v54  ;;  %v7072_v54 = vor.u32 %v8031_v48, %v7071_v47  ;;  %v6808_v47 = vor.u32 %v7965_v30, %v6807_v26  ;;  %v7554_v30 = vld [vmem:[#allocation4 + $0x12c] sm:$0xf] }
 0x113   :  { %3982 = vmatpush.bf16.msrb.mxu2 %v6208_v55  ;;  %v7929_v55 = vld [vmem:[#allocation4 + $0xcdc] sm:$0xf0] }
 0x114   :  { %3995 = vmatpush.bf16.msrb.mxu3 %v6400_v59  ;;  %v7977_v59 = vld [vmem:[#allocation4 + $0xe5c] sm:$0xf0]  ;;  %v6664_v0 = vor.u32 %v7929_v55, %v6663_v52  ;;  %v6975_v55 = vld [vmem:[#allocation4 + $0xf38] sm:$0xf] }
 0x115   :  { %3957 = vmatpush.bf16.msrb.mxu0 %v5800_v4  ;;  %v3751_v1 = vpop.f32.mrf.mxu0  ;;  %v6856_v2 = vor.u32 %v7977_v59, %v6855_v56  ;;  %v6639_v4 = vld [vmem:[#allocation4 + $0xc98] sm:$0xf]  ;;  %v8007_v56 = vld [vmem:[#allocation4 + $0xf4c] sm:$0xf0]  ;;  %v6592_v59 = vor.u32 %v7911_v50, %v6591_v49  ;;  %v7548_v50 = vld [vmem:[#allocation4 + $0xfc] sm:$0xf] }
 0x116   :  { %3970 = vmatpush.bf16.msrb.mxu1 %v5992_v43  ;;  %v3752_v7 = vadd.f32 %v3751_v1, %v695_v57  ;;  %v3764_v43 = vpop.f32.mrf.mxu1  ;;  %v7167_v57 = vld [vmem:[#allocation4 + $0x10b8] sm:$0xf]  ;;  %v6976_v63 = vor.u32 %v8007_v56, %v6975_v55  ;;  %v7953_v1 = vld [vmem:[#allocation4 + $0xd9c] sm:$0xf0]  ;;  %v7644_v55 = vld [vmem:[#allocation4 + $0x3fc] sm:$0xf] }
 0x117   :  { %3983 = vmatpush.bf16.msrb.mxu2 %v6184_v20  ;;  %v7971_v20 = vld [vmem:[#allocation4 + $0xe2c] sm:$0xf0]  ;;  %v5537_v56 = vld [vmem:[#allocation4 + $0x410] sm:$0xf0] }
 0x118   :  { %3996 = vmatpush.bf16.msrb.mxu3 %v6376_v12  ;;  %3958 = vmatmul.bf16.vlgmr.msrb.gmra.mxu0 %v8359_v37  ;;  %v7215_v12 = vld [vmem:[#allocation4 + $0x1118] sm:$0xf]  ;;  %v6832_v17 = vor.u32 %v7971_v20, %v6831_v6  ;;  %v7143_v6 = vld [vmem:[#allocation4 + $0x1088] sm:$0xf]  ;;  %v5201_v20 = vld [vmem:[#allocation4 + $0x170] sm:$0xf0]  ;;  %v5540_v61 = vor.u32 %v7644_v55, %v5537_v56 }
 0x119   :  { %4002 = vmatpush.bf16.msra.mxu0 %v6736_v13  ;;  %3971 = vmatmul.bf16.vlgmr.msrb.gmra.mxu1 %v8363_v40  ;;  %v8067_v13 = vld [vmem:[#allocation4 + $0x112c] sm:$0xf0]  ;;  %v7524_v56 = vld [vmem:[#allocation4 + $0x3c] sm:$0xf] }
 0x11a   :  { %4015 = vmatpush.bf16.msra.mxu1 %v6928_v14  ;;  %3984 = vmatmul.bf16.vlgmr.msrb.gmra.mxu2 %v8357_v34  ;;  %v3765_v14 = vadd.f32 %v3764_v43, %v3752_v7  ;;  %v7216_v29 = vor.u32 %v8067_v13, %v7215_v12  ;;  %v8049_v7 = vld [vmem:[#allocation4 + $0x109c] sm:$0xf0]  ;;  %v5393_v12 = vld [vmem:[#allocation4 + $0x2f0] sm:$0xf0]  ;;  %v7656_v13 = vld [vmem:[#allocation4 + $0x45c] sm:$0xf] }
 0x11b   :  { %4028 = vmatpush.bf16.msra.mxu2 %v7120_v16  ;;  %3997 = vmatmul.bf16.vlgmr.msrb.gmra.mxu3 %v8361_v38  ;;  %v6640_v16 = vor.u32 %v7923_v5, %v6639_v4  ;;  %v8001_v5 = vld [vmem:[#allocation4 + $0xf1c] sm:$0xf0] }
 0x11c   :  { %4041 = vmatpush.bf16.msra.mxu3 %v7312_v24  ;;  %v7917_v24 = vld [vmem:[#allocation4 + $0xc7c] sm:$0xf0] }
 0x11d   :  { %4003 = vmatpush.bf16.msra.mxu0 %v6712_v32  ;;  %v3777_v28 = vpop.f32.mrf.mxu2  ;;  %v8013_v32 = vld [vmem:[#allocation4 + $0xf7c] sm:$0xf0]  ;;  %v6616_v44 = vor.u32 %v7917_v24, %v6615_v21  ;;  %v3753_v46 = vpop.f32.mrf.mxu0  ;;  %v5777_v21 = vld [vmem:[#allocation4 + $0x5f0] sm:$0xf0]  ;;  %v7144_v24 = vor.u32 %v8049_v7, %v7143_v6  ;;  %v5705_v6 = vld [vmem:[#allocation4 + $0x560] sm:$0xf0] }
 0x11e   :  { %4016 = vmatpush.bf16.msra.mxu1 %v6904_v36  ;;  %v3778_v36 = vadd.f32 %v3777_v28, %v3765_v14  ;;  %v7000_v48 = vor.u32 %v8013_v32, %v6999_v31  ;;  %v3766_v52 = vpop.f32.mrf.mxu1  ;;  %v5585_v14 = vld [vmem:[#allocation4 + $0x470] sm:$0xf0]  ;;  %v5396_v28 = vor.u32 %v7608_v10, %v5393_v12  ;;  %v5177_v31 = vld [vmem:[#allocation4 + $0x140] sm:$0xf0]  ;;  %v7602_v32 = vld [vmem:[#allocation4 + $0x2ac] sm:$0xf] }
 0x11f   :  { %4029 = vmatpush.bf16.msra.mxu2 %v7096_v39  ;;  %v3790_v39 = vpop.f32.mrf.mxu3  ;;  %v5753_v46 = vld [vmem:[#allocation4 + $0x5c0] sm:$0xf0]  ;;  %v7596_v52 = vld [vmem:[#allocation4 + $0x27c] sm:$0xf] }
 0x120   :  { %4042 = vmatpush.bf16.msra.mxu3 %v7288_v45  ;;  %v8413_v45 = vadd.f32 %v3790_v39, %v3778_v36  ;;  %v5369_v39 = vld [vmem:[#allocation4 + $0x2c0] sm:$0xf0]  ;;  %v7536_v10 = vld [vmem:[#allocation4 + $0x9c] sm:$0xf] }
 0x121   :  { %4004 = vmatpush.bf16.msra.mxu0 %v6688_v51  ;;  %v6783_v51 = vld [vmem:[#allocation4 + $0xdb8] sm:$0xf]  ;;  %v7584_v12 = vld [vmem:[#allocation4 + $0x21c] sm:$0xf] }
 0x122   :  { %4017 = vmatpush.bf16.msra.mxu1 %v6880_v53  ;;  %v7192_v53 = vor.u32 %v8061_v42, %v7191_v41  ;;  %v7650_v41 = vld [vmem:[#allocation4 + $0x42c] sm:$0xf]  ;;  %v5561_v42 = vld [vmem:[#allocation4 + $0x440] sm:$0xf0] }
 0x123   :  { %4030 = vmatpush.bf16.msra.mxu2 %v7072_v54  ;;  %v7959_v54 = vld [vmem:[#allocation4 + $0xdcc] sm:$0xf0]  ;;  %v5564_v49 = vor.u32 %v7650_v41, %v5561_v42  ;;  %v5273_v42 = vld [vmem:[#allocation4 + $0x200] sm:$0xf0] }
 0x124   :  { %4043 = vmatpush.bf16.msra.mxu3 %v7264_v58  ;;  %v8055_v58 = vld [vmem:[#allocation4 + $0x10cc] sm:$0xf0]  ;;  %v6784_v62 = vor.u32 %v7959_v54, %v6783_v51  ;;  %v5153_v51 = vld [vmem:[#allocation4 + $0x110] sm:$0xf0] }
 0x125   :  { %4005 = vmatpush.bf16.msra.mxu0 %v6664_v0  ;;  %v6759_v0 = vld [vmem:[#allocation4 + $0xd88] sm:$0xf]  ;;  %v7168_v4 = vor.u32 %v8055_v58, %v7167_v57  ;;  %v5345_v54 = vld [vmem:[#allocation4 + $0x290] sm:$0xf0]  ;;  %v7692_v57 = vld [vmem:[#allocation4 + $0x57c] sm:$0xf] }
 0x126   :  { %4018 = vmatpush.bf16.msra.mxu1 %v6856_v2  ;;  %v6951_v2 = vld [vmem:[#allocation4 + $0xf08] sm:$0xf]  ;;  %v5729_v58 = vld [vmem:[#allocation4 + $0x590] sm:$0xf0]  ;;  %v5348_v60 = vor.u32 %v7596_v52, %v5345_v54 }
 0x127   :  { %4031 = vmatpush.bf16.msra.mxu2 %v7048_v3  ;;  %v3779_v3 = vpop.f32.mrf.mxu2  ;;  %v3792_v43 = vpop.f32.mrf.mxu3 }
 0x128   :  { %4044 = vmatpush.bf16.msra.mxu3 %v7240_v35  ;;  %v7560_v35 = vld [vmem:[#allocation4 + $0x15c] sm:$0xf]  ;;  %v7638_v3 = vld [vmem:[#allocation4 + $0x3cc] sm:$0xf] }
 0x129   :  { %4006 = vmatpush.bf16.msra.mxu0 %v6640_v16  ;;  %v6760_v16 = vor.u32 %v7953_v1, %v6759_v0  ;;  %v5204_v26 = vor.u32 %v7560_v35, %v5201_v20  ;;  %v7590_v0 = vld [vmem:[#allocation4 + $0x24c] sm:$0xf]  ;;  %v5732_v1 = vor.u32 %v7692_v57, %v5729_v58  ;;  %v5057_v57 = vld [vmem:[#allocation4 + $0x50] sm:$0xf0]  ;;  %v7572_v58 = vld [vmem:[#allocation4 + $0x1bc] sm:$0xf] }
 0x12a   :  { %4019 = vmatpush.bf16.msra.mxu1 %v6832_v17  ;;  %v6952_v17 = vor.u32 %v8001_v5, %v6951_v2  ;;  %v5321_v2 = vld [vmem:[#allocation4 + $0x260] sm:$0xf0]  ;;  %v7686_v5 = vld [vmem:[#allocation4 + $0x54c] sm:$0xf] }
 0x12b   :  { %4032 = vmatpush.bf16.msra.mxu2 %v7024_v19  ;;  %v7704_v19 = vld [vmem:[#allocation4 + $0x5dc] sm:$0xf]  ;;  %v5324_v35 = vor.u32 %v7590_v0, %v5321_v2  ;;  %v5060_v2 = vor.u32 %v7524_v56, %v5057_v57 }
 0x12c   :  { %4045 = vmatpush.bf16.msra.mxu3 %v7216_v29  ;;  %v5588_v29 = vor.u32 %v7656_v13, %v5585_v14  ;;  %v5780_v36 = vor.u32 %v7704_v19, %v5777_v21  ;;  %v7632_v19 = vld [vmem:[#allocation4 + $0x39c] sm:$0xf]  ;;  %v5489_v21 = vld [vmem:[#allocation4 + $0x3b0] sm:$0xf0] }
 0x12d   :  { %4007 = vmatpush.bf16.msra.mxu0 %v6616_v44  ;;  %v7698_v44 = vld [vmem:[#allocation4 + $0x5ac] sm:$0xf]  ;;  %v7668_v0 = vld [vmem:[#allocation4 + $0x4bc] sm:$0xf] }
 0x12e   :  { %4020 = vmatpush.bf16.msra.mxu1 %v6808_v47  ;;  %v5180_v47 = vor.u32 %v7554_v30, %v5177_v31  ;;  %v5492_v31 = vor.u32 %v7632_v19, %v5489_v21  ;;  %v7800_v19 = vld [vmem:[#allocation4 + $0x8dc] sm:$0xf] }
 0x12f   :  { %4033 = vmatpush.bf16.msra.mxu2 %v7000_v48  ;;  %v5372_v48 = vor.u32 %v7602_v32, %v5369_v39  ;;  %v7530_v32 = vld [vmem:[#allocation4 + $0x6c] sm:$0xf]  ;;  %v7740_v57 = vld [vmem:[#allocation4 + $0x6fc] sm:$0xf] }
 0x130   :  { %4046 = vmatpush.bf16.msra.mxu3 %v7192_v53  ;;  %v5756_v53 = vor.u32 %v7698_v44, %v5753_v46  ;;  %v7578_v39 = vld [vmem:[#allocation4 + $0x1ec] sm:$0xf]  ;;  %v5465_v46 = vld [vmem:[#allocation4 + $0x380] sm:$0xf0] }
 0x131   :  { %4008 = vmatpush.bf16.msra.mxu0 %v6592_v59  ;;  %v5156_v59 = vor.u32 %v7548_v50, %v5153_v51  ;;  %v7626_v44 = vld [vmem:[#allocation4 + $0x36c] sm:$0xf]  ;;  %v5657_v50 = vld [vmem:[#allocation4 + $0x500] sm:$0xf0]  ;;  %v5276_v54 = vor.u32 %v7578_v39, %v5273_v42 }
 0x132   :  { %4021 = vmatpush.bf16.msra.mxu1 %v6784_v62  ;;  %v7542_v62 = vld [vmem:[#allocation4 + $0xcc] sm:$0xf]  ;;  %v5468_v55 = vor.u32 %v7626_v44, %v5465_v46  ;;  %v5945_v44 = vld [vmem:[#allocation4 + $0x740] sm:$0xf0] }
 0x133   :  { %4034 = vmatpush.bf16.msra.mxu2 %v6976_v63  ;;  %v5129_v63 = vld [vmem:[#allocation4 + $0xe0] sm:$0xf0]  ;;  %v7746_v42 = vld [vmem:[#allocation4 + $0x72c] sm:$0xf] }
 0x134   :  { %4047 = vmatpush.bf16.msra.mxu3 %v7168_v4  ;;  %v5513_v4 = vld [vmem:[#allocation4 + $0x3e0] sm:$0xf0]  ;;  %v5132_v7 = vor.u32 %v7542_v62, %v5129_v63  ;;  %v7620_v62 = vld [vmem:[#allocation4 + $0x33c] sm:$0xf]  ;;  %v5441_v63 = vld [vmem:[#allocation4 + $0x350] sm:$0xf0] }
 0x135   :  { %4009 = vmatpush.bf16.msra.mxu0 %v6568_v11  ;;  %v3803_v43 = vpop.f32.mrf.mxu0  ;;  %v5516_v20 = vor.u32 %v7638_v3, %v5513_v4  ;;  %v5105_v11 = vld [vmem:[#allocation4 + $0xb0] sm:$0xf0]  ;;  %v7518_v3 = vld [vmem:[#allocation4 + $0xc] sm:$0xf]  ;;  %v5033_v4 = vld [vmem:[#allocation4 + $0x20] sm:$0xf0] }
 0x136   :  { %4022 = vmatpush.bf16.msra.mxu1 %v6760_v16  ;;  %v3804_v13 = vadd.f32 %v3803_v43, %v8413_v45  ;;  %v3816_v14 = vpop.f32.mrf.mxu1  ;;  %v5708_v16 = vor.u32 %v7686_v5, %v5705_v6  ;;  %v5444_v6 = vor.u32 %v7620_v62, %v5441_v63  ;;  %v5225_v43 = vld [vmem:[#allocation4 + $0x1a0] sm:$0xf0]  ;;  %v5036_v21 = vor.u32 %v7518_v3, %v5033_v4  ;;  %v7794_v46 = vld [vmem:[#allocation4 + $0x8ac] sm:$0xf]  ;;  %v7836_v62 = vld [vmem:[#allocation4 + $0x9fc] sm:$0xf] }
 0x137   :  { %4035 = vmatpush.bf16.msra.mxu2 %v6952_v17  ;;  %v5297_v17 = vld [vmem:[#allocation4 + $0x230] sm:$0xf0] }
 0x138   :  { %4048 = vmatpush.bf16.msra.mxu3 %v7144_v24  ;;  %4010 = vmatmul.bf16.vlgmr.msra.gmra.mxu0 %v8369_v18  ;;  %v7680_v24 = vld [vmem:[#allocation4 + $0x51c] sm:$0xf]  ;;  %v5300_v30 = vor.u32 %v7584_v12, %v5297_v17  ;;  %v7662_v12 = vld [vmem:[#allocation4 + $0x48c] sm:$0xf]  ;;  %v5969_v17 = vld [vmem:[#allocation4 + $0x770] sm:$0xf0] }
 0x139   :  { %4054 = vmatpush.bf16.msrb.mxu0 %v5204_v26  ;;  %4023 = vmatmul.bf16.vlgmr.msra.gmra.mxu1 %v8373_v23  ;;  %v5681_v26 = vld [vmem:[#allocation4 + $0x530] sm:$0xf0] }
 0x13a   :  { %4067 = vmatpush.bf16.msrb.mxu1 %v5396_v28  ;;  %4036 = vmatmul.bf16.vlgmr.msra.gmra.mxu2 %v8371_v22  ;;  %v3817_v28 = vadd.f32 %v3816_v14, %v3804_v13  ;;  %v5684_v45 = vor.u32 %v7680_v24, %v5681_v26  ;;  %v5609_v13 = vld [vmem:[#allocation4 + $0x4a0] sm:$0xf0]  ;;  %v6161_v24 = vld [vmem:[#allocation4 + $0x8f0] sm:$0xf0]  ;;  %v7848_v26 = vld [vmem:[#allocation4 + $0xa5c] sm:$0xf] }
 0x13b   :  { %4080 = vmatpush.bf16.msrb.mxu2 %v5588_v29  ;;  %4049 = vmatmul.bf16.vlgmr.msra.gmra.mxu3 %v8375_v27  ;;  %v5108_v29 = vor.u32 %v7536_v10, %v5105_v11  ;;  %v5417_v11 = vld [vmem:[#allocation4 + $0x320] sm:$0xf0]  ;;  %v6305_v63 = vld [vmem:[#allocation4 + $0xa10] sm:$0xf0] }
 0x13c   :  { %4093 = vmatpush.bf16.msrb.mxu3 %v5780_v36  ;;  %v5081_v36 = vld [vmem:[#allocation4 + $0x80] sm:$0xf0]  ;;  %v6308_v4 = vor.u32 %v7836_v62, %v6305_v63 }
 0x13d   :  { %4055 = vmatpush.bf16.msrb.mxu0 %v5180_v47  ;;  %v3829_v41 = vpop.f32.mrf.mxu2  ;;  %v5084_v51 = vor.u32 %v7530_v32, %v5081_v36  ;;  %v6545_v32 = vld [vmem:[#allocation4 + $0xbf0] sm:$0xf0]  ;;  %v5612_v36 = vor.u32 %v7662_v12, %v5609_v13  ;;  %v7878_v12 = vld [vmem:[#allocation4 + $0xb4c] sm:$0xf]  ;;  %v6473_v13 = vld [vmem:[#allocation4 + $0xb60] sm:$0xf0] }
 0x13e   :  { %4068 = vmatpush.bf16.msrb.mxu1 %v5372_v48  ;;  %v3830_v47 = vadd.f32 %v3829_v41, %v3817_v28  ;;  %v3842_v48 = vpop.f32.mrf.mxu3  ;;  %v6353_v28 = vld [vmem:[#allocation4 + $0xa70] sm:$0xf0]  ;;  %v6164_v41 = vor.u32 %v7800_v19, %v6161_v24  ;;  %v7728_v24 = vld [vmem:[#allocation4 + $0x69c] sm:$0xf] }
 0x13f   :  { %4081 = vmatpush.bf16.msrb.mxu2 %v5564_v49  ;;  %v7674_v49 = vld [vmem:[#allocation4 + $0x4ec] sm:$0xf] }
 0x140   :  { %4094 = vmatpush.bf16.msrb.mxu3 %v5756_v53  ;;  %v8420_v52 = vadd.f32 %v3842_v48, %v3830_v47  ;;  %v3805_v53 = vpop.f32.mrf.mxu0  ;;  %v6137_v48 = vld [vmem:[#allocation4 + $0x8c0] sm:$0xf0] }
 0x141   :  { %4056 = vmatpush.bf16.msrb.mxu0 %v5156_v59  ;;  %v3818_v59 = vpop.f32.mrf.mxu1  ;;  %v6521_v53 = vld [vmem:[#allocation4 + $0xbc0] sm:$0xf0] }
 0x142   :  { %4069 = vmatpush.bf16.msrb.mxu1 %v5348_v60  ;;  %v5660_v60 = vor.u32 %v7674_v49, %v5657_v50  ;;  %v7842_v49 = vld [vmem:[#allocation4 + $0xa2c] sm:$0xf]  ;;  %v6329_v50 = vld [vmem:[#allocation4 + $0xa40] sm:$0xf0]  ;;  %v7788_v59 = vld [vmem:[#allocation4 + $0x87c] sm:$0xf] }
 0x143   :  { %4082 = vmatpush.bf16.msrb.mxu2 %v5540_v61  ;;  %v5249_v61 = vld [vmem:[#allocation4 + $0x1d0] sm:$0xf0]  ;;  %v6332_v56 = vor.u32 %v7842_v49, %v6329_v50  ;;  %v6041_v50 = vld [vmem:[#allocation4 + $0x800] sm:$0xf0] }
 0x144   :  { %4095 = vmatpush.bf16.msrb.mxu3 %v5732_v1  ;;  %v5633_v1 = vld [vmem:[#allocation4 + $0x4d0] sm:$0xf0]  ;;  %v5252_v5 = vor.u32 %v7572_v58, %v5249_v61 }
 0x145   :  { %4057 = vmatpush.bf16.msrb.mxu0 %v5132_v7  ;;  %v7566_v7 = vld [vmem:[#allocation4 + $0x18c] sm:$0xf]  ;;  %v5636_v10 = vor.u32 %v7668_v0, %v5633_v1  ;;  %v5921_v58 = vld [vmem:[#allocation4 + $0x710] sm:$0xf0]  ;;  %v7884_v0 = vld [vmem:[#allocation4 + $0xb7c] sm:$0xf] }
 0x146   :  { %4070 = vmatpush.bf16.msrb.mxu1 %v5324_v35  ;;  %v7614_v35 = vld [vmem:[#allocation4 + $0x30c] sm:$0xf]  ;;  %v3844_v14 = vpop.f32.mrf.mxu3  ;;  %v6113_v61 = vld [vmem:[#allocation4 + $0x890] sm:$0xf0] }
 0x147   :  { %4083 = vmatpush.bf16.msrb.mxu2 %v5516_v20  ;;  %v3831_v20 = vpop.f32.mrf.mxu2  ;;  %v6497_v1 = vld [vmem:[#allocation4 + $0xb90] sm:$0xf0]  ;;  %v6116_v3 = vor.u32 %v7788_v59, %v6113_v61 }
 0x148   :  { %4096 = vmatpush.bf16.msrb.mxu3 %v5708_v16  ;;  %v7752_v16 = vld [vmem:[#allocation4 + $0x75c] sm:$0xf]  ;;  %v7830_v20 = vld [vmem:[#allocation4 + $0x9cc] sm:$0xf] }
 0x149   :  { %4058 = vmatpush.bf16.msrb.mxu0 %v5108_v29  ;;  %v5228_v29 = vor.u32 %v7566_v7, %v5225_v43  ;;  %v5972_v39 = vor.u32 %v7752_v16, %v5969_v17  ;;  %v7782_v7 = vld [vmem:[#allocation4 + $0x84c] sm:$0xf]  ;;  %v6500_v43 = vor.u32 %v7884_v0, %v6497_v1  ;;  %v7716_v0 = vld [vmem:[#allocation4 + $0x63c] sm:$0xf]  ;;  %v5825_v1 = vld [vmem:[#allocation4 + $0x650] sm:$0xf0] }
 0x14a   :  { %4071 = vmatpush.bf16.msrb.mxu1 %v5300_v30  ;;  %v5420_v30 = vor.u32 %v7614_v35, %v5417_v11  ;;  %v6089_v35 = vld [vmem:[#allocation4 + $0x860] sm:$0xf0] }
 0x14b   :  { %4084 = vmatpush.bf16.msrb.mxu2 %v5492_v31  ;;  %v7896_v31 = vld [vmem:[#allocation4 + $0xbdc] sm:$0xf]  ;;  %v6092_v19 = vor.u32 %v7782_v7, %v6089_v35  ;;  %v5828_v35 = vor.u32 %v7716_v0, %v5825_v1  ;;  %v6689_v1 = vld [vmem:[#allocation4 + $0xd10] sm:$0xf0] }
 0x14c   :  { %4097 = vmatpush.bf16.msrb.mxu3 %v5684_v45  ;;  %v6356_v45 = vor.u32 %v7848_v26, %v6353_v28  ;;  %v6548_v47 = vor.u32 %v7896_v31, %v6545_v32  ;;  %v5873_v26 = vld [vmem:[#allocation4 + $0x6b0] sm:$0xf0]  ;;  %v7776_v28 = vld [vmem:[#allocation4 + $0x81c] sm:$0xf] }
 0x14d   :  { %4059 = vmatpush.bf16.msrb.mxu0 %v5084_v51  ;;  %v7890_v51 = vld [vmem:[#allocation4 + $0xbac] sm:$0xf]  ;;  %v6065_v31 = vld [vmem:[#allocation4 + $0x830] sm:$0xf0]  ;;  %v7824_v32 = vld [vmem:[#allocation4 + $0x99c] sm:$0xf] }
 0x14e   :  { %4072 = vmatpush.bf16.msrb.mxu1 %v5276_v54  ;;  %v5948_v54 = vor.u32 %v7746_v42, %v5945_v44  ;;  %v7722_v44 = vld [vmem:[#allocation4 + $0x66c] sm:$0xf]  ;;  %v7860_v7 = vld [vmem:[#allocation4 + $0xabc] sm:$0xf] }
 0x14f   :  { %4085 = vmatpush.bf16.msrb.mxu2 %v5468_v55  ;;  %v6140_v55 = vor.u32 %v7794_v46, %v6137_v48  ;;  %v5849_v46 = vld [vmem:[#allocation4 + $0x680] sm:$0xf0]  ;;  %v7932_v0 = vld [vmem:[#allocation4 + $0xcfc] sm:$0xf] }
 0x150   :  { %4098 = vmatpush.bf16.msrb.mxu3 %v5660_v60  ;;  %v6524_v60 = vor.u32 %v7890_v51, %v6521_v53  ;;  %v7818_v51 = vld [vmem:[#allocation4 + $0x96c] sm:$0xf]  ;;  %v6233_v53 = vld [vmem:[#allocation4 + $0x980] sm:$0xf0]  ;;  %v5852_v59 = vor.u32 %v7722_v44, %v5849_v46  ;;  %v7313_v44 = vld [vmem:[#allocation4 + $0x11f0] sm:$0xf0] }
 0x151   :  { %4060 = vmatpush.bf16.msrb.mxu0 %v5060_v2  ;;  %v5924_v2 = vor.u32 %v7740_v57, %v5921_v58  ;;  %v6425_v57 = vld [vmem:[#allocation4 + $0xb00] sm:$0xf0]  ;;  %v6236_v63 = vor.u32 %v7818_v51, %v6233_v53  ;;  %v7986_v53 = vld [vmem:[#allocation4 + $0xeac] sm:$0xf] }
 0x152   :  { %4073 = vmatpush.bf16.msrb.mxu1 %v5252_v5  ;;  %v7734_v5 = vld [vmem:[#allocation4 + $0x6cc] sm:$0xf]  ;;  %v6713_v51 = vld [vmem:[#allocation4 + $0xd40] sm:$0xf0] }
 0x153   :  { %4086 = vmatpush.bf16.msrb.mxu2 %v5444_v6  ;;  %v5897_v6 = vld [vmem:[#allocation4 + $0x6e0] sm:$0xf0] }
 0x154   :  { %4099 = vmatpush.bf16.msrb.mxu3 %v5636_v10  ;;  %v6281_v10 = vld [vmem:[#allocation4 + $0x9e0] sm:$0xf0]  ;;  %v5900_v16 = vor.u32 %v7734_v5, %v5897_v6  ;;  %v7812_v5 = vld [vmem:[#allocation4 + $0x93c] sm:$0xf]  ;;  %v6209_v6 = vld [vmem:[#allocation4 + $0x950] sm:$0xf0] }
 0x155   :  { %4061 = vmatpush.bf16.msrb.mxu0 %v5036_v21  ;;  %v3855_v11 = vpop.f32.mrf.mxu0  ;;  %v6284_v21 = vor.u32 %v7830_v20, %v6281_v10  ;;  %v7710_v20 = vld [vmem:[#allocation4 + $0x60c] sm:$0xf]  ;;  %v5801_v10 = vld [vmem:[#allocation4 + $0x620] sm:$0xf0] }
 0x156   :  { %4074 = vmatpush.bf16.msrb.mxu1 %v5228_v29  ;;  %v3856_v14 = vadd.f32 %v3855_v11, %v8420_v52  ;;  %v3868_v17 = vpop.f32.mrf.mxu1  ;;  %v6476_v29 = vor.u32 %v7878_v12, %v6473_v13  ;;  %v6068_v52 = vor.u32 %v7776_v28, %v6065_v31  ;;  %v6212_v12 = vor.u32 %v7812_v5, %v6209_v6  ;;  %v7758_v13 = vld [vmem:[#allocation4 + $0x78c] sm:$0xf]  ;;  %v7944_v28 = vld [vmem:[#allocation4 + $0xd5c] sm:$0xf]  ;;  %v7073_v6 = vld [vmem:[#allocation4 + $0x1010] sm:$0xf0] }
 0x157   :  { %4087 = vmatpush.bf16.msrb.mxu2 %v5420_v30  ;;  %v8028_v5 = vld [vmem:[#allocation4 + $0xffc] sm:$0xf] }
 0x158   :  { %4100 = vmatpush.bf16.msrb.mxu3 %v5612_v36  ;;  %4062 = vmatmul.bf16.vlgmr.msrb.gmra.mxu0 %v8347_v9  ;;  %v3869_v30 = vadd.f32 %v3868_v17, %v3856_v14  ;;  %v6257_v36 = vld [vmem:[#allocation4 + $0x9b0] sm:$0xf0]  ;;  %v5993_v14 = vld [vmem:[#allocation4 + $0x7a0] sm:$0xf0] }
 0x159   :  { %4106 = vmatpush.bf16.msra.mxu0 %v5972_v39  ;;  %4075 = vmatmul.bf16.vlgmr.msrb.gmra.mxu1 %v8354_v25  ;;  %v7872_v39 = vld [vmem:[#allocation4 + $0xb1c] sm:$0xf]  ;;  %v6260_v42 = vor.u32 %v7824_v32, %v6257_v36  ;;  %v5804_v32 = vor.u32 %v7710_v20, %v5801_v10  ;;  %v6929_v36 = vld [vmem:[#allocation4 + $0xef0] sm:$0xf0]  ;;  %v7926_v20 = vld [vmem:[#allocation4 + $0xccc] sm:$0xf] }
 0x15a   :  { %4119 = vmatpush.bf16.msra.mxu1 %v6164_v41  ;;  %4088 = vmatmul.bf16.vlgmr.msrb.gmra.mxu2 %v8345_v8  ;;  %v6449_v41 = vld [vmem:[#allocation4 + $0xb30] sm:$0xf0] }
 0x15b   :  { %4132 = vmatpush.bf16.msra.mxu2 %v6356_v45  ;;  %4101 = vmatmul.bf16.vlgmr.msrb.gmra.mxu3 %v8349_v15  ;;  %v5876_v45 = vor.u32 %v7728_v24, %v5873_v26  ;;  %v6452_v48 = vor.u32 %v7872_v39, %v6449_v41  ;;  %v6377_v24 = vld [vmem:[#allocation4 + $0xaa0] sm:$0xf0]  ;;  %v8040_v39 = vld [vmem:[#allocation4 + $0x105c] sm:$0xf]  ;;  %v7121_v41 = vld [vmem:[#allocation4 + $0x1070] sm:$0xf0] }
 0x15c   :  { %4145 = vmatpush.bf16.msra.mxu3 %v6548_v47  ;;  %v7770_v47 = vld [vmem:[#allocation4 + $0x7ec] sm:$0xf] }
 0x15d   :  { %4107 = vmatpush.bf16.msra.mxu0 %v5948_v54  ;;  %v3881_v49 = vpop.f32.mrf.mxu2  ;;  %v3857_v58 = vpop.f32.mrf.mxu0  ;;  %v6044_v62 = vor.u32 %v7770_v47, %v6041_v50  ;;  %v7938_v50 = vld [vmem:[#allocation4 + $0xd2c] sm:$0xf] }
 0x15e   :  { %4120 = vmatpush.bf16.msra.mxu1 %v6140_v55  ;;  %v3882_v54 = vadd.f32 %v3881_v49, %v3869_v30  ;;  %v3894_v55 = vpop.f32.mrf.mxu3  ;;  %v7992_v30 = vld [vmem:[#allocation4 + $0xedc] sm:$0xf]  ;;  %v7124_v49 = vor.u32 %v8040_v39, %v7121_v41  ;;  %v8082_v58 = vld [vmem:[#allocation4 + $0x11ac] sm:$0xf]  ;;  %v6641_v39 = vld [vmem:[#allocation4 + $0xcb0] sm:$0xf0] }
 0x15f   :  { %4133 = vmatpush.bf16.msra.mxu2 %v6332_v56  ;;  %v7866_v56 = vld [vmem:[#allocation4 + $0xaec] sm:$0xf]  ;;  %v7968_v41 = vld [vmem:[#allocation4 + $0xe1c] sm:$0xf] }
 0x160   :  { %4146 = vmatpush.bf16.msra.mxu3 %v6524_v60  ;;  %v3870_v60 = vpop.f32.mrf.mxu1  ;;  %v8427_v61 = vadd.f32 %v3894_v55, %v3882_v54  ;;  %v6905_v55 = vld [vmem:[#allocation4 + $0xec0] sm:$0xf0] }
 0x161   :  { %4108 = vmatpush.bf16.msra.mxu0 %v5924_v2  ;;  %v7764_v2 = vld [vmem:[#allocation4 + $0x7bc] sm:$0xf]  ;;  %v6716_v60 = vor.u32 %v7938_v50, %v6713_v51 }
 0x162   :  { %4121 = vmatpush.bf16.msra.mxu1 %v6116_v3  ;;  %v6428_v3 = vor.u32 %v7866_v56, %v6425_v57  ;;  %v8034_v56 = vld [vmem:[#allocation4 + $0x102c] sm:$0xf]  ;;  %v7097_v57 = vld [vmem:[#allocation4 + $0x1040] sm:$0xf0] }
 0x163   :  { %4134 = vmatpush.bf16.msra.mxu2 %v6308_v4  ;;  %v6017_v4 = vld [vmem:[#allocation4 + $0x7d0] sm:$0xf0] }
 0x164   :  { %4147 = vmatpush.bf16.msra.mxu3 %v6500_v43  ;;  %v6401_v43 = vld [vmem:[#allocation4 + $0xad0] sm:$0xf0]  ;;  %v6020_v11 = vor.u32 %v7764_v2, %v6017_v4  ;;  %v7980_v2 = vld [vmem:[#allocation4 + $0xe7c] sm:$0xf] }
 0x165   :  { %4109 = vmatpush.bf16.msra.mxu0 %v5900_v16  ;;  %v7806_v16 = vld [vmem:[#allocation4 + $0x90c] sm:$0xf]  ;;  %v6404_v17 = vor.u32 %v7860_v7, %v6401_v43  ;;  %v3883_v26 = vpop.f32.mrf.mxu2  ;;  %v6881_v4 = vld [vmem:[#allocation4 + $0xe90] sm:$0xf0]  ;;  %v8076_v7 = vld [vmem:[#allocation4 + $0x117c] sm:$0xf] }
 0x166   :  { %4122 = vmatpush.bf16.msra.mxu1 %v6092_v19  ;;  %v6185_v19 = vld [vmem:[#allocation4 + $0x920] sm:$0xf0]  ;;  %v3896_v31 = vpop.f32.mrf.mxu3  ;;  %v7265_v43 = vld [vmem:[#allocation4 + $0x1190] sm:$0xf0]  ;;  %v6884_v10 = vor.u32 %v7980_v2, %v6881_v4  ;;  %v8070_v26 = vld [vmem:[#allocation4 + $0x114c] sm:$0xf] }
 0x167   :  { %4135 = vmatpush.bf16.msra.mxu2 %v6284_v21  ;;  %v7854_v21 = vld [vmem:[#allocation4 + $0xa8c] sm:$0xf] }
 0x168   :  { %4148 = vmatpush.bf16.msra.mxu3 %v6476_v29  ;;  %v6737_v29 = vld [vmem:[#allocation4 + $0xd70] sm:$0xf0]  ;;  %v6380_v46 = vor.u32 %v7854_v21, %v6377_v24  ;;  %v8022_v21 = vld [vmem:[#allocation4 + $0xfcc] sm:$0xf]  ;;  %v7049_v24 = vld [vmem:[#allocation4 + $0xfe0] sm:$0xf0] }
 0x169   :  { %4110 = vmatpush.bf16.msra.mxu0 %v5876_v45  ;;  %v5996_v45 = vor.u32 %v7758_v13, %v5993_v14  ;;  %v6740_v47 = vor.u32 %v7944_v28, %v6737_v29  ;;  %v7974_v13 = vld [vmem:[#allocation4 + $0xe4c] sm:$0xf]  ;;  %v8433_v14 = vld [vmem:[#allocation6] sm:$0x3f] }
 0x16a   :  { %4123 = vmatpush.bf16.msra.mxu1 %v6068_v52  ;;  %v6188_v52 = vor.u32 %v7806_v16, %v6185_v19  ;;  %v696_v16 = vperm.slane %v8433_v14, 2  ;;  %v6857_v19 = vld [vmem:[#allocation4 + $0xe60] sm:$0xf0]  ;;  %v8058_v2 = vld [vmem:[#allocation4 + $0x10ec] sm:$0xf] }
 0x16b   :  { %4136 = vmatpush.bf16.msra.mxu2 %v6260_v42  ;;  %v8088_v42 = vld [vmem:[#allocation4 + $0x11dc] sm:$0xf]  ;;  %v7241_v28 = vld [vmem:[#allocation4 + $0x1160] sm:$0xf0]  ;;  %v6860_v31 = vor.u32 %v7974_v13, %v6857_v19  ;;  %v6785_v13 = vld [vmem:[#allocation4 + $0xdd0] sm:$0xf0] }
 0x16c   :  { %4149 = vmatpush.bf16.msra.mxu3 %v6452_v48  ;;  %v6932_v48 = vor.u32 %v7992_v30, %v6929_v36  ;;  %v7316_v54 = vor.u32 %v8088_v42, %v7313_v44  ;;  %v7920_v36 = vld [vmem:[#allocation4 + $0xc9c] sm:$0xf]  ;;  %v7244_v42 = vor.u32 %v8070_v26, %v7241_v28  ;;  %v6833_v44 = vld [vmem:[#allocation4 + $0xe30] sm:$0xf0]  ;;  %v7902_v26 = vld [vmem:[#allocation4 + $0xc0c] sm:$0xf] }
 0x16d   :  { %4111 = vmatpush.bf16.msra.mxu0 %v5852_v59  ;;  %v7289_v59 = vld [vmem:[#allocation4 + $0x11c0] sm:$0xf0]  ;;  %v6644_v51 = vor.u32 %v7920_v36, %v6641_v39  ;;  %v8052_v19 = vld [vmem:[#allocation4 + $0x10bc] sm:$0xf]  ;;  %v7998_v36 = vld [vmem:[#allocation4 + $0xf0c] sm:$0xf] }
 0x16e   :  { %4124 = vmatpush.bf16.msra.mxu1 %v6044_v62  ;;  %v6908_v62 = vor.u32 %v7986_v53, %v6905_v55  ;;  %v6836_v53 = vor.u32 %v7968_v41, %v6833_v44  ;;  %v7914_v55 = vld [vmem:[#allocation4 + $0xc6c] sm:$0xf]  ;;  %v6569_v28 = vld [vmem:[#allocation4 + $0xc20] sm:$0xf0] }
 0x16f   :  { %4137 = vmatpush.bf16.msra.mxu2 %v6236_v63  ;;  %v7100_v63 = vor.u32 %v8034_v56, %v7097_v57  ;;  %v6617_v56 = vld [vmem:[#allocation4 + $0xc80] sm:$0xf0]  ;;  %v7962_v57 = vld [vmem:[#allocation4 + $0xdec] sm:$0xf] }
 0x170   :  { %4150 = vmatpush.bf16.msra.mxu3 %v6428_v3  ;;  %v7292_v3 = vor.u32 %v8082_v58, %v7289_v59  ;;  %v6620_v4 = vor.u32 %v7914_v55, %v6617_v56  ;;  %v5783_v56 = vld [vmem:[#allocation4 + $0x5e0] sm:$0xf] }
 0x171   :  { %4112 = vmatpush.bf16.msra.mxu0 %v5828_v35  ;;  %v6692_v35 = vor.u32 %v7932_v0, %v6689_v1 }
 0x172   :  { %4125 = vmatpush.bf16.msra.mxu1 %v6020_v11  ;;  %v7076_v11 = vor.u32 %v8028_v5, %v7073_v6 }
 0x173   :  { %4138 = vmatpush.bf16.msra.mxu2 %v6212_v12  ;;  %v6665_v12 = vld [vmem:[#allocation4 + $0xce0] sm:$0xf0] }
 0x174   :  { %4151 = vmatpush.bf16.msra.mxu3 %v6404_v17  ;;  %v7268_v17 = vor.u32 %v8076_v7, %v7265_v43  ;;  %v6668_v29 = vor.u32 %v7926_v20, %v6665_v12  ;;  %v6593_v20 = vld [vmem:[#allocation4 + $0xc50] sm:$0xf0] }
 0x175   :  { %4113 = vmatpush.bf16.msra.mxu0 %v5804_v32  ;;  %v3907_v30 = vpop.f32.mrf.mxu0  ;;  %v7052_v32 = vor.u32 %v8022_v21, %v7049_v24  ;;  %v7169_v21 = vld [vmem:[#allocation4 + $0x10d0] sm:$0xf0] }
 0x176   :  { %4126 = vmatpush.bf16.msra.mxu1 %v5996_v45  ;;  %v3908_v45 = vadd.f32 %v3907_v30, %v696_v16  ;;  %v8004_v16 = vld [vmem:[#allocation4 + $0xf3c] sm:$0xf]  ;;  %v7172_v41 = vor.u32 %v8052_v19, %v7169_v21  ;;  %v5543_v19 = vld [vmem:[#allocation4 + $0x400] sm:$0xf]  ;;  %v7648_v21 = vld [vmem:[#allocation4 + $0x414] sm:$0xf0] }
 0x177   :  { %4139 = vmatpush.bf16.msra.mxu2 %v6188_v52  ;;  %v3920_v52 = vpop.f32.mrf.mxu1 }
 0x178   :  { %4152 = vmatpush.bf16.msra.mxu3 %v6380_v46  ;;  %4114 = vmatmul.bf16.vlgmr.msra.gmra.mxu0 %v8359_v37  ;;  %v8016_v46 = vld [vmem:[#allocation4 + $0xf9c] sm:$0xf]  ;;  %v3921_v50 = vadd.f32 %v3920_v52, %v3908_v45  ;;  %v6953_v45 = vld [vmem:[#allocation4 + $0xf20] sm:$0xf0]  ;;  %v8046_v52 = vld [vmem:[#allocation4 + $0x108c] sm:$0xf] }
 0x179   :  { %4158 = vmatpush.bf16.msrb.mxu0 %v6740_v47  ;;  %4127 = vmatmul.bf16.vlgmr.msra.gmra.mxu1 %v8363_v40  ;;  %v7025_v47 = vld [vmem:[#allocation4 + $0xfb0] sm:$0xf0]  ;;  %v6956_v55 = vor.u32 %v7998_v36, %v6953_v45  ;;  %v5327_v36 = vld [vmem:[#allocation4 + $0x250] sm:$0xf] }
 0x17a   :  { %4171 = vmatpush.bf16.msrb.mxu1 %v6932_v48  ;;  %4140 = vmatmul.bf16.vlgmr.msra.gmra.mxu2 %v8357_v34  ;;  %v8064_v48 = vld [vmem:[#allocation4 + $0x111c] sm:$0xf]  ;;  %v5519_v45 = vld [vmem:[#allocation4 + $0x3d0] sm:$0xf] }
 0x17b   :  { %4184 = vmatpush.bf16.msrb.mxu2 %v7124_v49  ;;  %4153 = vmatmul.bf16.vlgmr.msra.gmra.mxu3 %v8361_v38  ;;  %v7217_v49 = vld [vmem:[#allocation4 + $0x1130] sm:$0xf0] }
 0x17c   :  { %4197 = vmatpush.bf16.msrb.mxu3 %v7316_v54  ;;  %v7028_v54 = vor.u32 %v8016_v46, %v7025_v47  ;;  %v7220_v59 = vor.u32 %v8064_v48, %v7217_v49  ;;  %v5207_v46 = vld [vmem:[#allocation4 + $0x160] sm:$0xf]  ;;  %v7564_v47 = vld [vmem:[#allocation4 + $0x174] sm:$0xf0]  ;;  %v6572_v49 = vor.u32 %v7902_v26, %v6569_v28 }
 0x17d   :  { %4159 = vmatpush.bf16.msrb.mxu0 %v6716_v60  ;;  %v3933_v58 = vpop.f32.mrf.mxu2  ;;  %v6809_v60 = vld [vmem:[#allocation4 + $0xe00] sm:$0xf0]  ;;  %v3909_v6 = vpop.f32.mrf.mxu0  ;;  %v5399_v48 = vld [vmem:[#allocation4 + $0x2e0] sm:$0xf]  ;;  %v7696_v26 = vld [vmem:[#allocation4 + $0x594] sm:$0xf0] }
 0x17e   :  { %4172 = vmatpush.bf16.msrb.mxu1 %v6908_v62  ;;  %v8010_v62 = vld [vmem:[#allocation4 + $0xf6c] sm:$0xf]  ;;  %v3934_v0 = vadd.f32 %v3933_v58, %v3921_v50  ;;  %v3946_v1 = vpop.f32.mrf.mxu3  ;;  %v6812_v7 = vor.u32 %v7962_v57, %v6809_v60  ;;  %v7612_v50 = vld [vmem:[#allocation4 + $0x2f4] sm:$0xf0]  ;;  %v7654_v6 = vld [vmem:[#allocation4 + $0x444] sm:$0xf0] }
 0x17f   :  { %4185 = vmatpush.bf16.msrb.mxu2 %v7100_v63  ;;  %v7001_v63 = vld [vmem:[#allocation4 + $0xf80] sm:$0xf0]  ;;  %v7708_v57 = vld [vmem:[#allocation4 + $0x5f4] sm:$0xf0]  ;;  %v5400_v60 = vor.u32 %v7612_v50, %v5399_v48  ;;  %v5111_v50 = vld [vmem:[#allocation4 + $0xa0] sm:$0xf] }
 0x180   :  { %4198 = vmatpush.bf16.msrb.mxu3 %v7292_v3  ;;  %v7193_v3 = vld [vmem:[#allocation4 + $0x1100] sm:$0xf0]  ;;  %v8436_v5 = vadd.f32 %v3946_v1, %v3934_v0  ;;  %v7004_v43 = vor.u32 %v8010_v62, %v7001_v63  ;;  %v5183_v63 = vld [vmem:[#allocation4 + $0x130] sm:$0xf]  ;;  %v7558_v0 = vld [vmem:[#allocation4 + $0x144] sm:$0xf0] }
 0x181   :  { %4160 = vmatpush.bf16.msrb.mxu0 %v6692_v35  ;;  %v7908_v35 = vld [vmem:[#allocation4 + $0xc3c] sm:$0xf]  ;;  %v7196_v12 = vor.u32 %v8058_v2, %v7193_v3  ;;  %v5375_v1 = vld [vmem:[#allocation4 + $0x2b0] sm:$0xf]  ;;  %v5784_v2 = vor.u32 %v7708_v57, %v5783_v56  ;;  %v7606_v3 = vld [vmem:[#allocation4 + $0x2c4] sm:$0xf0] }
 0x182   :  { %4173 = vmatpush.bf16.msrb.mxu1 %v6884_v10  ;;  %v7956_v10 = vld [vmem:[#allocation4 + $0xdbc] sm:$0xf]  ;;  %v6596_v24 = vor.u32 %v7908_v35, %v6593_v20  ;;  %v5184_v35 = vor.u32 %v7558_v0, %v5183_v63  ;;  %v5376_v20 = vor.u32 %v7606_v3, %v5375_v1  ;;  %v7588_v57 = vld [vmem:[#allocation4 + $0x234] sm:$0xf0]  ;;  %v5087_v3 = vld [vmem:[#allocation4 + $0x70] sm:$0xf] }
 0x183   :  { %4186 = vmatpush.bf16.msrb.mxu2 %v7076_v11  ;;  %v3922_v11 = vpop.f32.mrf.mxu1 }
 0x184   :  { %4199 = vmatpush.bf16.msrb.mxu3 %v7268_v17  ;;  %v6977_v17 = vld [vmem:[#allocation4 + $0xf50] sm:$0xf0]  ;;  %v5159_v11 = vld [vmem:[#allocation4 + $0x100] sm:$0xf] }
 0x185   :  { %4161 = vmatpush.bf16.msrb.mxu0 %v6668_v29  ;;  %v6788_v29 = vor.u32 %v7956_v10, %v6785_v13  ;;  %v6980_v30 = vor.u32 %v8004_v16, %v6977_v17  ;;  %v3935_v39 = vpop.f32.mrf.mxu2  ;;  %v5351_v13 = vld [vmem:[#allocation4 + $0x280] sm:$0xf]  ;;  %v7600_v17 = vld [vmem:[#allocation4 + $0x294] sm:$0xf0] }
 0x186   :  { %4174 = vmatpush.bf16.msrb.mxu1 %v6860_v31  ;;  %v7950_v31 = vld [vmem:[#allocation4 + $0xd8c] sm:$0xf]  ;;  %v3948_v44 = vpop.f32.mrf.mxu3 }
 0x187   :  { %4187 = vmatpush.bf16.msrb.mxu2 %v7052_v32  ;;  %v6761_v32 = vld [vmem:[#allocation4 + $0xda0] sm:$0xf0]  ;;  %v7690_v44 = vld [vmem:[#allocation4 + $0x564] sm:$0xf0] }
 0x188   :  { %4200 = vmatpush.bf16.msrb.mxu3 %v7244_v42  ;;  %v7145_v42 = vld [vmem:[#allocation4 + $0x10a0] sm:$0xf0] }
 0x189   :  { %4162 = vmatpush.bf16.msrb.mxu0 %v6644_v51  ;;  %v5591_v51 = vld [vmem:[#allocation4 + $0x460] sm:$0xf]  ;;  %v7148_v58 = vor.u32 %v8046_v52, %v7145_v42  ;;  %v7642_v52 = vld [vmem:[#allocation4 + $0x3e4] sm:$0xf0]  ;;  %v5711_v42 = vld [vmem:[#allocation4 + $0x550] sm:$0xf] }
 0x18a   :  { %4175 = vmatpush.bf16.msrb.mxu1 %v6836_v53  ;;  %v7660_v53 = vld [vmem:[#allocation4 + $0x474] sm:$0xf0]  ;;  %v5712_v56 = vor.u32 %v7690_v44, %v5711_v42  ;;  %v5039_v42 = vld [vmem:[#allocation4 + $0x10] sm:$0xf]  ;;  %v7522_v44 = vld [vmem:[#allocation4 + $0x24] sm:$0xf0] }
 0x18b   :  { %4188 = vmatpush.bf16.msrb.mxu2 %v7028_v54  ;;  %v6764_v54 = vor.u32 %v7950_v31, %v6761_v32  ;;  %v5592_v62 = vor.u32 %v7660_v53, %v5591_v51  ;;  %v5135_v31 = vld [vmem:[#allocation4 + $0xd0] sm:$0xf]  ;;  %v7546_v32 = vld [vmem:[#allocation4 + $0xe4] sm:$0xf0]  ;;  %v7540_v51 = vld [vmem:[#allocation4 + $0xb4] sm:$0xf0] }
 0x18c   :  { %4201 = vmatpush.bf16.msrb.mxu3 %v7220_v59  ;;  %v5208_v59 = vor.u32 %v7564_v47, %v5207_v46  ;;  %v5136_v46 = vor.u32 %v7546_v32, %v5135_v31  ;;  %v5303_v53 = vld [vmem:[#allocation4 + $0x220] sm:$0xf]  ;;  %v5112_v0 = vor.u32 %v7540_v51, %v5111_v50  ;;  %v7576_v32 = vld [vmem:[#allocation4 + $0x1d4] sm:$0xf0]  ;;  %v5423_v50 = vld [vmem:[#allocation4 + $0x310] sm:$0xf] }
 0x18d   :  { %4163 = vmatpush.bf16.msrb.mxu0 %v6620_v4  ;;  %v5567_v4 = vld [vmem:[#allocation4 + $0x430] sm:$0xf]  ;;  %v5304_v1 = vor.u32 %v7588_v57, %v5303_v53 }
 0x18e   :  { %4176 = vmatpush.bf16.msrb.mxu1 %v6812_v7  ;;  %v5759_v7 = vld [vmem:[#allocation4 + $0x5b0] sm:$0xf]  ;;  %v5568_v10 = vor.u32 %v7654_v6, %v5567_v4  ;;  %v7534_v4 = vld [vmem:[#allocation4 + $0x84] sm:$0xf0] }
 0x18f   :  { %4189 = vmatpush.bf16.msrb.mxu2 %v7004_v43  ;;  %v7702_v43 = vld [vmem:[#allocation4 + $0x5c4] sm:$0xf0]  ;;  %v5279_v6 = vld [vmem:[#allocation4 + $0x1f0] sm:$0xf] }
 0x190   :  { %4202 = vmatpush.bf16.msrb.mxu3 %v7196_v12  ;;  %v7552_v12 = vld [vmem:[#allocation4 + $0x114] sm:$0xf0]  ;;  %v5760_v16 = vor.u32 %v7702_v43, %v5759_v7  ;;  %v7582_v43 = vld [vmem:[#allocation4 + $0x204] sm:$0xf0] }
 0x191   :  { %4164 = vmatpush.bf16.msrb.mxu0 %v6596_v24  ;;  %v5735_v24 = vld [vmem:[#allocation4 + $0x580] sm:$0xf]  ;;  %v5160_v28 = vor.u32 %v7552_v12, %v5159_v11  ;;  %v5663_v12 = vld [vmem:[#allocation4 + $0x4f0] sm:$0xf] }
 0x192   :  { %4177 = vmatpush.bf16.msrb.mxu1 %v6788_v29  ;;  %v5352_v29 = vor.u32 %v7600_v17, %v5351_v13  ;;  %v5736_v39 = vor.u32 %v7696_v26, %v5735_v24  ;;  %v7678_v13 = vld [vmem:[#allocation4 + $0x504] sm:$0xf0]  ;;  %v5063_v26 = vld [vmem:[#allocation4 + $0x40] sm:$0xf] }
 0x193   :  { %4190 = vmatpush.bf16.msrb.mxu2 %v6980_v30  ;;  %v5544_v30 = vor.u32 %v7648_v21, %v5543_v19  ;;  %v5280_v21 = vor.u32 %v7582_v43, %v5279_v6  ;;  %v5664_v31 = vor.u32 %v7678_v13, %v5663_v12  ;;  %v7900_v6 = vld [vmem:[#allocation4 + $0xbf4] sm:$0xf0]  ;;  %v7798_v13 = vld [vmem:[#allocation4 + $0x8c4] sm:$0xf0] }
 0x194   :  { %4203 = vmatpush.bf16.msrb.mxu3 %v7172_v41  ;;  %v7594_v41 = vld [vmem:[#allocation4 + $0x264] sm:$0xf0] }
 0x195   :  { %4165 = vmatpush.bf16.msrb.mxu0 %v6572_v49  ;;  %v3959_v47 = vpop.f32.mrf.mxu0  ;;  %v5328_v48 = vor.u32 %v7594_v41, %v5327_v36  ;;  %v5520_v49 = vor.u32 %v7642_v52, %v5519_v45  ;;  %v5447_v36 = vld [vmem:[#allocation4 + $0x340] sm:$0xf]  ;;  %v7672_v45 = vld [vmem:[#allocation4 + $0x4d4] sm:$0xf0] }
 0x196   :  { %4178 = vmatpush.bf16.msrb.mxu1 %v6764_v54  ;;  %v3960_v54 = vadd.f32 %v3959_v47, %v8436_v5  ;;  %v5639_v41 = vld [vmem:[#allocation4 + $0x4c0] sm:$0xf] }
 0x197   :  { %4191 = vmatpush.bf16.msrb.mxu2 %v6956_v55  ;;  %v3972_v55 = vpop.f32.mrf.mxu1  ;;  %v5640_v53 = vor.u32 %v7672_v45, %v5639_v41  ;;  %v6311_v41 = vld [vmem:[#allocation4 + $0xa00] sm:$0xf]  ;;  %v7840_v45 = vld [vmem:[#allocation4 + $0xa14] sm:$0xf0] }
 0x198   :  { %4204 = vmatpush.bf16.msrb.mxu3 %v7148_v58  ;;  %4166 = vmatmul.bf16.vlgmr.msrb.gmra.mxu0 %v8369_v18  ;;  %v5495_v58 = vld [vmem:[#allocation4 + $0x3a0] sm:$0xf]  ;;  %v3973_v63 = vadd.f32 %v3972_v55, %v3960_v54  ;;  %v7618_v54 = vld [vmem:[#allocation4 + $0x324] sm:$0xf0]  ;;  %v5615_v55 = vld [vmem:[#allocation4 + $0x490] sm:$0xf] }
 0x199   :  { %4210 = vmatpush.bf16.msra.mxu0 %v5208_v59  ;;  %4179 = vmatmul.bf16.vlgmr.msrb.gmra.mxu1 %v8373_v23  ;;  %v7636_v59 = vld [vmem:[#allocation4 + $0x3b4] sm:$0xf0] }
 0x19a   :  { %4223 = vmatpush.bf16.msra.mxu1 %v5400_v60  ;;  %4192 = vmatmul.bf16.vlgmr.msrb.gmra.mxu2 %v8371_v22  ;;  %v5687_v60 = vld [vmem:[#allocation4 + $0x520] sm:$0xf] }
 0x19b   :  { %4236 = vmatpush.bf16.msra.mxu2 %v5592_v62  ;;  %4205 = vmatmul.bf16.vlgmr.msrb.gmra.mxu3 %v8375_v27  ;;  %v7684_v62 = vld [vmem:[#allocation4 + $0x534] sm:$0xf0] }
 0x19c   :  { %4249 = vmatpush.bf16.msra.mxu3 %v5784_v2  ;;  %v5496_v2 = vor.u32 %v7636_v59, %v5495_v58  ;;  %v5688_v5 = vor.u32 %v7684_v62, %v5687_v60  ;;  %v5975_v58 = vld [vmem:[#allocation4 + $0x760] sm:$0xf]  ;;  %v7756_v59 = vld [vmem:[#allocation4 + $0x774] sm:$0xf0]  ;;  %v5040_v62 = vor.u32 %v7522_v44, %v5039_v42 }
 0x19d   :  { %4211 = vmatpush.bf16.msra.mxu0 %v5184_v35  ;;  %v3985_v7 = vpop.f32.mrf.mxu2  ;;  %v5471_v35 = vld [vmem:[#allocation4 + $0x370] sm:$0xf]  ;;  %v3961_v19 = vpop.f32.mrf.mxu0  ;;  %v6167_v60 = vld [vmem:[#allocation4 + $0x8e0] sm:$0xf]  ;;  %v7888_v42 = vld [vmem:[#allocation4 + $0xb94] sm:$0xf0] }
 0x19e   :  { %4224 = vmatpush.bf16.msra.mxu1 %v5376_v20  ;;  %v7630_v20 = vld [vmem:[#allocation4 + $0x384] sm:$0xf0]  ;;  %v3998_v11 = vpop.f32.mrf.mxu3 }
 0x19f   :  { %4237 = vmatpush.bf16.msra.mxu2 %v5568_v10  ;;  %v3986_v10 = vadd.f32 %v3985_v7, %v3973_v63  ;;  %v5472_v24 = vor.u32 %v7630_v20, %v5471_v35  ;;  %v7804_v63 = vld [vmem:[#allocation4 + $0x8f4] sm:$0xf0]  ;;  %v5951_v20 = vld [vmem:[#allocation4 + $0x730] sm:$0xf]  ;;  %v7846_v19 = vld [vmem:[#allocation4 + $0xa44] sm:$0xf0] }
 0x1a0   :  { %4250 = vmatpush.bf16.msra.mxu3 %v5760_v16  ;;  %v5088_v16 = vor.u32 %v7534_v4, %v5087_v3  ;;  %v5424_v3 = vor.u32 %v7618_v54, %v5423_v50  ;;  %v6551_v4 = vld [vmem:[#allocation4 + $0xbe0] sm:$0xf]  ;;  %v6168_v43 = vor.u32 %v7804_v63, %v6167_v60  ;;  %v6095_v50 = vld [vmem:[#allocation4 + $0x850] sm:$0xf] }
 0x1a1   :  { %4212 = vmatpush.bf16.msra.mxu0 %v5160_v28  ;;  %v8443_v17 = vadd.f32 %v3998_v11, %v3986_v10  ;;  %v7528_v28 = vld [vmem:[#allocation4 + $0x54] sm:$0xf0]  ;;  %v7750_v10 = vld [vmem:[#allocation4 + $0x744] sm:$0xf0]  ;;  %v6143_v11 = vld [vmem:[#allocation4 + $0x8b0] sm:$0xf]  ;;  %v6552_v12 = vor.u32 %v7900_v6, %v6551_v4 }
 0x1a2   :  { %4225 = vmatpush.bf16.msra.mxu1 %v5352_v29  ;;  %v5255_v29 = vld [vmem:[#allocation4 + $0x1c0] sm:$0xf]  ;;  %v5064_v52 = vor.u32 %v7528_v28, %v5063_v26  ;;  %v5952_v26 = vor.u32 %v7750_v10, %v5951_v20  ;;  %v6144_v28 = vor.u32 %v7798_v13, %v6143_v11  ;;  %v6287_v54 = vld [vmem:[#allocation4 + $0x9d0] sm:$0xf]  ;;  %v7876_v20 = vld [vmem:[#allocation4 + $0xb34] sm:$0xf0] }
 0x1a3   :  { %4238 = vmatpush.bf16.msra.mxu2 %v5544_v30  ;;  %v3974_v30 = vpop.f32.mrf.mxu1  ;;  %v7726_v13 = vld [vmem:[#allocation4 + $0x684] sm:$0xf0] }
 0x1a4   :  { %4251 = vmatpush.bf16.msra.mxu3 %v5736_v39  ;;  %v7624_v39 = vld [vmem:[#allocation4 + $0x354] sm:$0xf0]  ;;  %v5927_v30 = vld [vmem:[#allocation4 + $0x700] sm:$0xf] }
 0x1a5   :  { %4213 = vmatpush.bf16.msra.mxu0 %v5136_v46  ;;  %v5256_v46 = vor.u32 %v7576_v32, %v5255_v29  ;;  %v5448_v47 = vor.u32 %v7624_v39, %v5447_v36  ;;  %v3987_v51 = vpop.f32.mrf.mxu2  ;;  %v6119_v32 = vld [vmem:[#allocation4 + $0x880] sm:$0xf]  ;;  %v7792_v39 = vld [vmem:[#allocation4 + $0x894] sm:$0xf0] }
 0x1a6   :  { %4226 = vmatpush.bf16.msra.mxu1 %v5328_v48  ;;  %v5231_v48 = vld [vmem:[#allocation4 + $0x190] sm:$0xf]  ;;  %v4000_v57 = vpop.f32.mrf.mxu3 }
 0x1a7   :  { %4239 = vmatpush.bf16.msra.mxu2 %v5520_v49  ;;  %v7570_v49 = vld [vmem:[#allocation4 + $0x1a4] sm:$0xf0]  ;;  %v6479_v57 = vld [vmem:[#allocation4 + $0xb50] sm:$0xf] }
 0x1a8   :  { %4252 = vmatpush.bf16.msra.mxu3 %v5712_v56  ;;  %v7666_v56 = vld [vmem:[#allocation4 + $0x4a4] sm:$0xf0] }
 0x1a9   :  { %4214 = vmatpush.bf16.msra.mxu0 %v5112_v0  ;;  %v6359_v0 = vld [vmem:[#allocation4 + $0xa60] sm:$0xf]  ;;  %v5616_v7 = vor.u32 %v7666_v56, %v5615_v55  ;;  %v7834_v55 = vld [vmem:[#allocation4 + $0x9e4] sm:$0xf0] }
 0x1aa   :  { %4227 = vmatpush.bf16.msra.mxu1 %v5304_v1  ;;  %v7852_v1 = vld [vmem:[#allocation4 + $0xa74] sm:$0xf0] }
 0x1ab   :  { %4240 = vmatpush.bf16.msra.mxu2 %v5496_v2  ;;  %v5232_v2 = vor.u32 %v7570_v49, %v5231_v48  ;;  %v6360_v35 = vor.u32 %v7852_v1, %v6359_v0  ;;  %v5903_v48 = vld [vmem:[#allocation4 + $0x6d0] sm:$0xf]  ;;  %v7738_v49 = vld [vmem:[#allocation4 + $0x6e4] sm:$0xf0]  ;;  %v6288_v0 = vor.u32 %v7834_v55, %v6287_v54  ;;  %v5879_v1 = vld [vmem:[#allocation4 + $0x6a0] sm:$0xf] }
 0x1ac   :  { %4253 = vmatpush.bf16.msra.mxu3 %v5688_v5  ;;  %v5976_v5 = vor.u32 %v7756_v59, %v5975_v58  ;;  %v7882_v58 = vld [vmem:[#allocation4 + $0xb64] sm:$0xf0]  ;;  %v5904_v60 = vor.u32 %v7738_v49, %v5903_v48  ;;  %v7768_v49 = vld [vmem:[#allocation4 + $0x7d4] sm:$0xf0] }
 0x1ad   :  { %4215 = vmatpush.bf16.msra.mxu0 %v5088_v16  ;;  %v6335_v16 = vld [vmem:[#allocation4 + $0xa30] sm:$0xf]  ;;  %v6480_v4 = vor.u32 %v7882_v58, %v6479_v57  ;;  %v7864_v54 = vld [vmem:[#allocation4 + $0xad4] sm:$0xf0]  ;;  %v7714_v57 = vld [vmem:[#allocation4 + $0x624] sm:$0xf0] }
 0x1ae   :  { %4228 = vmatpush.bf16.msra.mxu1 %v5280_v21  ;;  %v6527_v21 = vld [vmem:[#allocation4 + $0xbb0] sm:$0xf]  ;;  %v6336_v29 = vor.u32 %v7846_v19, %v6335_v16 }
 0x1af   :  { %4241 = vmatpush.bf16.msra.mxu2 %v5472_v24  ;;  %v7894_v24 = vld [vmem:[#allocation4 + $0xbc4] sm:$0xf0]  ;;  %v6047_v16 = vld [vmem:[#allocation4 + $0x7f0] sm:$0xf] }
 0x1b0   :  { %4254 = vmatpush.bf16.msra.mxu3 %v5664_v31  ;;  %v7744_v31 = vld [vmem:[#allocation4 + $0x714] sm:$0xf0]  ;;  %v6528_v36 = vor.u32 %v7894_v24, %v6527_v21  ;;  %v7774_v24 = vld [vmem:[#allocation4 + $0x804] sm:$0xf0] }
 0x1b1   :  { %4216 = vmatpush.bf16.msra.mxu0 %v5064_v52  ;;  %v6503_v52 = vld [vmem:[#allocation4 + $0xb80] sm:$0xf]  ;;  %v5928_v44 = vor.u32 %v7744_v31, %v5927_v30  ;;  %v6431_v31 = vld [vmem:[#allocation4 + $0xaf0] sm:$0xf] }
 0x1b2   :  { %4229 = vmatpush.bf16.msra.mxu1 %v5256_v46  ;;  %v6120_v46 = vor.u32 %v7792_v39, %v6119_v32  ;;  %v6504_v51 = vor.u32 %v7888_v42, %v6503_v52  ;;  %v7870_v32 = vld [vmem:[#allocation4 + $0xb04] sm:$0xf0]  ;;  %v6048_v52 = vor.u32 %v7774_v24, %v6047_v16  ;;  %v8092_v16 = vld [vmem:[#allocation4 + $0x11f4] sm:$0xf0] }
 0x1b3   :  { %4242 = vmatpush.bf16.msra.mxu2 %v5448_v47  ;;  %v6312_v47 = vor.u32 %v7840_v45, %v6311_v41  ;;  %v6432_v48 = vor.u32 %v7870_v32, %v6431_v31  ;;  %v7990_v32 = vld [vmem:[#allocation4 + $0xec4] sm:$0xf0] }
 0x1b4   :  { %4255 = vmatpush.bf16.msra.mxu3 %v5640_v53  ;;  %v7786_v53 = vld [vmem:[#allocation4 + $0x864] sm:$0xf0] }
 0x1b5   :  { %4217 = vmatpush.bf16.msra.mxu0 %v5040_v62  ;;  %v4011_v56 = vpop.f32.mrf.mxu0  ;;  %v6096_v63 = vor.u32 %v7786_v53, %v6095_v50  ;;  %v6215_v50 = vld [vmem:[#allocation4 + $0x940] sm:$0xf] }
 0x1b6   :  { %4230 = vmatpush.bf16.msra.mxu1 %v5232_v2  ;;  %v4012_v59 = vadd.f32 %v4011_v56, %v8443_v17  ;;  %v4024_v62 = vpop.f32.mrf.mxu1  ;;  %v7732_v2 = vld [vmem:[#allocation4 + $0x6b4] sm:$0xf0]  ;;  %v6407_v53 = vld [vmem:[#allocation4 + $0xac0] sm:$0xf]  ;;  %v5807_v56 = vld [vmem:[#allocation4 + $0x610] sm:$0xf] }
 0x1b7   :  { %4243 = vmatpush.bf16.msra.mxu2 %v5424_v3  ;;  %v6071_v3 = vld [vmem:[#allocation4 + $0x820] sm:$0xf]  ;;  %v5880_v10 = vor.u32 %v7732_v2, %v5879_v1  ;;  %v7810_v1 = vld [vmem:[#allocation4 + $0x924] sm:$0xf0]  ;;  %v6383_v2 = vld [vmem:[#allocation4 + $0xa90] sm:$0xf] }
 0x1b8   :  { %4256 = vmatpush.bf16.msra.mxu3 %v5616_v7  ;;  %4218 = vmatmul.bf16.vlgmr.msra.gmra.mxu0 %v8347_v9  ;;  %v4025_v6 = vadd.f32 %v4024_v62, %v4012_v59  ;;  %v7780_v7 = vld [vmem:[#allocation4 + $0x834] sm:$0xf0]  ;;  %v7762_v62 = vld [vmem:[#allocation4 + $0x7a4] sm:$0xf0] }
 0x1b9   :  { %4262 = vmatpush.bf16.msrb.mxu0 %v5976_v5  ;;  %4231 = vmatmul.bf16.vlgmr.msra.gmra.mxu1 %v8354_v25  ;;  %v6263_v5 = vld [vmem:[#allocation4 + $0x9a0] sm:$0xf]  ;;  %v6072_v17 = vor.u32 %v7780_v7, %v6071_v3  ;;  %v7858_v3 = vld [vmem:[#allocation4 + $0xaa4] sm:$0xf0]  ;;  %v7948_v7 = vld [vmem:[#allocation4 + $0xd74] sm:$0xf0] }
 0x1ba   :  { %4275 = vmatpush.bf16.msrb.mxu1 %v6168_v43  ;;  %4244 = vmatmul.bf16.vlgmr.msra.gmra.mxu2 %v8345_v8  ;;  %v7828_v43 = vld [vmem:[#allocation4 + $0x9b4] sm:$0xf0] }
 0x1bb   :  { %4288 = vmatpush.bf16.msrb.mxu2 %v6360_v35  ;;  %4257 = vmatmul.bf16.vlgmr.msra.gmra.mxu3 %v8349_v15  ;;  %v6455_v35 = vld [vmem:[#allocation4 + $0xb20] sm:$0xf]  ;;  %v6264_v11 = vor.u32 %v7828_v43, %v6263_v5 }
 0x1bc   :  { %4301 = vmatpush.bf16.msrb.mxu3 %v6552_v12  ;;  %v5855_v12 = vld [vmem:[#allocation4 + $0x670] sm:$0xf]  ;;  %v6456_v19 = vor.u32 %v7876_v20, %v6455_v35  ;;  %v6935_v5 = vld [vmem:[#allocation4 + $0xee0] sm:$0xf]  ;;  %v5808_v35 = vor.u32 %v7714_v57, %v5807_v56  ;;  %v7996_v20 = vld [vmem:[#allocation4 + $0xef4] sm:$0xf0] }
 0x1bd   :  { %4263 = vmatpush.bf16.msrb.mxu0 %v5952_v26  ;;  %v4037_v21 = vpop.f32.mrf.mxu2  ;;  %v6239_v26 = vld [vmem:[#allocation4 + $0x970] sm:$0xf]  ;;  %v5856_v39 = vor.u32 %v7726_v13, %v5855_v12  ;;  %v7319_v13 = vld [vmem:[#allocation4 + $0x11e0] sm:$0xf]  ;;  %v6936_v24 = vor.u32 %v7996_v20, %v6935_v5  ;;  %v8080_v56 = vld [vmem:[#allocation4 + $0x1194] sm:$0xf0] }
 0x1be   :  { %4276 = vmatpush.bf16.msrb.mxu1 %v6144_v28  ;;  %v7822_v28 = vld [vmem:[#allocation4 + $0x984] sm:$0xf0]  ;;  %v4050_v30 = vpop.f32.mrf.mxu3  ;;  %v4026_v41 = vpop.f32.mrf.mxu1  ;;  %v7320_v31 = vor.u32 %v8092_v16, %v7319_v13  ;;  %v7972_v16 = vld [vmem:[#allocation4 + $0xe34] sm:$0xf0] }
 0x1bf   :  { %4289 = vmatpush.bf16.msrb.mxu2 %v6336_v29  ;;  %v4038_v29 = vadd.f32 %v4037_v21, %v4025_v6  ;;  %v6240_v42 = vor.u32 %v7822_v28, %v6239_v26  ;;  %v6743_v6 = vld [vmem:[#allocation4 + $0xd60] sm:$0xf]  ;;  %v6719_v28 = vld [vmem:[#allocation4 + $0xd30] sm:$0xf] }
 0x1c0   :  { %4302 = vmatpush.bf16.msrb.mxu3 %v6528_v36  ;;  %v4013_v36 = vpop.f32.mrf.mxu0  ;;  %v6744_v21 = vor.u32 %v7948_v7, %v6743_v6  ;;  %v7295_v41 = vld [vmem:[#allocation4 + $0x11b0] sm:$0xf]  ;;  %v8074_v7 = vld [vmem:[#allocation4 + $0x1164] sm:$0xf0] }
 0x1c1   :  { %4264 = vmatpush.bf16.msrb.mxu0 %v5928_v44  ;;  %v8450_v45 = vadd.f32 %v4050_v30, %v4038_v29  ;;  %v5831_v44 = vld [vmem:[#allocation4 + $0x640] sm:$0xf]  ;;  %v7942_v29 = vld [vmem:[#allocation4 + $0xd44] sm:$0xf0]  ;;  %v6911_v30 = vld [vmem:[#allocation4 + $0xeb0] sm:$0xf] }
 0x1c2   :  { %4277 = vmatpush.bf16.msrb.mxu1 %v6120_v46  ;;  %v7720_v46 = vld [vmem:[#allocation4 + $0x654] sm:$0xf0]  ;;  %v7103_v36 = vld [vmem:[#allocation4 + $0x1030] sm:$0xf] }
 0x1c3   :  { %4290 = vmatpush.bf16.msrb.mxu2 %v6312_v47  ;;  %v6023_v47 = vld [vmem:[#allocation4 + $0x7c0] sm:$0xf]  ;;  %v5832_v55 = vor.u32 %v7720_v46, %v5831_v44  ;;  %v6912_v44 = vor.u32 %v7990_v32, %v6911_v30  ;;  %v7247_v6 = vld [vmem:[#allocation4 + $0x1150] sm:$0xf] }
 0x1c4   :  { %4303 = vmatpush.bf16.msrb.mxu3 %v6504_v51  ;;  %v7816_v51 = vld [vmem:[#allocation4 + $0x954] sm:$0xf0]  ;;  %v6024_v58 = vor.u32 %v7768_v49, %v6023_v47  ;;  %v6695_v47 = vld [vmem:[#allocation4 + $0xd00] sm:$0xf]  ;;  %v6623_v32 = vld [vmem:[#allocation4 + $0xc70] sm:$0xf] }
 0x1c5   :  { %4265 = vmatpush.bf16.msrb.mxu0 %v5904_v60  ;;  %v6216_v59 = vor.u32 %v7816_v51, %v6215_v50  ;;  %v5999_v60 = vld [vmem:[#allocation4 + $0x790] sm:$0xf]  ;;  %v6887_v49 = vld [vmem:[#allocation4 + $0xe80] sm:$0xf]  ;;  %v7984_v51 = vld [vmem:[#allocation4 + $0xe94] sm:$0xf0] }
 0x1c6   :  { %4278 = vmatpush.bf16.msrb.mxu1 %v6096_v63  ;;  %v6191_v63 = vld [vmem:[#allocation4 + $0x910] sm:$0xf]  ;;  %v4052_v43 = vpop.f32.mrf.mxu3 }
 0x1c7   :  { %4291 = vmatpush.bf16.msrb.mxu2 %v6288_v0  ;;  %v6408_v0 = vor.u32 %v7864_v54, %v6407_v53  ;;  %v6192_v12 = vor.u32 %v7810_v1, %v6191_v63  ;;  %v7079_v53 = vld [vmem:[#allocation4 + $0x1000] sm:$0xf]  ;;  %v8032_v54 = vld [vmem:[#allocation4 + $0x1014] sm:$0xf0]  ;;  %v6863_v63 = vld [vmem:[#allocation4 + $0xe50] sm:$0xf] }
 0x1c8   :  { %4304 = vmatpush.bf16.msrb.mxu3 %v6480_v4  ;;  %v4039_v4 = vpop.f32.mrf.mxu2 }
 0x1c9   :  { %4266 = vmatpush.bf16.msrb.mxu0 %v5880_v10  ;;  %v7127_v10 = vld [vmem:[#allocation4 + $0x1060] sm:$0xf]  ;;  %v8026_v4 = vld [vmem:[#allocation4 + $0xfe4] sm:$0xf0] }
 0x1ca   :  { %4279 = vmatpush.bf16.msrb.mxu1 %v6072_v17  ;;  %v8044_v17 = vld [vmem:[#allocation4 + $0x1074] sm:$0xf0] }
 0x1cb   :  { %4292 = vmatpush.bf16.msrb.mxu2 %v6264_v11  ;;  %v6000_v11 = vor.u32 %v7762_v62, %v5999_v60  ;;  %v7128_v26 = vor.u32 %v8044_v17, %v7127_v10  ;;  %v7080_v60 = vor.u32 %v8032_v54, %v7079_v53  ;;  %v7930_v62 = vld [vmem:[#allocation4 + $0xce4] sm:$0xf0]  ;;  %v6647_v10 = vld [vmem:[#allocation4 + $0xca0] sm:$0xf]  ;;  %v7924_v17 = vld [vmem:[#allocation4 + $0xcb4] sm:$0xf0] }
 0x1cc   :  { %4305 = vmatpush.bf16.msrb.mxu3 %v6456_v19  ;;  %v6384_v19 = vor.u32 %v7858_v3, %v6383_v2  ;;  %v7978_v2 = vld [vmem:[#allocation4 + $0xe64] sm:$0xf0]  ;;  %v7055_v3 = vld [vmem:[#allocation4 + $0xfd0] sm:$0xf] }
 0x1cd   :  { %4267 = vmatpush.bf16.msrb.mxu0 %v5856_v39  ;;  %v8038_v39 = vld [vmem:[#allocation4 + $0x1044] sm:$0xf0]  ;;  %v7056_v20 = vor.u32 %v8026_v4, %v7055_v3  ;;  %v8056_v3 = vld [vmem:[#allocation4 + $0x10d4] sm:$0xf0] }
 0x1ce   :  { %4280 = vmatpush.bf16.msrb.mxu1 %v6048_v52  ;;  %v8086_v52 = vld [vmem:[#allocation4 + $0x11c4] sm:$0xf0]  ;;  %v7104_v46 = vor.u32 %v8038_v39, %v7103_v36  ;;  %v6815_v39 = vld [vmem:[#allocation4 + $0xdf0] sm:$0xf] }
 0x1cf   :  { %4293 = vmatpush.bf16.msrb.mxu2 %v6240_v42  ;;  %v6720_v42 = vor.u32 %v7942_v29, %v6719_v28  ;;  %v7296_v50 = vor.u32 %v8086_v52, %v7295_v41  ;;  %v6648_v29 = vor.u32 %v7924_v17, %v6647_v10  ;;  %v7918_v36 = vld [vmem:[#allocation4 + $0xc84] sm:$0xf0]  ;;  %v6959_v10 = vld [vmem:[#allocation4 + $0xf10] sm:$0xf] }
 0x1d0   :  { %4306 = vmatpush.bf16.msrb.mxu3 %v6432_v48  ;;  %v7936_v48 = vld [vmem:[#allocation4 + $0xd14] sm:$0xf0] }
 0x1d1   :  { %4268 = vmatpush.bf16.msrb.mxu0 %v5832_v55  ;;  %v7271_v55 = vld [vmem:[#allocation4 + $0x1180] sm:$0xf]  ;;  %v6696_v57 = vor.u32 %v7936_v48, %v6695_v47 }
 0x1d2   :  { %4281 = vmatpush.bf16.msrb.mxu1 %v6024_v58  ;;  %v6671_v58 = vld [vmem:[#allocation4 + $0xcd0] sm:$0xf]  ;;  %v7272_v1 = vor.u32 %v8080_v56, %v7271_v55 }
 0x1d3   :  { %4294 = vmatpush.bf16.msrb.mxu2 %v6216_v59  ;;  %v6888_v59 = vor.u32 %v7984_v51, %v6887_v49  ;;  %v6672_v5 = vor.u32 %v7930_v62, %v6671_v58  ;;  %v7199_v49 = vld [vmem:[#allocation4 + $0x10f0] sm:$0xf]  ;;  %v6624_v51 = vor.u32 %v7918_v36, %v6623_v32  ;;  %v7912_v58 = vld [vmem:[#allocation4 + $0xc54] sm:$0xf0]  ;;  %v7705_v36 = vld [vmem:[#allocation4 + $0x5e4] sm:$0xf] }
 0x1d4   :  { %4307 = vmatpush.bf16.msrb.mxu3 %v6408_v0  ;;  %v697_v0 = vperm.slane %v8433_v14, 3  ;;  %v7248_v14 = vor.u32 %v8074_v7, %v7247_v6  ;;  %v6575_v6 = vld [vmem:[#allocation4 + $0xc10] sm:$0xf]  ;;  %v7906_v7 = vld [vmem:[#allocation4 + $0xc24] sm:$0xf0] }
 0x1d5   :  { %4269 = vmatpush.bf16.msrb.mxu0 %v5808_v35  ;;  %v4063_v43 = vpop.f32.mrf.mxu0  ;;  %v6864_v35 = vor.u32 %v7978_v2, %v6863_v63  ;;  %v7960_v63 = vld [vmem:[#allocation4 + $0xdd4] sm:$0xf0]  ;;  %v7175_v2 = vld [vmem:[#allocation4 + $0x10c0] sm:$0xf] }
 0x1d6   :  { %4282 = vmatpush.bf16.msrb.mxu1 %v6000_v11  ;;  %v6839_v11 = vld [vmem:[#allocation4 + $0xe20] sm:$0xf]  ;;  %v4076_v13 = vpop.f32.mrf.mxu1 }
 0x1d7   :  { %4295 = vmatpush.bf16.msrb.mxu2 %v6192_v12  ;;  %v4064_v12 = vadd.f32 %v4063_v43, %v697_v0  ;;  %v6840_v30 = vor.u32 %v7972_v16, %v6839_v11  ;;  %v6983_v0 = vld [vmem:[#allocation4 + $0xf40] sm:$0xf]  ;;  %v7176_v11 = vor.u32 %v8056_v3, %v7175_v2  ;;  %v7645_v2 = vld [vmem:[#allocation4 + $0x404] sm:$0xf]  ;;  %v5545_v3 = vld [vmem:[#allocation4 + $0x418] sm:$0xf0] }
 0x1d8   :  { %4308 = vmatpush.bf16.msrb.mxu3 %v6384_v19  ;;  %4270 = vmatmul.bf16.vlgmr.msrb.gmra.mxu0 %v8359_v37  ;;  %v7031_v19 = vld [vmem:[#allocation4 + $0xfa0] sm:$0xf] }
 0x1d9   :  { %4314 = vmatpush.bf16.msra.mxu0 %v6744_v21  ;;  %4283 = vmatmul.bf16.vlgmr.msrb.gmra.mxu1 %v8363_v40  ;;  %v8020_v21 = vld [vmem:[#allocation4 + $0xfb4] sm:$0xf0]  ;;  %v4077_v28 = vadd.f32 %v4076_v13, %v4064_v12  ;;  %v8002_v12 = vld [vmem:[#allocation4 + $0xf24] sm:$0xf0]  ;;  %v7151_v13 = vld [vmem:[#allocation4 + $0x1090] sm:$0xf] }
 0x1da   :  { %4327 = vmatpush.bf16.msra.mxu1 %v6936_v24  ;;  %4296 = vmatmul.bf16.vlgmr.msrb.gmra.mxu2 %v8357_v34  ;;  %v7223_v24 = vld [vmem:[#allocation4 + $0x1120] sm:$0xf]  ;;  %v6960_v32 = vor.u32 %v8002_v12, %v6959_v10  ;;  %v7591_v10 = vld [vmem:[#allocation4 + $0x254] sm:$0xf] }
 0x1db   :  { %4340 = vmatpush.bf16.msra.mxu2 %v7128_v26  ;;  %4309 = vmatmul.bf16.vlgmr.msrb.gmra.mxu3 %v8361_v38  ;;  %v8068_v26 = vld [vmem:[#allocation4 + $0x1134] sm:$0xf0]  ;;  %v7639_v12 = vld [vmem:[#allocation4 + $0x3d4] sm:$0xf] }
 0x1dc   :  { %4353 = vmatpush.bf16.msra.mxu3 %v7320_v31  ;;  %v7032_v31 = vor.u32 %v8020_v21, %v7031_v19  ;;  %v7224_v52 = vor.u32 %v8068_v26, %v7223_v24  ;;  %v7561_v19 = vld [vmem:[#allocation4 + $0x164] sm:$0xf]  ;;  %v5209_v21 = vld [vmem:[#allocation4 + $0x178] sm:$0xf0]  ;;  %v6576_v26 = vor.u32 %v7906_v7, %v6575_v6 }
 0x1dd   :  { %4315 = vmatpush.bf16.msra.mxu0 %v6720_v42  ;;  %v4089_v41 = vpop.f32.mrf.mxu2  ;;  %v7966_v42 = vld [vmem:[#allocation4 + $0xe04] sm:$0xf0]  ;;  %v4065_v54 = vpop.f32.mrf.mxu0  ;;  %v7609_v24 = vld [vmem:[#allocation4 + $0x2e4] sm:$0xf]  ;;  %v5737_v6 = vld [vmem:[#allocation4 + $0x598] sm:$0xf0] }
 0x1de   :  { %4328 = vmatpush.bf16.msra.mxu1 %v6912_v44  ;;  %v7007_v44 = vld [vmem:[#allocation4 + $0xf70] sm:$0xf]  ;;  %v4090_v47 = vadd.f32 %v4089_v41, %v4077_v28  ;;  %v4102_v48 = vpop.f32.mrf.mxu3  ;;  %v6816_v55 = vor.u32 %v7966_v42, %v6815_v39  ;;  %v5401_v28 = vld [vmem:[#allocation4 + $0x2f8] sm:$0xf0]  ;;  %v5569_v54 = vld [vmem:[#allocation4 + $0x448] sm:$0xf0] }
 0x1df   :  { %4341 = vmatpush.bf16.msra.mxu2 %v7104_v46  ;;  %v8014_v46 = vld [vmem:[#allocation4 + $0xf84] sm:$0xf0]  ;;  %v5785_v39 = vld [vmem:[#allocation4 + $0x5f8] sm:$0xf0]  ;;  %v5404_v42 = vor.u32 %v7609_v24, %v5401_v28  ;;  %v7537_v28 = vld [vmem:[#allocation4 + $0xa4] sm:$0xf] }
 0x1e0   :  { %4354 = vmatpush.bf16.msra.mxu3 %v7296_v50  ;;  %v8062_v50 = vld [vmem:[#allocation4 + $0x1104] sm:$0xf0]  ;;  %v8457_v53 = vadd.f32 %v4102_v48, %v4090_v47  ;;  %v7008_v56 = vor.u32 %v8014_v46, %v7007_v44  ;;  %v7555_v46 = vld [vmem:[#allocation4 + $0x134] sm:$0xf]  ;;  %v5185_v47 = vld [vmem:[#allocation4 + $0x148] sm:$0xf0] }
 0x1e1   :  { %4316 = vmatpush.bf16.msra.mxu0 %v6696_v57  ;;  %v6599_v57 = vld [vmem:[#allocation4 + $0xc40] sm:$0xf]  ;;  %v7200_v62 = vor.u32 %v8062_v50, %v7199_v49  ;;  %v7603_v48 = vld [vmem:[#allocation4 + $0x2b4] sm:$0xf]  ;;  %v5788_v49 = vor.u32 %v7705_v36, %v5785_v39  ;;  %v5377_v50 = vld [vmem:[#allocation4 + $0x2c8] sm:$0xf0] }
 0x1e2   :  { %4329 = vmatpush.bf16.msra.mxu1 %v6888_v59  ;;  %v6791_v59 = vld [vmem:[#allocation4 + $0xdc0] sm:$0xf]  ;;  %v6600_v4 = vor.u32 %v7912_v58, %v6599_v57  ;;  %v5188_v57 = vor.u32 %v7555_v46, %v5185_v47  ;;  %v5380_v58 = vor.u32 %v7603_v48, %v5377_v50  ;;  %v5305_v39 = vld [vmem:[#allocation4 + $0x238] sm:$0xf0]  ;;  %v7531_v50 = vld [vmem:[#allocation4 + $0x74] sm:$0xf] }
 0x1e3   :  { %4342 = vmatpush.bf16.msra.mxu2 %v7080_v60  ;;  %v4078_v60 = vpop.f32.mrf.mxu1 }
 0x1e4   :  { %4355 = vmatpush.bf16.msra.mxu3 %v7272_v1  ;;  %v8008_v1 = vld [vmem:[#allocation4 + $0xf54] sm:$0xf0]  ;;  %v7549_v60 = vld [vmem:[#allocation4 + $0x104] sm:$0xf] }
 0x1e5   :  { %4317 = vmatpush.bf16.msra.mxu0 %v6672_v5  ;;  %v6792_v5 = vor.u32 %v7960_v63, %v6791_v59  ;;  %v6984_v43 = vor.u32 %v8008_v1, %v6983_v0  ;;  %v4091_v17 = vpop.f32.mrf.mxu2  ;;  %v7597_v63 = vld [vmem:[#allocation4 + $0x284] sm:$0xf]  ;;  %v5353_v1 = vld [vmem:[#allocation4 + $0x298] sm:$0xf0] }
 0x1e6   :  { %4330 = vmatpush.bf16.msra.mxu1 %v6864_v35  ;;  %v6767_v35 = vld [vmem:[#allocation4 + $0xd90] sm:$0xf]  ;;  %v4104_v16 = vpop.f32.mrf.mxu3 }
 0x1e7   :  { %4343 = vmatpush.bf16.msra.mxu2 %v7056_v20  ;;  %v7954_v20 = vld [vmem:[#allocation4 + $0xda4] sm:$0xf0]  ;;  %v5713_v16 = vld [vmem:[#allocation4 + $0x568] sm:$0xf0] }
 0x1e8   :  { %4356 = vmatpush.bf16.msra.mxu3 %v7248_v14  ;;  %v8050_v14 = vld [vmem:[#allocation4 + $0x10a4] sm:$0xf0] }
 0x1e9   :  { %4318 = vmatpush.bf16.msra.mxu0 %v6648_v29  ;;  %v7657_v29 = vld [vmem:[#allocation4 + $0x464] sm:$0xf]  ;;  %v7152_v41 = vor.u32 %v8050_v14, %v7151_v13  ;;  %v5521_v13 = vld [vmem:[#allocation4 + $0x3e8] sm:$0xf0]  ;;  %v7687_v14 = vld [vmem:[#allocation4 + $0x554] sm:$0xf] }
 0x1ea   :  { %4331 = vmatpush.bf16.msra.mxu1 %v6840_v30  ;;  %v5593_v30 = vld [vmem:[#allocation4 + $0x478] sm:$0xf0]  ;;  %v5716_v36 = vor.u32 %v7687_v14, %v5713_v16  ;;  %v7519_v14 = vld [vmem:[#allocation4 + $0x14] sm:$0xf]  ;;  %v5041_v16 = vld [vmem:[#allocation4 + $0x28] sm:$0xf0] }
 0x1eb   :  { %4344 = vmatpush.bf16.msra.mxu2 %v7032_v31  ;;  %v6768_v31 = vor.u32 %v7954_v20, %v6767_v35  ;;  %v5596_v44 = vor.u32 %v7657_v29, %v5593_v30  ;;  %v7543_v35 = vld [vmem:[#allocation4 + $0xd4] sm:$0xf]  ;;  %v5137_v20 = vld [vmem:[#allocation4 + $0xe8] sm:$0xf0]  ;;  %v5113_v29 = vld [vmem:[#allocation4 + $0xb8] sm:$0xf0] }
 0x1ec   :  { %4357 = vmatpush.bf16.msra.mxu3 %v7224_v52  ;;  %v5212_v52 = vor.u32 %v7561_v19, %v5209_v21  ;;  %v5140_v19 = vor.u32 %v7543_v35, %v5137_v20  ;;  %v7585_v30 = vld [vmem:[#allocation4 + $0x224] sm:$0xf]  ;;  %v5116_v47 = vor.u32 %v7537_v28, %v5113_v29  ;;  %v5257_v20 = vld [vmem:[#allocation4 + $0x1d8] sm:$0xf0]  ;;  %v7615_v28 = vld [vmem:[#allocation4 + $0x314] sm:$0xf] }
 0x1ed   :  { %4319 = vmatpush.bf16.msra.mxu0 %v6624_v51  ;;  %v7651_v51 = vld [vmem:[#allocation4 + $0x434] sm:$0xf]  ;;  %v5308_v48 = vor.u32 %v7585_v30, %v5305_v39 }
 0x1ee   :  { %4332 = vmatpush.bf16.msra.mxu1 %v6816_v55  ;;  %v7699_v55 = vld [vmem:[#allocation4 + $0x5b4] sm:$0xf]  ;;  %v5572_v59 = vor.u32 %v7651_v51, %v5569_v54  ;;  %v5089_v51 = vld [vmem:[#allocation4 + $0x88] sm:$0xf0] }
 0x1ef   :  { %4345 = vmatpush.bf16.msra.mxu2 %v7008_v56  ;;  %v5761_v56 = vld [vmem:[#allocation4 + $0x5c8] sm:$0xf0]  ;;  %v7579_v54 = vld [vmem:[#allocation4 + $0x1f4] sm:$0xf] }
 0x1f0   :  { %4358 = vmatpush.bf16.msra.mxu3 %v7200_v62  ;;  %v5161_v62 = vld [vmem:[#allocation4 + $0x118] sm:$0xf0]  ;;  %v5764_v0 = vor.u32 %v7699_v55, %v5761_v56  ;;  %v5281_v56 = vld [vmem:[#allocation4 + $0x208] sm:$0xf0] }
 0x1f1   :  { %4320 = vmatpush.bf16.msra.mxu0 %v6600_v4  ;;  %v7693_v4 = vld [vmem:[#allocation4 + $0x584] sm:$0xf]  ;;  %v5164_v7 = vor.u32 %v7549_v60, %v5161_v62  ;;  %v7675_v62 = vld [vmem:[#allocation4 + $0x4f4] sm:$0xf] }
 0x1f2   :  { %4333 = vmatpush.bf16.msra.mxu1 %v6792_v5  ;;  %v5356_v5 = vor.u32 %v7597_v63, %v5353_v1  ;;  %v5740_v17 = vor.u32 %v7693_v4, %v5737_v6  ;;  %v5665_v63 = vld [vmem:[#allocation4 + $0x508] sm:$0xf0]  ;;  %v7525_v6 = vld [vmem:[#allocation4 + $0x44] sm:$0xf] }
 0x1f3   :  { %4346 = vmatpush.bf16.msra.mxu2 %v6984_v43  ;;  %v5548_v43 = vor.u32 %v7645_v2, %v5545_v3  ;;  %v5284_v3 = vor.u32 %v7579_v54, %v5281_v56  ;;  %v5668_v35 = vor.u32 %v7675_v62, %v5665_v63  ;;  %v6553_v54 = vld [vmem:[#allocation4 + $0xbf8] sm:$0xf0]  ;;  %v6145_v63 = vld [vmem:[#allocation4 + $0x8c8] sm:$0xf0] }
 0x1f4   :  { %4359 = vmatpush.bf16.msra.mxu3 %v7176_v11  ;;  %v5329_v11 = vld [vmem:[#allocation4 + $0x268] sm:$0xf0] }
 0x1f5   :  { %4321 = vmatpush.bf16.msra.mxu0 %v6576_v26  ;;  %v4115_v21 = vpop.f32.mrf.mxu0  ;;  %v5332_v24 = vor.u32 %v7591_v10, %v5329_v11  ;;  %v5524_v26 = vor.u32 %v7639_v12, %v5521_v13  ;;  %v7621_v10 = vld [vmem:[#allocation4 + $0x344] sm:$0xf]  ;;  %v5641_v12 = vld [vmem:[#allocation4 + $0x4d8] sm:$0xf0] }
 0x1f6   :  { %4334 = vmatpush.bf16.msra.mxu1 %v6768_v31  ;;  %v4116_v31 = vadd.f32 %v4115_v21, %v8457_v53  ;;  %v7669_v11 = vld [vmem:[#allocation4 + $0x4c4] sm:$0xf] }
 0x1f7   :  { %4347 = vmatpush.bf16.msra.mxu2 %v6960_v32  ;;  %v4128_v32 = vpop.f32.mrf.mxu1  ;;  %v5644_v30 = vor.u32 %v7669_v11, %v5641_v12  ;;  %v7837_v11 = vld [vmem:[#allocation4 + $0xa04] sm:$0xf]  ;;  %v6313_v12 = vld [vmem:[#allocation4 + $0xa18] sm:$0xf0] }
 0x1f8   :  { %4360 = vmatpush.bf16.msra.mxu3 %v7152_v41  ;;  %4322 = vmatmul.bf16.vlgmr.msra.gmra.mxu0 %v8369_v18  ;;  %v7633_v41 = vld [vmem:[#allocation4 + $0x3a4] sm:$0xf]  ;;  %v4129_v46 = vadd.f32 %v4128_v32, %v4116_v31  ;;  %v5425_v31 = vld [vmem:[#allocation4 + $0x328] sm:$0xf0]  ;;  %v7663_v32 = vld [vmem:[#allocation4 + $0x494] sm:$0xf] }
 0x1f9   :  { %4366 = vmatpush.bf16.msrb.mxu0 %v5212_v52  ;;  %4335 = vmatmul.bf16.vlgmr.msra.gmra.mxu1 %v8373_v23  ;;  %v5497_v52 = vld [vmem:[#allocation4 + $0x3b8] sm:$0xf0] }
 0x1fa   :  { %4379 = vmatpush.bf16.msrb.mxu1 %v5404_v42  ;;  %4348 = vmatmul.bf16.vlgmr.msra.gmra.mxu2 %v8371_v22  ;;  %v7681_v42 = vld [vmem:[#allocation4 + $0x524] sm:$0xf] }
 0x1fb   :  { %4392 = vmatpush.bf16.msrb.mxu2 %v5596_v44  ;;  %4361 = vmatmul.bf16.vlgmr.msra.gmra.mxu3 %v8375_v27  ;;  %v5689_v44 = vld [vmem:[#allocation4 + $0x538] sm:$0xf0] }
 0x1fc   :  { %4405 = vmatpush.bf16.msrb.mxu3 %v5788_v49  ;;  %v5500_v49 = vor.u32 %v7633_v41, %v5497_v52  ;;  %v5692_v53 = vor.u32 %v7681_v42, %v5689_v44  ;;  %v7753_v41 = vld [vmem:[#allocation4 + $0x764] sm:$0xf]  ;;  %v5977_v52 = vld [vmem:[#allocation4 + $0x778] sm:$0xf0]  ;;  %v5044_v44 = vor.u32 %v7519_v14, %v5041_v16 }
 0x1fd   :  { %4367 = vmatpush.bf16.msrb.mxu0 %v5188_v57  ;;  %v4141_v55 = vpop.f32.mrf.mxu2  ;;  %v7627_v57 = vld [vmem:[#allocation4 + $0x374] sm:$0xf]  ;;  %v4117_v2 = vpop.f32.mrf.mxu0  ;;  %v7801_v42 = vld [vmem:[#allocation4 + $0x8e4] sm:$0xf]  ;;  %v6505_v14 = vld [vmem:[#allocation4 + $0xb98] sm:$0xf0] }
 0x1fe   :  { %4380 = vmatpush.bf16.msrb.mxu1 %v5380_v58  ;;  %v5473_v58 = vld [vmem:[#allocation4 + $0x388] sm:$0xf0]  ;;  %v4154_v60 = vpop.f32.mrf.mxu3 }
 0x1ff   :  { %4393 = vmatpush.bf16.msrb.mxu2 %v5572_v59  ;;  %v4142_v59 = vadd.f32 %v4141_v55, %v4129_v46  ;;  %v5476_v4 = vor.u32 %v7627_v57, %v5473_v58  ;;  %v6169_v46 = vld [vmem:[#allocation4 + $0x8f8] sm:$0xf0]  ;;  %v7747_v58 = vld [vmem:[#allocation4 + $0x734] sm:$0xf]  ;;  %v6337_v2 = vld [vmem:[#allocation4 + $0xa48] sm:$0xf0] }
 0x200   :  { %4406 = vmatpush.bf16.msrb.mxu3 %v5764_v0  ;;  %v5092_v0 = vor.u32 %v7531_v50, %v5089_v51  ;;  %v5428_v50 = vor.u32 %v7615_v28, %v5425_v31  ;;  %v7897_v51 = vld [vmem:[#allocation4 + $0xbe4] sm:$0xf]  ;;  %v6172_v56 = vor.u32 %v7801_v42, %v6169_v46  ;;  %v7783_v28 = vld [vmem:[#allocation4 + $0x854] sm:$0xf]  ;;  %v6289_v31 = vld [vmem:[#allocation4 + $0x9e8] sm:$0xf0] }
 0x201   :  { %4368 = vmatpush.bf16.msrb.mxu0 %v5164_v7  ;;  %v8464_v1 = vadd.f32 %v4154_v60, %v4142_v59  ;;  %v5065_v7 = vld [vmem:[#allocation4 + $0x58] sm:$0xf0]  ;;  %v5953_v59 = vld [vmem:[#allocation4 + $0x748] sm:$0xf0]  ;;  %v7795_v60 = vld [vmem:[#allocation4 + $0x8b4] sm:$0xf]  ;;  %v6556_v62 = vor.u32 %v7897_v51, %v6553_v54 }
 0x202   :  { %4381 = vmatpush.bf16.msrb.mxu1 %v5356_v5  ;;  %v7573_v5 = vld [vmem:[#allocation4 + $0x1c4] sm:$0xf]  ;;  %v5068_v13 = vor.u32 %v7525_v6, %v5065_v7  ;;  %v5956_v6 = vor.u32 %v7747_v58, %v5953_v59  ;;  %v6148_v7 = vor.u32 %v7795_v60, %v6145_v63  ;;  %v6265_v51 = vld [vmem:[#allocation4 + $0x9b8] sm:$0xf0]  ;;  %v5857_v58 = vld [vmem:[#allocation4 + $0x688] sm:$0xf0] }
 0x203   :  { %4394 = vmatpush.bf16.msrb.mxu2 %v5548_v43  ;;  %v4130_v43 = vpop.f32.mrf.mxu1  ;;  %v7729_v42 = vld [vmem:[#allocation4 + $0x6a4] sm:$0xf]  ;;  %v7771_v59 = vld [vmem:[#allocation4 + $0x7f4] sm:$0xf]  ;;  %v6049_v63 = vld [vmem:[#allocation4 + $0x808] sm:$0xf0] }
 0x204   :  { %4407 = vmatpush.bf16.msrb.mxu3 %v5740_v17  ;;  %v5449_v17 = vld [vmem:[#allocation4 + $0x358] sm:$0xf0]  ;;  %v7741_v43 = vld [vmem:[#allocation4 + $0x704] sm:$0xf] }
 0x205   :  { %4369 = vmatpush.bf16.msrb.mxu0 %v5140_v19  ;;  %v5260_v19 = vor.u32 %v7573_v5, %v5257_v20  ;;  %v5452_v21 = vor.u32 %v7621_v10, %v5449_v17  ;;  %v4143_v29 = vpop.f32.mrf.mxu2  ;;  %v7789_v20 = vld [vmem:[#allocation4 + $0x884] sm:$0xf]  ;;  %v6121_v17 = vld [vmem:[#allocation4 + $0x898] sm:$0xf0] }
 0x206   :  { %4382 = vmatpush.bf16.msrb.mxu1 %v5332_v24  ;;  %v7567_v24 = vld [vmem:[#allocation4 + $0x194] sm:$0xf]  ;;  %v4156_v39 = vpop.f32.mrf.mxu3  ;;  %v7777_v46 = vld [vmem:[#allocation4 + $0x824] sm:$0xf] }
 0x207   :  { %4395 = vmatpush.bf16.msrb.mxu2 %v5524_v26  ;;  %v5233_v26 = vld [vmem:[#allocation4 + $0x1a8] sm:$0xf0]  ;;  %v7873_v54 = vld [vmem:[#allocation4 + $0xb24] sm:$0xf] }
 0x208   :  { %4408 = vmatpush.bf16.msrb.mxu3 %v5716_v36  ;;  %v5617_v36 = vld [vmem:[#allocation4 + $0x4a8] sm:$0xf0] }
 0x209   :  { %4370 = vmatpush.bf16.msrb.mxu0 %v5116_v47  ;;  %v7849_v47 = vld [vmem:[#allocation4 + $0xa64] sm:$0xf]  ;;  %v5620_v55 = vor.u32 %v7663_v32, %v5617_v36  ;;  %v6481_v36 = vld [vmem:[#allocation4 + $0xb68] sm:$0xf0] }
 0x20a   :  { %4383 = vmatpush.bf16.msrb.mxu1 %v5308_v48  ;;  %v6361_v48 = vld [vmem:[#allocation4 + $0xa78] sm:$0xf0] }
 0x20b   :  { %4396 = vmatpush.bf16.msrb.mxu2 %v5500_v49  ;;  %v5236_v49 = vor.u32 %v7567_v24, %v5233_v26  ;;  %v6364_v57 = vor.u32 %v7849_v47, %v6361_v48  ;;  %v7735_v24 = vld [vmem:[#allocation4 + $0x6d4] sm:$0xf]  ;;  %v5905_v26 = vld [vmem:[#allocation4 + $0x6e8] sm:$0xf0] }
 0x20c   :  { %4409 = vmatpush.bf16.msrb.mxu3 %v5692_v53  ;;  %v5980_v53 = vor.u32 %v7753_v41, %v5977_v52  ;;  %v5908_v39 = vor.u32 %v7735_v24, %v5905_v26  ;;  %v7711_v26 = vld [vmem:[#allocation4 + $0x614] sm:$0xf] }
 0x20d   :  { %4371 = vmatpush.bf16.msrb.mxu0 %v5092_v0  ;;  %v7843_v0 = vld [vmem:[#allocation4 + $0xa34] sm:$0xf] }
 0x20e   :  { %4384 = vmatpush.bf16.msrb.mxu1 %v5284_v3  ;;  %v7891_v3 = vld [vmem:[#allocation4 + $0xbb4] sm:$0xf]  ;;  %v6340_v5 = vor.u32 %v7843_v0, %v6337_v2  ;;  %v6241_v2 = vld [vmem:[#allocation4 + $0x988] sm:$0xf0] }
 0x20f   :  { %4397 = vmatpush.bf16.msrb.mxu2 %v5476_v4  ;;  %v6529_v4 = vld [vmem:[#allocation4 + $0xbc8] sm:$0xf0]  ;;  %v7819_v0 = vld [vmem:[#allocation4 + $0x974] sm:$0xf] }
 0x210   :  { %4410 = vmatpush.bf16.msrb.mxu3 %v5668_v35  ;;  %v5929_v35 = vld [vmem:[#allocation4 + $0x718] sm:$0xf0]  ;;  %v6532_v10 = vor.u32 %v7891_v3, %v6529_v4  ;;  %v7867_v4 = vld [vmem:[#allocation4 + $0xaf4] sm:$0xf] }
 0x211   :  { %4372 = vmatpush.bf16.msrb.mxu0 %v5068_v13  ;;  %v7885_v13 = vld [vmem:[#allocation4 + $0xb84] sm:$0xf]  ;;  %v5932_v16 = vor.u32 %v7741_v43, %v5929_v35  ;;  %v6052_v35 = vor.u32 %v7771_v59, %v6049_v63  ;;  %v7939_v59 = vld [vmem:[#allocation4 + $0xd34] sm:$0xf] }
 0x212   :  { %4385 = vmatpush.bf16.msrb.mxu1 %v5260_v19  ;;  %v6124_v19 = vor.u32 %v7789_v20, %v6121_v17  ;;  %v6508_v29 = vor.u32 %v7885_v13, %v6505_v14  ;;  %v6244_v20 = vor.u32 %v7819_v0, %v6241_v2  ;;  %v5833_v17 = vld [vmem:[#allocation4 + $0x658] sm:$0xf0]  ;;  %v7813_v14 = vld [vmem:[#allocation4 + $0x944] sm:$0xf]  ;;  %v7987_v63 = vld [vmem:[#allocation4 + $0xeb4] sm:$0xf] }
 0x213   :  { %4398 = vmatpush.bf16.msrb.mxu2 %v5452_v21  ;;  %v6316_v21 = vor.u32 %v7837_v11, %v6313_v12  ;;  %v7765_v11 = vld [vmem:[#allocation4 + $0x7c4] sm:$0xf]  ;;  %v6025_v13 = vld [vmem:[#allocation4 + $0x7d8] sm:$0xf0]  ;;  %v6913_v2 = vld [vmem:[#allocation4 + $0xec8] sm:$0xf0] }
 0x214   :  { %4411 = vmatpush.bf16.msrb.mxu3 %v5644_v30  ;;  %v7831_v30 = vld [vmem:[#allocation4 + $0x9d4] sm:$0xf] }
 0x215   :  { %4373 = vmatpush.bf16.msrb.mxu0 %v5044_v44  ;;  %v4167_v32 = vpop.f32.mrf.mxu0  ;;  %v6292_v52 = vor.u32 %v7831_v30, %v6289_v31  ;;  %v5881_v44 = vld [vmem:[#allocation4 + $0x6b8] sm:$0xf0]  ;;  %v7759_v30 = vld [vmem:[#allocation4 + $0x794] sm:$0xf]  ;;  %v6001_v31 = vld [vmem:[#allocation4 + $0x7a8] sm:$0xf0] }
 0x216   :  { %4386 = vmatpush.bf16.msrb.mxu1 %v5236_v49  ;;  %v6073_v49 = vld [vmem:[#allocation4 + $0x838] sm:$0xf0] }
 0x217   :  { %4399 = vmatpush.bf16.msrb.mxu2 %v5428_v50  ;;  %v7825_v50 = vld [vmem:[#allocation4 + $0x9a4] sm:$0xf] }
 0x218   :  { %4412 = vmatpush.bf16.msrb.mxu3 %v5620_v55  ;;  %4374 = vmatmul.bf16.vlgmr.msrb.gmra.mxu0 %v8347_v9  ;;  %v7879_v9 = vld [vmem:[#allocation4 + $0xb54] sm:$0xf]  ;;  %v6457_v55 = vld [vmem:[#allocation4 + $0xb38] sm:$0xf0] }
 0x219   :  { %4418 = vmatpush.bf16.msra.mxu0 %v5980_v53  ;;  %4387 = vmatmul.bf16.vlgmr.msrb.gmra.mxu1 %v8354_v25  ;;  %v4180_v25 = vpop.f32.mrf.mxu1  ;;  %v6484_v47 = vor.u32 %v7879_v9, %v6481_v36  ;;  %v6076_v53 = vor.u32 %v7777_v46, %v6073_v49  ;;  %v6460_v60 = vor.u32 %v7873_v54, %v6457_v55  ;;  %v6193_v36 = vld [vmem:[#allocation4 + $0x928] sm:$0xf0]  ;;  %v8041_v49 = vld [vmem:[#allocation4 + $0x1064] sm:$0xf] }
 0x21a   :  { %4431 = vmatpush.bf16.msra.mxu1 %v6172_v56  ;;  %4400 = vmatmul.bf16.vlgmr.msrb.gmra.mxu2 %v8345_v8  ;;  %v6097_v8 = vld [vmem:[#allocation4 + $0x868] sm:$0xf0]  ;;  %v6268_v56 = vor.u32 %v7825_v50, %v6265_v51  ;;  %v7129_v50 = vld [vmem:[#allocation4 + $0x1078] sm:$0xf0]  ;;  %v6004_v51 = vor.u32 %v7759_v30, %v6001_v31  ;;  %v8089_v55 = vld [vmem:[#allocation4 + $0x11e4] sm:$0xf] }
 0x21b   :  { %4444 = vmatpush.bf16.msra.mxu2 %v6364_v57  ;;  %4413 = vmatmul.bf16.vlgmr.msrb.gmra.mxu3 %v8349_v15  ;;  %v4168_v15 = vadd.f32 %v4167_v32, %v8464_v1  ;;  %v6100_v41 = vor.u32 %v7783_v28, %v6097_v8  ;;  %v5884_v1 = vor.u32 %v7729_v42, %v5881_v44  ;;  %v7723_v57 = vld [vmem:[#allocation4 + $0x674] sm:$0xf]  ;;  %v5809_v28 = vld [vmem:[#allocation4 + $0x628] sm:$0xf0]  ;;  %v7993_v42 = vld [vmem:[#allocation4 + $0xee4] sm:$0xf] }
 0x21c   :  { %4457 = vmatpush.bf16.msra.mxu3 %v6556_v62  ;;  %v7807_v32 = vld [vmem:[#allocation4 + $0x914] sm:$0xf]  ;;  %v5812_v46 = vor.u32 %v7711_v26, %v5809_v28  ;;  %v6865_v31 = vld [vmem:[#allocation4 + $0xe68] sm:$0xf0] }
 0x21d   :  { %4419 = vmatpush.bf16.msra.mxu0 %v5956_v6  ;;  %v8471_v48 = vadd.f32 %v4180_v25, %v4168_v15  ;;  %v8473_v62 = vpop.f32.mrf.mxu2  ;;  %v6433_v6 = vld [vmem:[#allocation4 + $0xb08] sm:$0xf0]  ;;  %v7855_v15 = vld [vmem:[#allocation4 + $0xa94] sm:$0xf]  ;;  %v6196_v54 = vor.u32 %v7807_v32, %v6193_v36 }
 0x21e   :  { %4432 = vmatpush.bf16.msra.mxu1 %v6148_v7  ;;  %v8475_v3 = vpop.f32.mrf.mxu3  ;;  %v4169_v7 = vpop.f32.mrf.mxu0  ;;  %v6436_v12 = vor.u32 %v7867_v4, %v6433_v6  ;;  %v8035_v4 = vld [vmem:[#allocation4 + $0x1034] sm:$0xf]  ;;  %v7105_v6 = vld [vmem:[#allocation4 + $0x1048] sm:$0xf0] }
 0x21f   :  { %4445 = vmatpush.bf16.msra.mxu2 %v6340_v5  ;;  %v5860_v5 = vor.u32 %v7723_v57, %v5857_v58  ;;  %v7132_v58 = vor.u32 %v8041_v49, %v7129_v50  ;;  %v8083_v7 = vld [vmem:[#allocation4 + $0x11b4] sm:$0xf]  ;;  %v7033_v49 = vld [vmem:[#allocation4 + $0xfb8] sm:$0xf0]  ;;  %v8065_v50 = vld [vmem:[#allocation4 + $0x1124] sm:$0xf] }
 0x220   :  { %4458 = vmatpush.bf16.msra.mxu3 %v6532_v10  ;;  %v7717_v10 = vld [vmem:[#allocation4 + $0x644] sm:$0xf]  ;;  %v8023_v32 = vld [vmem:[#allocation4 + $0xfd4] sm:$0xf] }
 0x221   :  { %4420 = vmatpush.bf16.msra.mxu0 %v5932_v16  ;;  %v4182_v43 = vpop.f32.mrf.mxu1  ;;  %v6217_v16 = vld [vmem:[#allocation4 + $0x958] sm:$0xf0]  ;;  %v5836_v24 = vor.u32 %v7717_v10, %v5833_v17  ;;  %v7933_v10 = vld [vmem:[#allocation4 + $0xd04] sm:$0xf]  ;;  %v8071_v36 = vld [vmem:[#allocation4 + $0x1154] sm:$0xf] }
 0x222   :  { %4433 = vmatpush.bf16.msra.mxu1 %v6124_v19  ;;  %v7861_v19 = vld [vmem:[#allocation4 + $0xac4] sm:$0xf]  ;;  %v6220_v8 = vor.u32 %v7813_v14, %v6217_v16  ;;  %v6697_v17 = vld [vmem:[#allocation4 + $0xd18] sm:$0xf0] }
 0x223   :  { %4446 = vmatpush.bf16.msra.mxu2 %v6316_v21  ;;  %v6409_v21 = vld [vmem:[#allocation4 + $0xad8] sm:$0xf0]  ;;  %v8029_v14 = vld [vmem:[#allocation4 + $0x1004] sm:$0xf] }
 0x224   :  { %4459 = vmatpush.bf16.msra.mxu3 %v6508_v29  ;;  %v6028_v29 = vor.u32 %v7765_v11, %v6025_v13  ;;  %v6412_v9 = vor.u32 %v7861_v19, %v6409_v21  ;;  %v7981_v11 = vld [vmem:[#allocation4 + $0xe84] sm:$0xf]  ;;  %v6889_v13 = vld [vmem:[#allocation4 + $0xe98] sm:$0xf0] }
 0x225   :  { %4421 = vmatpush.bf16.msra.mxu0 %v5908_v39  ;;  %v6385_v39 = vld [vmem:[#allocation4 + $0xaa8] sm:$0xf0]  ;;  %v4195_v25 = vpop.f32.mrf.mxu2  ;;  %v7081_v16 = vld [vmem:[#allocation4 + $0x1018] sm:$0xf0]  ;;  %v8077_v19 = vld [vmem:[#allocation4 + $0x1184] sm:$0xf]  ;;  %v6892_v26 = vor.u32 %v7981_v11, %v6889_v13 }
 0x226   :  { %4434 = vmatpush.bf16.msra.mxu1 %v6100_v41  ;;  %v7945_v41 = vld [vmem:[#allocation4 + $0xd64] sm:$0xf]  ;;  %v4208_v44 = vpop.f32.mrf.mxu3  ;;  %v7273_v21 = vld [vmem:[#allocation4 + $0x1198] sm:$0xf0]  ;;  %v7084_v28 = vor.u32 %v8029_v14, %v7081_v16 }
 0x227   :  { %4447 = vmatpush.bf16.msra.mxu2 %v6292_v52  ;;  %v6745_v52 = vld [vmem:[#allocation4 + $0xd78] sm:$0xf0]  ;;  %v7276_v30 = vor.u32 %v8077_v19, %v7273_v21  ;;  %v7921_v25 = vld [vmem:[#allocation4 + $0xca4] sm:$0xf] }
 0x228   :  { %4460 = vmatpush.bf16.msra.mxu3 %v6484_v47  ;;  %v6937_v47 = vld [vmem:[#allocation4 + $0xef8] sm:$0xf0]  ;;  %v8005_v14 = vld [vmem:[#allocation4 + $0xf44] sm:$0xf] }
 0x229   :  { %4422 = vmatpush.bf16.msra.mxu0 %v5884_v1  ;;  %v7321_v1 = vld [vmem:[#allocation4 + $0x11f8] sm:$0xf0]  ;;  %v6940_v57 = vor.u32 %v7993_v42, %v6937_v47  ;;  %v8017_v47 = vld [vmem:[#allocation4 + $0xfa4] sm:$0xf] }
 0x22a   :  { %4435 = vmatpush.bf16.msra.mxu1 %v6076_v53  ;;  %v6388_v53 = vor.u32 %v7855_v15, %v6385_v39  ;;  %v7324_v0 = vor.u32 %v8089_v55, %v7321_v1  ;;  %v7036_v1 = vor.u32 %v8017_v47, %v7033_v49  ;;  %v6793_v13 = vld [vmem:[#allocation4 + $0xdd8] sm:$0xf0]  ;;  %v8053_v19 = vld [vmem:[#allocation4 + $0x10c4] sm:$0xf] }
 0x22b   :  { %4448 = vmatpush.bf16.msra.mxu2 %v6268_v56  ;;  %v6748_v56 = vor.u32 %v7945_v41, %v6745_v52  ;;  %v6649_v41 = vld [vmem:[#allocation4 + $0xcb8] sm:$0xf0]  ;;  %v7969_v52 = vld [vmem:[#allocation4 + $0xe24] sm:$0xf] }
 0x22c   :  { %4461 = vmatpush.bf16.msra.mxu3 %v6460_v60  ;;  %v6721_v60 = vld [vmem:[#allocation4 + $0xd48] sm:$0xf0]  ;;  %v6985_v16 = vld [vmem:[#allocation4 + $0xf58] sm:$0xf0] }
 0x22d   :  { %4423 = vmatpush.bf16.msra.mxu0 %v5860_v5  ;;  %v7297_v5 = vld [vmem:[#allocation4 + $0x11c8] sm:$0xf0]  ;;  %v6724_v43 = vor.u32 %v7939_v59, %v6721_v60  ;;  %v7177_v21 = vld [vmem:[#allocation4 + $0x10d8] sm:$0xf0] }
 0x22e   :  { %4436 = vmatpush.bf16.msra.mxu1 %v6052_v35  ;;  %v6916_v35 = vor.u32 %v7987_v63, %v6913_v2  ;;  %v6817_v60 = vld [vmem:[#allocation4 + $0xe08] sm:$0xf0]  ;;  %v8011_v63 = vld [vmem:[#allocation4 + $0xf74] sm:$0xf]  ;;  %v8116_v47 = vld [vmem:[#allocation7 + $0xb8] sm:$0xff] }
 0x22f   :  { %4449 = vmatpush.bf16.msra.mxu2 %v6244_v20  ;;  %v7108_v20 = vor.u32 %v8035_v4, %v7105_v6  ;;  %v8059_v4 = vld [vmem:[#allocation4 + $0x10f4] sm:$0xf]  ;;  %v7201_v6 = vld [vmem:[#allocation4 + $0x1108] sm:$0xf0]  ;;  %v8124_v49 = vld [vmem:[#allocation7 + $0xf8] sm:$0xff] }
 0x230   :  { %4462 = vmatpush.bf16.msra.mxu3 %v6436_v12  ;;  %v7300_v12 = vor.u32 %v8083_v7, %v7297_v5 }
 0x231   :  { %4424 = vmatpush.bf16.msra.mxu0 %v5836_v24  ;;  %v6700_v24 = vor.u32 %v7933_v10, %v6697_v17  ;;  %v6601_v10 = vld [vmem:[#allocation4 + $0xc58] sm:$0xf0]  ;;  %v7957_v17 = vld [vmem:[#allocation4 + $0xdc4] sm:$0xf] }
 0x232   :  { %4437 = vmatpush.bf16.msra.mxu1 %v6028_v29  ;;  %v7927_v29 = vld [vmem:[#allocation4 + $0xcd4] sm:$0xf] }
 0x233   :  { %4450 = vmatpush.bf16.msra.mxu2 %v6220_v8  ;;  %v6673_v8 = vld [vmem:[#allocation4 + $0xce8] sm:$0xf0] }
 0x234   :  { %4463 = vmatpush.bf16.msra.mxu3 %v6412_v9  ;;  %v7057_v9 = vld [vmem:[#allocation4 + $0xfe8] sm:$0xf0] }
 0x235   :  { %4425 = vmatpush.bf16.msra.mxu0 %v5812_v46  ;;  %v8481_v15 = vpop.f32.mrf.mxu0  ;;  %v7060_v39 = vor.u32 %v8023_v32, %v7057_v9  ;;  %v6841_v46 = vld [vmem:[#allocation4 + $0xe38] sm:$0xf0]  ;;  %v6769_v32 = vld [vmem:[#allocation4 + $0xda8] sm:$0xf0]  ;;  %v7999_v9 = vld [vmem:[#allocation4 + $0xf14] sm:$0xf] }
 0x236   :  { %4438 = vmatpush.bf16.msra.mxu1 %v6004_v51  ;;  %v8483_v42 = vpop.f32.mrf.mxu1  ;;  %v7225_v51 = vld [vmem:[#allocation4 + $0x1138] sm:$0xf0]  ;;  %v6844_v55 = vor.u32 %v7969_v52, %v6841_v46 }
 0x237   :  { %4451 = vmatpush.bf16.msra.mxu2 %v6196_v54  ;;  %v6652_v54 = vor.u32 %v7921_v25, %v6649_v41  ;;  %v7228_v59 = vor.u32 %v8065_v50, %v7225_v51  ;;  %v8108_v46 = vld [vmem:[#allocation7 + $0x78] sm:$0xff]  ;;  %v8099_v50 = vld [vmem:[#allocation7 + $0x30] sm:$0xff] }
 0x238   :  { %4464 = vmatpush.bf16.msra.mxu3 %v6388_v53  ;;  %4426 = vmatmul.bf16.vlgmr.msra.gmra.mxu0 %v8359_v37  ;;  %v7249_v37 = vld [vmem:[#allocation4 + $0x1168] sm:$0xf0]  ;;  %v7915_v53 = vld [vmem:[#allocation4 + $0xc74] sm:$0xf] }
 0x239   :  { %4470 = vmatpush.bf16.msrb.mxu0 %v6748_v56  ;;  %4439 = vmatmul.bf16.vlgmr.msra.gmra.mxu1 %v8363_v40  ;;  %v7252_v44 = vor.u32 %v8071_v36, %v7249_v37  ;;  %v6625_v56 = vld [vmem:[#allocation4 + $0xc88] sm:$0xf0]  ;;  %v8107_v51 = vld [vmem:[#allocation7 + $0x70] sm:$0xff] }
 0x23a   :  { %4483 = vmatpush.bf16.msrb.mxu1 %v6940_v57  ;;  %4452 = vmatmul.bf16.vlgmr.msra.gmra.mxu2 %v8357_v34  ;;  %v7975_v34 = vld [vmem:[#allocation4 + $0xe54] sm:$0xf]  ;;  %v6628_v7 = vor.u32 %v7915_v53, %v6625_v56  ;;  %v6961_v36 = vld [vmem:[#allocation4 + $0xf28] sm:$0xf0]  ;;  %v8493_v53 = vld [vmem:[#allocation6] sm:$0x3f] }
 0x23b   :  { %4496 = vmatpush.bf16.msrb.mxu2 %v7132_v58  ;;  %4465 = vmatmul.bf16.vlgmr.msra.gmra.mxu3 %v8361_v38  ;;  %v6676_v38 = vor.u32 %v7927_v29, %v6673_v8  ;;  %v6868_v40 = vor.u32 %v7975_v34, %v6865_v31  ;;  %v7963_v57 = vld [vmem:[#allocation4 + $0xdf4] sm:$0xf]  ;;  %v6577_v8 = vld [vmem:[#allocation4 + $0xc28] sm:$0xf0]  ;;  %v7180_v31 = vor.u32 %v8053_v19, %v7177_v21  ;;  %v698_v56 = vperm.slane %v8493_v53, 4 }
 0x23c   :  { %4509 = vmatpush.bf16.msrb.mxu3 %v7324_v0  ;;  %v7009_v0 = vld [vmem:[#allocation4 + $0xf88] sm:$0xf0]  ;;  %v7903_v29 = vld [vmem:[#allocation4 + $0xc14] sm:$0xf]  ;;  %v6964_v41 = vor.u32 %v7999_v9, %v6961_v36 }
 0x23d   :  { %4471 = vmatpush.bf16.msrb.mxu0 %v6724_v43  ;;  %v8485_v58 = vpop.f32.mrf.mxu2  ;;  %v4221_v5 = vpop.f32.mrf.mxu0  ;;  %v6820_v43 = vor.u32 %v7963_v57, %v6817_v60  ;;  %v7951_v34 = vld [vmem:[#allocation4 + $0xd94] sm:$0xf]  ;;  %v8101_v36 = vld [vmem:[#allocation7 + $0x40] sm:$0xff] }
 0x23e   :  { %4484 = vmatpush.bf16.msrb.mxu1 %v6916_v35  ;;  %v8487_v2 = vpop.f32.mrf.mxu3  ;;  %v7012_v35 = vor.u32 %v8011_v63, %v7009_v0  ;;  %v4234_v11 = vpop.f32.mrf.mxu1  ;;  %v6772_v25 = vor.u32 %v7951_v34, %v6769_v32  ;;  %v8106_v57 = vld [vmem:[#allocation7 + $0x68] sm:$0xff]  ;;  %v8105_v63 = vld [vmem:[#allocation7 + $0x60] sm:$0xff]  ;;  %v8096_v5 = vld [vmem:[#allocation7 + $0x18] sm:$0xff] }
 0x23f   :  { %4497 = vmatpush.bf16.msrb.mxu2 %v7108_v20  ;;  %v7909_v20 = vld [vmem:[#allocation4 + $0xc44] sm:$0xf]  ;;  %v8122_v60 = vld [vmem:[#allocation7 + $0xe8] sm:$0xff] }
 0x240   :  { %4510 = vmatpush.bf16.msrb.mxu3 %v7300_v12  ;;  %v7204_v12 = vor.u32 %v8059_v4, %v7201_v6  ;;  %v8113_v0 = vld [vmem:[#allocation7 + $0xa0] sm:$0xff]  ;;  %v8118_v34 = vld [vmem:[#allocation7 + $0xc8] sm:$0xff] }
 0x241   :  { %4472 = vmatpush.bf16.msrb.mxu0 %v6700_v24  ;;  %v6604_v24 = vor.u32 %v7909_v20, %v6601_v10  ;;  %v8112_v20 = vld [vmem:[#allocation7 + $0x98] sm:$0xff] }
 0x242   :  { %4485 = vmatpush.bf16.msrb.mxu1 %v6892_v26  ;;  %v6796_v26 = vor.u32 %v7957_v17, %v6793_v13  ;;  %v8120_v17 = vld [vmem:[#allocation7 + $0xd8] sm:$0xff] }
 0x243   :  { %4498 = vmatpush.bf16.msrb.mxu2 %v7084_v28  ;;  %v6988_v28 = vor.u32 %v8005_v14, %v6985_v16  ;;  %v8111_v16 = vld [vmem:[#allocation7 + $0x90] sm:$0xff] }
 0x244   :  { %4511 = vmatpush.bf16.msrb.mxu3 %v7276_v30 }
 0x245   :  { %4473 = vmatpush.bf16.msrb.mxu0 %v6676_v38  ;;  %v4247_v30 = vpop.f32.mrf.mxu2  ;;  %v8047_v38 = vld [vmem:[#allocation4 + $0x1094] sm:$0xf] }
 0x246   :  { %4486 = vmatpush.bf16.msrb.mxu1 %v6868_v40  ;;  %v4260_v37 = vpop.f32.mrf.mxu3  ;;  %v7153_v40 = vld [vmem:[#allocation4 + $0x10a8] sm:$0xf0] }
 0x247   :  { %4499 = vmatpush.bf16.msrb.mxu2 %v7060_v39  ;;  %v6580_v39 = vor.u32 %v7903_v29, %v6577_v8  ;;  %v7156_v52 = vor.u32 %v8047_v38, %v7153_v40  ;;  %v8102_v29 = vld [vmem:[#allocation7 + $0x48] sm:$0xff]  ;;  %v8109_v37 = vld [vmem:[#allocation7 + $0x80] sm:$0xff]  ;;  %v8132_v40 = vld [vmem:[#allocation7 + $0x138] sm:$0xff] }
 0x248   :  { %4512 = vmatpush.bf16.msrb.mxu3 %v7252_v44  ;;  %v8100_v44 = vld [vmem:[#allocation7 + $0x38] sm:$0xff]  ;;  %v8110_v8 = vld [vmem:[#allocation7 + $0x88] sm:$0xff] }
 0x249   :  { %4474 = vmatpush.bf16.msrb.mxu0 %v6652_v54  ;;  %v8115_v54 = vld [vmem:[#allocation7 + $0xb0] sm:$0xff] }
 0x24a   :  { %4487 = vmatpush.bf16.msrb.mxu1 %v6844_v55  ;;  %v8123_v55 = vld [vmem:[#allocation7 + $0xf0] sm:$0xff] }
 0x24b   :  { %4500 = vmatpush.bf16.msrb.mxu2 %v7036_v1  ;;  %v8098_v1 = vld [vmem:[#allocation7 + $0x28] sm:$0xff] }
 0x24c   :  { %4513 = vmatpush.bf16.msrb.mxu3 %v7228_v59  ;;  %v8114_v59 = vld [vmem:[#allocation7 + $0xa8] sm:$0xff] }
 0x24d   :  { %4475 = vmatpush.bf16.msrb.mxu0 %v6628_v7  ;;  %v8121_v7 = vld [vmem:[#allocation7 + $0xe0] sm:$0xff] }
 0x24e   :  { %4488 = vmatpush.bf16.msrb.mxu1 %v6820_v43 }
 0x24f   :  { %4501 = vmatpush.bf16.msrb.mxu2 %v7012_v35  ;;  %v8104_v35 = vld [vmem:[#allocation7 + $0x58] sm:$0xff] }
 0x250   :  { %4514 = vmatpush.bf16.msrb.mxu3 %v7204_v12  ;;  %v8095_v12 = vld [vmem:[#allocation7 + $0x10] sm:$0xff] }
 0x251   :  { %4476 = vmatpush.bf16.msrb.mxu0 %v6604_v24  ;;  %v8119_v24 = vld [vmem:[#allocation7 + $0xd0] sm:$0xff] }
 0x252   :  { %4489 = vmatpush.bf16.msrb.mxu1 %v6796_v26  ;;  %v8094_v26 = vld [vmem:[#allocation7 + $0x8] sm:$0xff] }
 0x253   :  { %4502 = vmatpush.bf16.msrb.mxu2 %v6988_v28 }
 0x254   :  { %4515 = vmatpush.bf16.msrb.mxu3 %v7180_v31  ;;  %v8093_v31 = vld [vmem:[#allocation7] sm:$0xff] }
 0x255   :  { %4477 = vmatpush.bf16.msrb.mxu0 %v6580_v39 }
 0x256   :  { %4490 = vmatpush.bf16.msrb.mxu1 %v6772_v25  ;;  %v8499_v4 = vpop.f32.mrf.mxu1 }
 0x257   :  { %4503 = vmatpush.bf16.msrb.mxu2 %v6964_v41 }
 0x258   :  { %4516 = vmatpush.bf16.msrb.mxu3 %v7156_v52  ;;  %4478 = vmatmul.bf16.vlgmr.msrb.gmra.mxu0 %v8369_v18  ;;  %v4194_v18 = vadd.f32 %v8473_v62, %v8471_v48  ;;  %v4522_v48 = vpack.c.bf16 %v8406_v33, %v8406_v33  ;;  %v4523_v62 = vpack.c.bf16 %v8427_v61, %v8427_v61 }
 0x259   :  { %4934 = vmatpush.bf16.msra.mxu0 %v8100_v44  ;;  %4491 = vmatmul.bf16.vlgmr.msrb.gmra.mxu1 %v8373_v23  ;;  %v8097_v23 = vld [vmem:[#allocation7 + $0x20] sm:$0xff] }
 0x25a   :  { %4947 = vmatpush.bf16.msra.mxu1 %v8108_v46  ;;  %4504 = vmatmul.bf16.vlgmr.msrb.gmra.mxu2 %v8371_v22  ;;  %v4271_v22 = vpop.f32.mrf.mxu0  ;;  %v4207_v6 = vadd.f32 %v8475_v3, %v4194_v18  ;;  %v4528_v11 = vunpack.c.l.bf16 %v4522_v48  ;;  %v4529_v61 = vunpack.c.l.bf16 %v4523_v62 }
 0x25b   :  { %4960 = vmatpush.bf16.msra.mxu2 %v8116_v47  ;;  %4517 = vmatmul.bf16.vlgmr.msrb.gmra.mxu3 %v8375_v27  ;;  %v4220_v27 = vadd.f32 %v8481_v15, %v698_v56  ;;  %v4524_v15 = vpack.c.bf16 %v8450_v45, %v8450_v45  ;;  %v8131_v47 = vld [vmem:[#allocation7 + $0x130] sm:$0xff]  ;;  %v8129_v56 = vld [vmem:[#allocation7 + $0x120] sm:$0xff] }
 0x25c   :  { %4973 = vmatpush.bf16.msra.mxu3 %v8124_v49  ;;  %v4525_v10 = vpack.c.bf16 %v4207_v6, %v4207_v6  ;;  %8151 = vtanh.f32 %v4528_v11 }
 0x25d   :  { %4935 = vmatpush.bf16.msra.mxu0 %v8099_v50  ;;  %v4233_v43 = vadd.f32 %v8483_v42, %v4220_v27  ;;  %v8509_v3 = vpop.f32.mrf.mxu2  ;;  %v4530_v14 = vunpack.c.l.bf16 %v4524_v15  ;;  %v8103_v42 = vld [vmem:[#allocation7 + $0x50] sm:$0xff]  ;;  %8153 = vtanh.f32 %v4529_v61  ;;  %v8125_v15 = vld [vmem:[#allocation7 + $0x100] sm:$0xff]  ;;  %v8140_v61 = vld [vmem:[#allocation7 + $0x178] sm:$0xff] }
 0x25e   :  { %4948 = vmatpush.bf16.msra.mxu1 %v8107_v51  ;;  %v8511_v33 = vpop.f32.mrf.mxu3  ;;  %v4286_v19 = vpop.f32.mrf.mxu1  ;;  %v4531_v21 = vunpack.c.l.bf16 %v4525_v10  ;;  %v8130_v51 = vld [vmem:[#allocation7 + $0x128] sm:$0xff] }
 0x25f   :  { %4961 = vmatpush.bf16.msra.mxu2 %v8115_v54  ;;  %v4246_v45 = vadd.f32 %v8485_v58, %v4233_v43  ;;  %8155 = vtanh.f32 %v4530_v14  ;;  %v8139_v14 = vld [vmem:[#allocation7 + $0x170] sm:$0xff]  ;;  %v8137_v19 = vld [vmem:[#allocation7 + $0x160] sm:$0xff] }
 0x260   :  { %4974 = vmatpush.bf16.msra.mxu3 %v8123_v55  ;;  %8157 = vtanh.f32 %v4531_v21 }
 0x261   :  { %4936 = vmatpush.bf16.msra.mxu0 %v8098_v1  ;;  %v4259_v28 = vadd.f32 %v8487_v2, %v4246_v45  ;;  %v8117_v2 = vld [vmem:[#allocation7 + $0xc0] sm:$0xff]  ;;  %v699_v45 = vperm.slane %v8493_v53, 5 }
 0x262   :  { %4949 = vmatpush.bf16.msra.mxu1 %v8106_v57  ;;  %v4273_v13 = vpop.f32.mrf.mxu0  ;;  %v8152_v32 = vpop.eup %8151 }
 0x263   :  { %4962 = vmatpush.bf16.msra.mxu2 %v8114_v59  ;;  %v4272_v9 = vadd.f32 %v4271_v22, %v4259_v28  ;;  %v8154_v38 = vpop.eup %8153  ;;  %v4540_v41 = vpack.c.bf16 %v8152_v32, %v8152_v32  ;;  %v8128_v59 = vld [vmem:[#allocation7 + $0x118] sm:$0xff] }
 0x264   :  { %4975 = vmatpush.bf16.msra.mxu3 %v8122_v60  ;;  %v4541_v44 = vpack.c.bf16 %v8154_v38, %v8154_v38  ;;  %v8133_v38 = vld [vmem:[#allocation7 + $0x140] sm:$0xff] }
 0x265   :  { %4937 = vmatpush.bf16.msra.mxu0 %v8097_v23  ;;  %v4299_v58 = vpop.f32.mrf.mxu2  ;;  %v8156_v39 = vpop.eup %8155  ;;  %v4285_v52 = vadd.f32 %v8499_v4, %v4272_v9 }
 0x266   :  { %4950 = vmatpush.bf16.msra.mxu1 %v8105_v63  ;;  %v4312_v30 = vpop.f32.mrf.mxu3  ;;  %v8158_v25 = vpop.eup %8157  ;;  %v4542_v46 = vpack.c.bf16 %v8156_v39, %v8156_v39  ;;  %v8127_v63 = vld [vmem:[#allocation7 + $0x110] sm:$0xff] }
 0x267   :  { %4963 = vmatpush.bf16.msra.mxu2 %v8113_v0  ;;  %v4543_v49 = vpack.c.bf16 %v8158_v25, %v8158_v25  ;;  %v4298_v50 = vadd.f32 %v8509_v3, %v4285_v52 }
 0x268   :  { %4976 = vmatpush.bf16.msra.mxu3 %v8121_v7  ;;  %v8126_v7 = vld [vmem:[#allocation7 + $0x108] sm:$0xff] }
 0x269   :  { %4938 = vmatpush.bf16.msra.mxu0 %v8096_v5  ;;  %v4311_v54 = vadd.f32 %v8511_v33, %v4298_v50 }
 0x26a   :  { %4951 = vmatpush.bf16.msra.mxu1 %v8104_v35 }
 0x26b   :  { %4964 = vmatpush.bf16.msra.mxu2 %v8112_v20 }
 0x26c   :  { %4977 = vmatpush.bf16.msra.mxu3 %v8120_v17 }
 0x26d   :  { %4939 = vmatpush.bf16.msra.mxu0 %v8095_v12 }
 0x26e   :  { %4952 = vmatpush.bf16.msra.mxu1 %v8103_v42  ;;  %v8138_v42 = vld [vmem:[#allocation7 + $0x168] sm:$0xff] }
 0x26f   :  { %4965 = vmatpush.bf16.msra.mxu2 %v8111_v16 }
 0x270   :  { %4978 = vmatpush.bf16.msra.mxu3 %v8119_v24 }
 0x271   :  { %4940 = vmatpush.bf16.msra.mxu0 %v8094_v26 }
 0x272   :  { %4953 = vmatpush.bf16.msra.mxu1 %v8102_v29 }
 0x273   :  { %4966 = vmatpush.bf16.msra.mxu2 %v8110_v8  ;;  %v8136_v8 = vld [vmem:[#allocation7 + $0x158] sm:$0xff] }
 0x274   :  { %4979 = vmatpush.bf16.msra.mxu3 %v8118_v34 }
 0x275   :  { %4941 = vmatpush.bf16.msra.mxu0 %v8093_v31  ;;  %v4323_v55 = vpop.f32.mrf.mxu0  ;;  %v8135_v31 = vld [vmem:[#allocation7 + $0x150] sm:$0xff] }
 0x276   :  { %4954 = vmatpush.bf16.msra.mxu1 %v8101_v36  ;;  %v4336_v1 = vpop.f32.mrf.mxu1  ;;  %v4324_v57 = vadd.f32 %v4323_v55, %v4311_v54  ;;  %v8134_v36 = vld [vmem:[#allocation7 + $0x148] sm:$0xff] }
 0x277   :  { %4967 = vmatpush.bf16.msra.mxu2 %v8109_v37 }
 0x278   :  { %4980 = vmatpush.bf16.msra.mxu3 %v8117_v2  ;;  %4942 = vmatmul.bf16.vlgmr.msra.gmra.mxu0 %v4540_v41  ;;  %v4337_v18 = vadd.f32 %v4336_v1, %v4324_v57 }
 0x279   :  { %4986 = vmatpush.bf16.msrb.mxu0 %v8132_v40  ;;  %4955 = vmatmul.bf16.vlgmr.msra.gmra.mxu1 %v4541_v44 }
 0x27a   :  { %4968 = vmatmul.bf16.vlgmr.msra.gmra.mxu2 %v4542_v46  ;;  %4999 = vmatpush.bf16.msrb.mxu1 %v8140_v61 }
 0x27b   :  { %4981 = vmatmul.bf16.vlgmr.msra.gmra.mxu3 %v4543_v49 }
 0x27d   :  { %4987 = vmatpush.bf16.msrb.mxu0 %v8131_v47  ;;  %v4349_v60 = vpop.f32.mrf.mxu2  ;;  %v4325_v27 = vpop.f32.mrf.mxu0 }
 0x27e   :  { %v4350_v23 = vadd.f32 %v4349_v60, %v4337_v18  ;;  %v4362_v22 = vpop.f32.mrf.mxu3  ;;  %v4338_v0 = vpop.f32.mrf.mxu1  ;;  %5000 = vmatpush.bf16.msrb.mxu1 %v8139_v14  ;;  %v8150_v60 = vld [vmem:[#allocation9] ss:$0 sm:$0xff] }
 0x280   :  { %v4363_v4 = vadd.f32 %v4362_v22, %v4350_v23 }
 0x281   :  { %4988 = vmatpush.bf16.msrb.mxu0 %v8130_v51 }
 0x282   :  { %v4526_v6 = vpack.c.bf16 %v4363_v4, %v4363_v4  ;;  %5001 = vmatpush.bf16.msrb.mxu1 %v8138_v42 }
 0x284   :  { %v4532_v48 = vunpack.c.l.bf16 %v4526_v6 }
 0x285   :  { %4989 = vmatpush.bf16.msrb.mxu0 %v8129_v56  ;;  %v4351_v62 = vpop.f32.mrf.mxu2 }
 0x286   :  { %8159 = vtanh.f32 %v4532_v48  ;;  %v4364_v5 = vpop.f32.mrf.mxu3  ;;  %5002 = vmatpush.bf16.msrb.mxu1 %v8137_v19 }
 0x289   :  { %4990 = vmatpush.bf16.msrb.mxu0 %v8128_v59 }
 0x28a   :  { %5003 = vmatpush.bf16.msrb.mxu1 %v8136_v8 }
 0x28c   :  { %v8160_v43 = vpop.eup %8159 }
 0x28d   :  { %4991 = vmatpush.bf16.msrb.mxu0 %v8127_v63  ;;  %v4544_v35 = vpack.c.bf16 %v8160_v43, %v8160_v43 }
 0x28e   :  { %5004 = vmatpush.bf16.msrb.mxu1 %v8135_v31 }
 0x291   :  { %4992 = vmatpush.bf16.msrb.mxu0 %v8126_v7 }
 0x292   :  { %5005 = vmatpush.bf16.msrb.mxu1 %v8134_v36 }
 0x295   :  { %4993 = vmatpush.bf16.msrb.mxu0 %v8125_v15  ;;  %v4375_v20 = vpop.f32.mrf.mxu0 }
 0x296   :  { %v4388_v3 = vpop.f32.mrf.mxu1  ;;  %v4376_v21 = vadd.f32 %v4375_v20, %v699_v45  ;;  %5006 = vmatpush.bf16.msrb.mxu1 %v8133_v38 }
 0x298   :  { %4994 = vmatmul.bf16.vlgmr.msrb.gmra.mxu0 %v4544_v35  ;;  %v4389_v26 = vadd.f32 %v4388_v3, %v4376_v21 }
 0x29d   :  { %v4401_v10 = vpop.f32.mrf.mxu2  ;;  %v4377_v33 = vpop.f32.mrf.mxu0 }
 0x29e   :  { %v4414_v17 = vpop.f32.mrf.mxu3  ;;  %v4390_v11 = vpop.f32.mrf.mxu1  ;;  %v4402_v34 = vadd.f32 %v4401_v10, %v4389_v26 }
 0x2a0   :  { %v4415_v32 = vadd.f32 %v4414_v17, %v4402_v34 }
 0x2a5   :  { %v4403_v12 = vpop.f32.mrf.mxu2 }
 0x2a6   :  { %v4416_v13 = vpop.f32.mrf.mxu3 }
 0x2b5   :  { %v4427_v16 = vpop.f32.mrf.mxu0 }
 0x2b6   :  { %v4440_v24 = vpop.f32.mrf.mxu1  ;;  %v4428_v37 = vadd.f32 %v4427_v16, %v4415_v32 }
 0x2b8   :  { %v4441_v2 = vadd.f32 %v4440_v24, %v4428_v37 }
 0x2bd   :  { %v4453_v28 = vpop.f32.mrf.mxu2  ;;  %v4429_v58 = vpop.f32.mrf.mxu0 }
 0x2be   :  { %v4466_v29 = vpop.f32.mrf.mxu3  ;;  %v4442_v30 = vpop.f32.mrf.mxu1  ;;  %v4454_v40 = vadd.f32 %v4453_v28, %v4441_v2 }
 0x2c0   :  { %v4467_v39 = vadd.f32 %v4466_v29, %v4454_v40 }
 0x2c5   :  { %v4455_v9 = vpop.f32.mrf.mxu2 }
 0x2c6   :  { %v4468_v53 = vpop.f32.mrf.mxu3 }
 0x2d5   :  { %v4479_v25 = vpop.f32.mrf.mxu0 }
 0x2d6   :  { %v4492_v41 = vpop.f32.mrf.mxu1  ;;  %v4480_v52 = vadd.f32 %v4479_v25, %v4467_v39 }
 0x2d8   :  { %v4493_v44 = vadd.f32 %v4492_v41, %v4480_v52 }
 0x2dd   :  { %v4505_v46 = vpop.f32.mrf.mxu2  ;;  %v4481_v50 = vpop.f32.mrf.mxu0 }
 0x2de   :  { %v4506_v47 = vadd.f32 %v4505_v46, %v4493_v44  ;;  %v4518_v49 = vpop.f32.mrf.mxu3  ;;  %v4494_v51 = vpop.f32.mrf.mxu1 }
 0x2e0   :  { %v4519_v54 = vadd.f32 %v4518_v49, %v4506_v47 }
 0x2e2   :  { %v4527_v55 = vpack.c.bf16 %v4519_v54, %v4519_v54 }
 0x2e4   :  { %v4533_v1 = vunpack.c.l.bf16 %v4527_v55 }
 0x2e5   :  { %v4507_v56 = vpop.f32.mrf.mxu2 }
 0x2e6   :  { %8161 = vtanh.f32 %v4533_v1  ;;  %v4520_v57 = vpop.f32.mrf.mxu3 }
 0x2ec   :  { %v8162_v59 = vpop.eup %8161 }
 0x2ed   :  { %v4545_v18 = vpack.c.bf16 %v8162_v59, %v8162_v59 }
 0x2ef   :  { %5007 = vmatmul.bf16.vlgmr.msrb.gmra.mxu1 %v4545_v18 }
 0x2f5   :  { %v4943_v23 = vpop.f32.mrf.mxu0 }
 0x2f6   :  { %v4944_v22 = vadd.f32 %v8150_v60, %v4943_v23  ;;  %v4956_v27 = vpop.f32.mrf.mxu1 }
 0x2f8   :  { %v4957_v63 = vadd.f32 %v4956_v27, %v4944_v22 }
 0x2fd   :  { %v4969_v0 = vpop.f32.mrf.mxu2  ;;  %v4945_v7 = vpop.f32.mrf.mxu0 }
 0x2fe   :  { %v4970_v4 = vadd.f32 %v4969_v0, %v4957_v63  ;;  %v4982_v6 = vpop.f32.mrf.mxu3  ;;  %v4958_v48 = vpop.f32.mrf.mxu1 }
 0x300   :  { %v4983_v62 = vadd.f32 %v4982_v6, %v4970_v4 }
 0x305   :  { %v4971_v5 = vpop.f32.mrf.mxu2 }
 0x306   :  { %v4984_v15 = vpop.f32.mrf.mxu3 }
 0x315   :  { %v4995_v43 = vpop.f32.mrf.mxu0 }
 0x316   :  { %v4996_v35 = vadd.f32 %v4995_v43, %v4983_v62 }
 0x31d   :  { %v4997_v20 = vpop.f32.mrf.mxu0 }
 0x36c   :  { %v5008_v3 = vpop.f32.mrf.mxu1 }
 0x36d   :  { %v5009_v10 = vadd.f32 %v5008_v3, %v4996_v35 }
 0x36f   :  { %5013 = vst.msk [vmem:[%s8527_s5] sm:$0xff] %vm5012_vm0, %v5009_v10 }
 0x374   :  { %v5010_v17 = vpop.f32.mrf.mxu1 }
 0x375   :  { %5018 = vsyncpa [#allocation3], 1 }
 0x376   :  { %5019 = vsyncpa [#allocation5], 1 }
 0x377   :  { %5020 = vsyncpa [#allocation8], 1 }

</bundles_post_ra>
